<compile_context>
chip_gen: v6e
topology: v6e:2x2x1
jax: 0.10.0
libtpu: 0.0.40
codegen_flags: <defaults>
</compile_context>

<pallas_src>
import functools
import numpy as np
import jax
import jax.numpy as jnp
from jax.experimental import pallas as pl
from jax.experimental.pallas import tpu as pltpu

# ---------------- configuration (small synthetic sizes) ----------------
VOCAB = 50          # vocabulary of the synthetic Electra base model
EMB = 16            # Electra embedding_size (projected to hidden)
HID = 32            # hidden_feats == in_feats of the global model
OUT_FEATS = 4       # classifier output
NHEAD_LOCAL = 4     # local (Electra) layer heads  -> head dim 8
NHEAD_GLOBAL = 8    # GlobalEncoder nhead=8        -> head dim 4
NUM_LAYERS = 2      # number of local layers == number of global layers
MAX_POS = 16        # position-embedding table of the local model
FF_LOCAL = 4 * HID
FF_GLOBAL = 4 * HID  # GlobalEncoder dim_feedforward = in_feats * 4


# ---------------- generic row-tiled pallas_call helper ----------------

def _row_call(kernel, row_args, rep_args, n_out, *, block_rows=256):
    """Run kernel(row_refs..., rep_refs..., o_ref) over a 1-D grid of row blocks.

    row_args: 2-D [M, *] arrays tiled along rows (all row-wise independent ops).
    rep_args: weights / biases / LN params, replicated to every block.
    """
    M = row_args[0].shape[0]
    bm = M if M <= block_rows else block_rows
    grid = (pl.cdiv(M, bm),)
    in_specs = []
    for a in row_args:
        in_specs.append(pl.BlockSpec((bm, a.shape[1]), lambda i: (i, 0)))
    for a in rep_args:
        in_specs.append(pl.BlockSpec(a.shape, lambda i, nd=a.ndim: (0,) * nd))
    return pl.pallas_call(
        kernel,
        grid=grid,
        in_specs=in_specs,
        out_specs=pl.BlockSpec((bm, n_out), lambda i: (i, 0)),
        out_shape=jax.ShapeDtypeStruct((M, n_out), jnp.float32),
        compiler_params=pltpu.CompilerParams(dimension_semantics=("parallel",)),
    )(*row_args, *rep_args)


# ---------------- Pallas kernels ----------------

def _activate(y, act):
    if act == "gelu":
        # TODO(synk): HF Electra uses exact erf-GELU; tanh approximation used for
        # guaranteed Mosaic lowering (small numeric drift vs the PyTorch reference).
        return jax.nn.gelu(y, approximate=True)
    if act == "relu":
        return jnp.maximum(y, 0.0)
    return y


def _linear_kernel(x_ref, w_ref, b_ref, o_ref, *, act):
    y = jnp.dot(x_ref[...], w_ref[...], preferred_element_type=jnp.float32) + b_ref[...]
    o_ref[...] = _activate(y, act)


def _linear_res_ln_kernel(x_ref, r_ref, w_ref, b_ref, g_ref, beta_ref, o_ref, *, eps):
    """LayerNorm(x @ W + b + residual)  -- fused attention-output block."""
    y = jnp.dot(x_ref[...], w_ref[...], preferred_element_type=jnp.float32) + b_ref[...]
    y = y + r_ref[...]
    mu = jnp.mean(y, axis=-1, keepdims=True)
    yc = y - mu
    var = jnp.mean(yc * yc, axis=-1, keepdims=True)
    o_ref[...] = yc * jax.lax.rsqrt(var + eps) * g_ref[...] + beta_ref[...]


def _ffn_ln_kernel(x_ref, w1_ref, b1_ref, w2_ref, b2_ref, g_ref, beta_ref, o_ref, *, act, eps):
    """LayerNorm(act(x @ W1 + b1) @ W2 + b2 + x)  -- fused feed-forward block."""
    x = x_ref[...]
    h = jnp.dot(x, w1_ref[...], preferred_element_type=jnp.float32) + b1_ref[...]
    h = _activate(h, act)
    y = jnp.dot(h, w2_ref[...], preferred_element_type=jnp.float32) + b2_ref[...] + x
    mu = jnp.mean(y, axis=-1, keepdims=True)
    yc = y - mu
    var = jnp.mean(yc * yc, axis=-1, keepdims=True)
    o_ref[...] = yc * jax.lax.rsqrt(var + eps) * g_ref[...] + beta_ref[...]


def _ln_linear_kernel(x_ref, g_ref, beta_ref, w_ref, b_ref, o_ref, *, eps):
    """LayerNorm(x) @ W + b  -- fused Electra embedding LN + projection."""
    x = x_ref[...]
    mu = jnp.mean(x, axis=-1, keepdims=True)
    xc = x - mu
    var = jnp.mean(xc * xc, axis=-1, keepdims=True)
    xn = xc * jax.lax.rsqrt(var + eps) * g_ref[...] + beta_ref[...]
    o_ref[...] = jnp.dot(xn, w_ref[...], preferred_element_type=jnp.float32) + b_ref[...]


def _mha_kernel(q_ref, k_ref, v_ref, m_ref, o_ref, *, nhead, scale):
    """One batch element: multi-head attention with additive mask.
    Heads stay folded in the hidden dim; split in-kernel (static slices)."""
    q = q_ref[0]          # [Lq, H]
    k = k_ref[0]          # [Lk, H]
    v = v_ref[0]          # [Lk, H]
    m = m_ref[0]          # [Lq_m, Lk], Lq_m in {1, Lq}, broadcast over heads/queries
    H = q.shape[-1]
    Dh = H // nhead
    outs = []
    for h in range(nhead):
        sl = slice(h * Dh, (h + 1) * Dh)
        s = jax.lax.dot_general(q[:, sl], k[:, sl], (((1,), (1,)), ((), ())),
                                preferred_element_type=jnp.float32)
        s = s * scale + m
        s = s - jnp.max(s, axis=-1, keepdims=True)
        p = jnp.exp(s)
        p = p * pl.reciprocal(jnp.sum(p, axis=-1, keepdims=True), approx=True)
        outs.append(jnp.dot(p, v[:, sl], preferred_element_type=jnp.float32))
    o_ref[0] = jnp.concatenate(outs, axis=-1)   # single full-width store


# ---------------- kernel wrappers ----------------

def linear(x2, W, b, act="none"):
    return _row_call(functools.partial(_linear_kernel, act=act),
                     [x2], [W, b.reshape(1, -1)], W.shape[1])


def linear_residual_ln(x2, res2, W, b, g, beta, eps):
    return _row_call(functools.partial(_linear_res_ln_kernel, eps=eps),
                     [x2, res2],
                     [W, b.reshape(1, -1), g.reshape(1, -1), beta.reshape(1, -1)],
                     W.shape[1])


def ffn_ln(x2, W1, b1, W2, b2, g, beta, act, eps):
    return _row_call(functools.partial(_ffn_ln_kernel, act=act, eps=eps),
                     [x2],
                     [W1, b1.reshape(1, -1), W2, b2.reshape(1, -1),
                      g.reshape(1, -1), beta.reshape(1, -1)],
                     W2.shape[1])


def ln_linear(x2, g, beta, W, b, eps):
    return _row_call(functools.partial(_ln_linear_kernel, eps=eps),
                     [x2],
                     [g.reshape(1, -1), beta.reshape(1, -1), W, b.reshape(1, -1)],
                     W.shape[1])


def mha(q, k, v, mask, nhead, scale):
    """q: [B, Lq, H], k/v: [B, Lk, H], mask: [B, Lq_m, Lk] additive float mask."""
    B, Lq, H = q.shape
    Lk = k.shape[1]
    Lm = mask.shape[1]
    return pl.pallas_call(
        functools.partial(_mha_kernel, nhead=nhead, scale=scale),
        grid=(B,),
        in_specs=[pl.BlockSpec((1, Lq, H), lambda i: (i, 0, 0)),
                  pl.BlockSpec((1, Lk, H), lambda i: (i, 0, 0)),
                  pl.BlockSpec((1, Lk, H), lambda i: (i, 0, 0)),
                  pl.BlockSpec((1, Lm, Lk), lambda i: (i, 0, 0))],
        out_specs=pl.BlockSpec((1, Lq, H), lambda i: (i, 0, 0)),
        out_shape=jax.ShapeDtypeStruct((B, Lq, H), jnp.float32),
        compiler_params=pltpu.CompilerParams(dimension_semantics=("parallel",)),
    )(q, k, v, mask)


# ---------------- device-side forward (one jit, all static shapes) ----------------

@jax.jit
def _device_forward(params, xs_j, gather_pos, valid, pack_ex, pack_pos, unpack_pos,
                    local_key_mask, l2g_mask, g2l_mask, global_mask):
    B, S = xs_j.shape
    L_max = gather_pos.shape[1]
    L_total = pack_ex.shape[0]
    scale_l = 1.0 / float(np.sqrt(HID // NHEAD_LOCAL))
    scale_g = 1.0 / float(np.sqrt(HID // NHEAD_GLOBAL))

    # --- Electra embeddings (word + position + token-type) -> fused LN + projection ---
    emb = (params["emb_word"][xs_j]
           + params["emb_pos"][:S][None, :, :]
           + params["emb_tok"][0][None, None, :])
    embed_xs = ln_linear(emb.reshape(B * S, EMB), params["emb_ln_g"], params["emb_ln_b"],
                         params["proj_W"], params["proj_b"], eps=1e-12).reshape(B, S, HID)

    global_tokens = embed_xs[:, 0:1, :]                              # [B, 1, H]
    row_idx = jnp.arange(B)[:, None]
    # padded ragged layout: [B, L_max, H]; pad rows kept at exactly 0
    local_padded = embed_xs[:, 1:, :][row_idx, gather_pos] * valid[:, :, None]

    for li in range(NUM_LAYERS):
        lp = params["local_layers"][li]
        gp = params["global_layers"][li]

        # 1) per-example local self-attention, batched over the padded tensor;
        #    padded keys masked with -10000 (== no-padding result in f32).
        qkv_l = linear(local_padded.reshape(B * L_max, HID), lp["qkv_W"], lp["qkv_b"])
        ql, kl, vl = jnp.split(qkv_l.reshape(B, L_max, 3 * HID), 3, axis=-1)
        ctx = mha(ql, kl, vl, local_key_mask, NHEAD_LOCAL, scale_l)
        a = linear_residual_ln(ctx.reshape(B * L_max, HID),
                               local_padded.reshape(B * L_max, HID),
                               lp["ao_W"], lp["ao_b"], lp["ao_ln_g"], lp["ao_ln_b"], eps=1e-12)
        local_padded = ffn_ln(a, lp["i_W"], lp["i_b"], lp["o_W"], lp["o_b"],
                              lp["o_ln_g"], lp["o_ln_b"], act="gelu", eps=1e-12)
        local_padded = local_padded.reshape(B, L_max, HID) * valid[:, :, None]

        # pack every example's valid tokens -> [L_total, H]; build long_tokens
        local_cat = local_padded[pack_ex, pack_pos]                  # [L_total, H]
        long_tokens = jnp.concatenate(
            [global_tokens, jnp.broadcast_to(local_cat[None], (B, L_total, HID))], axis=1)

        # one fused QKV projection of long_tokens serves BOTH hooked passes
        qkv = linear(long_tokens.reshape(B * (1 + L_total), HID), lp["qkv_W"], lp["qkv_b"])
        q_all, k_all, v_all = jnp.split(qkv.reshape(B, 1 + L_total, 3 * HID), 3, axis=-1)

        # 2) Hook(l2g=True): Q = long part, K/V = global token, residual = global token.
        #    The reference adds the permuted mask over query rows; with a single key the
        #    softmax is 1 regardless, so a zero mask is numerically identical.
        ctx = mha(q_all[:, 1:], k_all[:, 0:1], v_all[:, 0:1], l2g_mask, NHEAD_LOCAL, scale_l)
        res = jnp.broadcast_to(global_tokens, (B, L_total, HID)).reshape(B * L_total, HID)
        a = linear_residual_ln(ctx.reshape(B * L_total, HID), res,
                               lp["ao_W"], lp["ao_b"], lp["ao_ln_g"], lp["ao_ln_b"], eps=1e-12)
        local_tokens_ = ffn_ln(a, lp["i_W"], lp["i_b"], lp["o_W"], lp["o_b"],
                               lp["o_ln_g"], lp["o_ln_b"], act="gelu", eps=1e-12)
        local_tokens_ = local_tokens_.reshape(B, L_total, HID)
        # re-slice each example's own segment back into the padded layout
        local_padded = local_tokens_[row_idx, unpack_pos] * valid[:, :, None]

        # 3) Hook(l2g=False): Q = global token, K/V = long part, residual = global token,
        #    attention mask = extended long_tokens_mask  [B, 1, L_total]
        ctx_g = mha(q_all[:, 0:1], k_all[:, 1:], v_all[:, 1:], g2l_mask, NHEAD_LOCAL, scale_l)
        a_g = linear_residual_ln(ctx_g.reshape(B, HID), global_tokens.reshape(B, HID),
                                 lp["ao_W"], lp["ao_b"], lp["ao_ln_g"], lp["ao_ln_b"], eps=1e-12)
        g = ffn_ln(a_g, lp["i_W"], lp["i_b"], lp["o_W"], lp["o_b"],
                   lp["o_ln_g"], lp["o_ln_b"], act="gelu", eps=1e-12)
        global_tokens = g.reshape(B, 1, HID)

        if li == 0:
            # PositionalEncoding over [seq=B, batch=1, H]; dropout identity in eval
            global_tokens = global_tokens + params["pe"][:B]

        # 4) global transformer layer: [B,1,H] read as [seq=B, batch=1, H]
        x = global_tokens.reshape(B, HID)
        qkv_g = linear(x, gp["in_W"], gp["in_b"])                    # [B, 3H]
        qg, kg, vg = jnp.split(qkv_g, 3, axis=-1)
        ctx2 = mha(qg[None], kg[None], vg[None], global_mask, NHEAD_GLOBAL, scale_g)[0]
        x = linear_residual_ln(ctx2, x, gp["op_W"], gp["op_b"],
                               gp["ln1_g"], gp["ln1_b"], eps=1e-5)
        x = ffn_ln(x, gp["l1_W"], gp["l1_b"], gp["l2_W"], gp["l2_b"],
                   gp["ln2_g"], gp["ln2_b"], act="relu", eps=1e-5)
        global_tokens = x.reshape(B, 1, HID)

    out = linear(global_tokens.reshape(B, HID), params["cls_W"], params["cls_b"])
    return out.reshape(B, 1, OUT_FEATS)


# ---------------- host wrapper (data-dependent filtering & ragged bookkeeping) ----------------

def electra_etc_forward(params, xs):
    # Host-side, executed ONCE per forward (data-dependent shapes; no per-layer numpy).
    xs_np = np.asarray(xs)
    xs_np = xs_np[xs_np.sum(axis=1) > 0]              # xs = xs[xs.sum(axis=1) > 0]
    B, S = xs_np.shape
    attention_mask = xs_np[:, 1:] > 0                 # [B, S-1] bool
    lens = attention_mask.sum(axis=1).astype(np.int64)
    L_max = int(lens.max())
    L_total = int(lens.sum())
    accu = np.cumsum(lens)                            # attention_mask_accu_lens

    gather_pos = np.zeros((B, L_max), np.int32)       # padded <- original positions
    valid = np.zeros((B, L_max), np.float32)
    pack_ex = np.zeros((L_total,), np.int32)          # packed <- padded
    pack_pos = np.zeros((L_total,), np.int32)
    unpack_pos = np.zeros((B, L_max), np.int32)       # padded <- packed (own segment)
    j = 0
    for i in range(B):
        nz = np.nonzero(attention_mask[i])[0]
        li = int(lens[i])
        if li > 0:
            gather_pos[i, :li] = nz
            gather_pos[i, li:] = nz[-1]
            valid[i, :li] = 1.0
        start = int(accu[i] - lens[i])
        for p in range(li):
            pack_ex[j] = i
            pack_pos[j] = p
            j += 1
        unpack_pos[i, :li] = start + np.arange(li)
        unpack_pos[i, li:] = start + max(li - 1, 0)

    ltm = np.zeros((B, L_total), np.float32)          # long_tokens_mask
    for i in range(B):
        ltm[i, :int(accu[i])] = 1.0

    local_key_mask = jnp.asarray(((1.0 - valid) * -10000.0)[:, None, :])   # [B,1,L_max]
    g2l_mask = jnp.asarray(((1.0 - ltm) * -10000.0)[:, None, :])           # [B,1,L_total]
    l2g_mask = jnp.zeros((B, 1, 1), jnp.float32)                           # single-key softmax
    # Faithful to the PyTorch reference: tril(ones) is ADDED as a float mask (+1 in the
    # lower triangle, 0 above) -- it does not actually mask anything. Reproduced as-is.
    global_mask = jnp.asarray(np.tril(np.ones((B, B), np.float32)))[None]  # [1,B,B]

    return _device_forward(params, jnp.asarray(xs_np), jnp.asarray(gather_pos),
                           jnp.asarray(valid), jnp.asarray(pack_ex), jnp.asarray(pack_pos),
                           jnp.asarray(unpack_pos), local_key_mask, l2g_mask,
                           g2l_mask, global_mask)


# ---------------- parameter init (deterministic, synthetic) ----------------

def positional_encoding(d_model, max_len):
    position = np.arange(max_len)[:, None].astype(np.float64)
    div_term = np.exp(np.arange(0, d_model, 2) * (-np.log(10000.0) / d_model))
    pe = np.zeros((max_len, 1, d_model), np.float32)
    pe[:, 0, 0::2] = np.sin(position * div_term)
    pe[:, 0, 1::2] = np.cos(position * div_term)
    return jnp.asarray(pe)


def init_params(key):
    keys = iter(jax.random.split(key, 256))

    def nrm(shape, scale=0.02):
        return scale * jax.random.normal(next(keys), shape, jnp.float32)

    def zeros(shape):
        return jnp.zeros(shape, jnp.float32)

    def ones(shape):
        return jnp.ones(shape, jnp.float32)

    p = {
        "emb_word": nrm((VOCAB, EMB)),
        "emb_pos": nrm((MAX_POS, EMB)),
        "emb_tok": nrm((2, EMB)),
        "emb_ln_g": ones((EMB,)), "emb_ln_b": zeros((EMB,)),
        "proj_W": nrm((EMB, HID)), "proj_b": zeros((HID,)),
        "pe": positional_encoding(HID, 64),
        "cls_W": nrm((HID, OUT_FEATS)), "cls_b": zeros((OUT_FEATS,)),
        "local_layers": [], "global_layers": [],
    }
    for _ in range(NUM_LAYERS):
        p["local_layers"].append({
            # fused Q/K/V projection: columns [0:H]=Q, [H:2H]=K, [2H:3H]=V
            "qkv_W": nrm((HID, 3 * HID)), "qkv_b": zeros((3 * HID,)),
            "ao_W": nrm((HID, HID)), "ao_b": zeros((HID,)),
            "ao_ln_g": ones((HID,)), "ao_ln_b": zeros((HID,)),
            "i_W": nrm((HID, FF_LOCAL)), "i_b": zeros((FF_LOCAL,)),
            "o_W": nrm((FF_LOCAL, HID)), "o_b": zeros((HID,)),
            "o_ln_g": ones((HID,)), "o_ln_b": zeros((HID,)),
        })
        p["global_layers"].append({
            "in_W": nrm((HID, 3 * HID)), "in_b": zeros((3 * HID,)),
            "op_W": nrm((HID, HID)), "op_b": zeros((HID,)),
            "l1_W": nrm((HID, FF_GLOBAL)), "l1_b": zeros((FF_GLOBAL,)),
            "l2_W": nrm((FF_GLOBAL, HID)), "l2_b": zeros((HID,)),
            "ln1_g": ones((HID,)), "ln1_b": zeros((HID,)),
            "ln2_g": ones((HID,)), "ln2_b": zeros((HID,)),
        })
    return p


# ---------------- main ----------------

if __name__ == "__main__":
    key = jax.random.PRNGKey(0)
    params = init_params(key)

    # Build xs: [4, 9] int32 token ids; last row is all zeros and gets filtered
    # by `xs[xs.sum(axis=1) > 0]`. Kept rows have 5 / 3 / 7 valid local tokens.
    S = 9
    lens = [5, 3, 7]
    tok_key = jax.random.split(key, 3)[2]
    toks = np.asarray(jax.random.randint(tok_key, (3, S), 1, VOCAB), dtype=np.int32)
    xs = np.zeros((4, S), np.int32)
    for r, l in enumerate(lens):
        xs[r, 0] = toks[r, 0]               # "CLS" / global token
        xs[r, 1:1 + l] = toks[r, 1:1 + l]   # local tokens; rest stay 0 (padding)
    # xs[3] stays all-zero -> filtered out

    out = electra_etc_forward(params, xs)
    out = jax.block_until_ready(out)
    assert out.shape == (3, 1, OUT_FEATS), out.shape
    assert bool(jnp.all(jnp.isfinite(out)))
    print("KERNEL_OK")
</pallas_src>

<mosaic_0001>
module attributes {stable_mosaic.version = 11 : i64} {
  func.func @_ln_linear_kernel(%arg0: i32, %arg1: memref<27x16xf32, #tpu.memory_space<vmem>>, %arg2: memref<1x16xf32, #tpu.memory_space<vmem>>, %arg3: memref<1x16xf32, #tpu.memory_space<vmem>>, %arg4: memref<16x32xf32, #tpu.memory_space<vmem>>, %arg5: memref<1x32xf32, #tpu.memory_space<vmem>>, %arg6: memref<27x32xf32, #tpu.memory_space<vmem>>) attributes {dimension_semantics = [#tpu.dimension_semantics<parallel>], iteration_bounds = array<i64: 1>, scalar_prefetch = 0 : i64, scratch_operands = 0 : i64, tpu.core_type = #tpu.core_type<tc>, window_params = [{transform_indices = @transform_0, window_bounds = array<i64: 27, 16>}, {pipeline_mode = #tpu.pipeline_mode<synchronous>, transform_indices = @transform_1, window_bounds = array<i64: 1, 16>}, {pipeline_mode = #tpu.pipeline_mode<synchronous>, transform_indices = @transform_2, window_bounds = array<i64: 1, 16>}, {pipeline_mode = #tpu.pipeline_mode<synchronous>, transform_indices = @transform_3, window_bounds = array<i64: 16, 32>}, {pipeline_mode = #tpu.pipeline_mode<synchronous>, transform_indices = @transform_4, window_bounds = array<i64: 1, 32>}, {transform_indices = @transform_5, window_bounds = array<i64: 27, 32>}]} {
    %c0 = arith.constant 0 : index
    %c0_0 = arith.constant 0 : index
    %0 = vector.load %arg1[%c0, %c0_0] : memref<27x16xf32, #tpu.memory_space<vmem>>, vector<27x16xf32>
    %cst = arith.constant dense<0.000000e+00> : vector<27xf32>
    %1 = vector.multi_reduction <add>, %0, %cst [1] : vector<27x16xf32> to vector<27xf32>
    %2 = vector.shape_cast %1 : vector<27xf32> to vector<27x1xf32>
    %cst_1 = arith.constant 1.600000e+01 : f32
    %3 = vector.broadcast %cst_1 : f32 to vector<27x1xf32>
    %4 = arith.divf %2, %3 : vector<27x1xf32>
    %5 = vector.broadcast %4 : vector<27x1xf32> to vector<27x16xf32>
    %6 = arith.subf %0, %5 : vector<27x16xf32>
    %7 = arith.mulf %6, %6 : vector<27x16xf32>
    %cst_2 = arith.constant dense<0.000000e+00> : vector<27xf32>
    %8 = vector.multi_reduction <add>, %7, %cst_2 [1] : vector<27x16xf32> to vector<27xf32>
    %9 = vector.shape_cast %8 : vector<27xf32> to vector<27x1xf32>
    %cst_3 = arith.constant 1.600000e+01 : f32
    %10 = vector.broadcast %cst_3 : f32 to vector<27x1xf32>
    %11 = arith.divf %9, %10 : vector<27x1xf32>
    %cst_4 = arith.constant 9.99999996E-13 : f32
    %12 = vector.broadcast %cst_4 : f32 to vector<27x1xf32>
    %13 = arith.addf %11, %12 : vector<27x1xf32>
    %14 = math.rsqrt %13 : vector<27x1xf32>
    %15 = vector.broadcast %14 : vector<27x1xf32> to vector<27x16xf32>
    %16 = arith.mulf %6, %15 : vector<27x16xf32>
    %c0_5 = arith.constant 0 : index
    %c0_6 = arith.constant 0 : index
    %17 = vector.load %arg2[%c0_5, %c0_6] : memref<1x16xf32, #tpu.memory_space<vmem>>, vector<1x16xf32>
    %18 = vector.broadcast %17 : vector<1x16xf32> to vector<27x16xf32>
    %19 = arith.mulf %16, %18 : vector<27x16xf32>
    %c0_7 = arith.constant 0 : index
    %c0_8 = arith.constant 0 : index
    %20 = vector.load %arg3[%c0_7, %c0_8] : memref<1x16xf32, #tpu.memory_space<vmem>>, vector<1x16xf32>
    %21 = vector.broadcast %20 : vector<1x16xf32> to vector<27x16xf32>
    %22 = arith.addf %19, %21 : vector<27x16xf32>
    %c0_9 = arith.constant 0 : index
    %c0_10 = arith.constant 0 : index
    %23 = vector.load %arg4[%c0_9, %c0_10] : memref<16x32xf32, #tpu.memory_space<vmem>>, vector<16x32xf32>
    %cst_11 = arith.constant dense<0.000000e+00> : vector<27x32xf32>
    %24 = tpu.matmul %22, %23, %cst_11 {dimension_numbers = #tpu.dot_dimension_numbers<[1], [0], [0], [1], [0, 0, 1, 1], [], []>} : vector<27x16xf32>, vector<16x32xf32>, vector<27x32xf32> -> vector<27x32xf32>
    %c0_12 = arith.constant 0 : index
    %c0_13 = arith.constant 0 : index
    %25 = vector.load %arg5[%c0_12, %c0_13] : memref<1x32xf32, #tpu.memory_space<vmem>>, vector<1x32xf32>
    %26 = vector.broadcast %25 : vector<1x32xf32> to vector<27x32xf32>
    %27 = arith.addf %24, %26 : vector<27x32xf32>
    %c0_14 = arith.constant 0 : index
    %c0_15 = arith.constant 0 : index
    %28 = vector.load %arg6[%c0_14, %c0_15] : memref<27x32xf32, #tpu.memory_space<vmem>>, vector<27x32xf32>
    tpu.vector_store %arg6[%c0_14, %c0_15], %27 {strides = array<i32>} : memref<27x32xf32, #tpu.memory_space<vmem>>, vector<27x32xf32>,
    return
  }
  func.func @transform_0(%arg0: i32) -> (i32, i32) {
    %c0_i32 = arith.constant 0 : i32
    %c0_i32_0 = arith.constant 0 : i32
    return %arg0, %c0_i32 : i32, i32
  }
  func.func @transform_1(%arg0: i32) -> (i32, i32) {
    %c0_i32 = arith.constant 0 : i32
    %c0_i32_0 = arith.constant 0 : i32
    %c0_i32_1 = arith.constant 0 : i32
    return %c0_i32, %c0_i32_0 : i32, i32
  }
  func.func @transform_2(%arg0: i32) -> (i32, i32) {
    %c0_i32 = arith.constant 0 : i32
    %c0_i32_0 = arith.constant 0 : i32
    %c0_i32_1 = arith.constant 0 : i32
    return %c0_i32, %c0_i32_0 : i32, i32
  }
  func.func @transform_3(%arg0: i32) -> (i32, i32) {
    %c0_i32 = arith.constant 0 : i32
    %c0_i32_0 = arith.constant 0 : i32
    %c0_i32_1 = arith.constant 0 : i32
    return %c0_i32, %c0_i32_0 : i32, i32
  }
  func.func @transform_4(%arg0: i32) -> (i32, i32) {
    %c0_i32 = arith.constant 0 : i32
    %c0_i32_0 = arith.constant 0 : i32
    %c0_i32_1 = arith.constant 0 : i32
    return %c0_i32, %c0_i32_0 : i32, i32
  }
  func.func @transform_5(%arg0: i32) -> (i32, i32) {
    %c0_i32 = arith.constant 0 : i32
    %c0_i32_0 = arith.constant 0 : i32
    return %arg0, %c0_i32 : i32, i32
  }
}

module attributes {stable_mosaic.version = 11 : i64} {
  func.func @_linear_kernel(%arg0: i32, %arg1: memref<21x32xf32, #tpu.memory_space<vmem>>, %arg2: memref<32x96xf32, #tpu.memory_space<vmem>>, %arg3: memref<1x96xf32, #tpu.memory_space<vmem>>, %arg4: memref<21x96xf32, #tpu.memory_space<vmem>>) attributes {dimension_semantics = [#tpu.dimension_semantics<parallel>], iteration_bounds = array<i64: 1>, scalar_prefetch = 0 : i64, scratch_operands = 0 : i64, tpu.core_type = #tpu.core_type<tc>, window_params = [{transform_indices = @transform_0, window_bounds = array<i64: 21, 32>}, {pipeline_mode = #tpu.pipeline_mode<synchronous>, transform_indices = @transform_1, window_bounds = array<i64: 32, 96>}, {pipeline_mode = #tpu.pipeline_mode<synchronous>, transform_indices = @transform_2, window_bounds = array<i64: 1, 96>}, {transform_indices = @transform_3, window_bounds = array<i64: 21, 96>}]} {
    %c0 = arith.constant 0 : index
    %c0_0 = arith.constant 0 : index
    %0 = vector.load %arg1[%c0, %c0_0] : memref<21x32xf32, #tpu.memory_space<vmem>>, vector<21x32xf32>
    %c0_1 = arith.constant 0 : index
    %c0_2 = arith.constant 0 : index
    %1 = vector.load %arg2[%c0_1, %c0_2] : memref<32x96xf32, #tpu.memory_space<vmem>>, vector<32x96xf32>
    %cst = arith.constant dense<0.000000e+00> : vector<21x96xf32>
    %2 = tpu.matmul %0, %1, %cst {dimension_numbers = #tpu.dot_dimension_numbers<[1], [0], [0], [1], [0, 0, 1, 1], [], []>} : vector<21x32xf32>, vector<32x96xf32>, vector<21x96xf32> -> vector<21x96xf32>
    %c0_3 = arith.constant 0 : index
    %c0_4 = arith.constant 0 : index
    %3 = vector.load %arg3[%c0_3, %c0_4] : memref<1x96xf32, #tpu.memory_space<vmem>>, vector<1x96xf32>
    %4 = vector.broadcast %3 : vector<1x96xf32> to vector<21x96xf32>
    %5 = arith.addf %2, %4 : vector<21x96xf32>
    %c0_5 = arith.constant 0 : index
    %c0_6 = arith.constant 0 : index
    %6 = vector.load %arg4[%c0_5, %c0_6] : memref<21x96xf32, #tpu.memory_space<vmem>>, vector<21x96xf32>
    tpu.vector_store %arg4[%c0_5, %c0_6], %5 {strides = array<i32>} : memref<21x96xf32, #tpu.memory_space<vmem>>, vector<21x96xf32>,
    return
  }
  func.func @transform_0(%arg0: i32) -> (i32, i32) {
    %c0_i32 = arith.constant 0 : i32
    %c0_i32_0 = arith.constant 0 : i32
    return %arg0, %c0_i32 : i32, i32
  }
  func.func @transform_1(%arg0: i32) -> (i32, i32) {
    %c0_i32 = arith.constant 0 : i32
    %c0_i32_0 = arith.constant 0 : i32
    %c0_i32_1 = arith.constant 0 : i32
    return %c0_i32, %c0_i32_0 : i32, i32
  }
  func.func @transform_2(%arg0: i32) -> (i32, i32) {
    %c0_i32 = arith.constant 0 : i32
    %c0_i32_0 = arith.constant 0 : i32
    %c0_i32_1 = arith.constant 0 : i32
    return %c0_i32, %c0_i32_0 : i32, i32
  }
  func.func @transform_3(%arg0: i32) -> (i32, i32) {
    %c0_i32 = arith.constant 0 : i32
    %c0_i32_0 = arith.constant 0 : i32
    return %arg0, %c0_i32 : i32, i32
  }
}

module attributes {stable_mosaic.version = 11 : i64} {
  func.func @_mha_kernel(%arg0: i32, %arg1: memref<1x7x32xf32, #tpu.memory_space<vmem>>, %arg2: memref<1x7x32xf32, #tpu.memory_space<vmem>>, %arg3: memref<1x7x32xf32, #tpu.memory_space<vmem>>, %arg4: memref<1x1x7xf32, #tpu.memory_space<vmem>>, %arg5: memref<1x7x32xf32, #tpu.memory_space<vmem>>) attributes {dimension_semantics = [#tpu.dimension_semantics<parallel>], iteration_bounds = array<i64: 3>, scalar_prefetch = 0 : i64, scratch_operands = 0 : i64, tpu.core_type = #tpu.core_type<tc>, window_params = [{transform_indices = @transform_0, window_bounds = array<i64: 1, 7, 32>}, {transform_indices = @transform_1, window_bounds = array<i64: 1, 7, 32>}, {transform_indices = @transform_2, window_bounds = array<i64: 1, 7, 32>}, {transform_indices = @transform_3, window_bounds = array<i64: 1, 1, 7>}, {transform_indices = @transform_4, window_bounds = array<i64: 1, 7, 32>}]} {
    %c0 = arith.constant 0 : index
    %c0_0 = arith.constant 0 : index
    %c0_1 = arith.constant 0 : index
    %0 = vector.load %arg1[%c0, %c0_0, %c0_1] : memref<1x7x32xf32, #tpu.memory_space<vmem>>, vector<1x7x32xf32>
    %1 = vector.shape_cast %0 : vector<1x7x32xf32> to vector<7x32xf32>
    %c0_2 = arith.constant 0 : index
    %c0_3 = arith.constant 0 : index
    %c0_4 = arith.constant 0 : index
    %2 = vector.load %arg2[%c0_2, %c0_3, %c0_4] : memref<1x7x32xf32, #tpu.memory_space<vmem>>, vector<1x7x32xf32>
    %3 = vector.shape_cast %2 : vector<1x7x32xf32> to vector<7x32xf32>
    %c0_5 = arith.constant 0 : index
    %c0_6 = arith.constant 0 : index
    %c0_7 = arith.constant 0 : index
    %4 = vector.load %arg3[%c0_5, %c0_6, %c0_7] : memref<1x7x32xf32, #tpu.memory_space<vmem>>, vector<1x7x32xf32>
    %5 = vector.shape_cast %4 : vector<1x7x32xf32> to vector<7x32xf32>
    %c0_8 = arith.constant 0 : index
    %c0_9 = arith.constant 0 : index
    %c0_10 = arith.constant 0 : index
    %6 = vector.load %arg4[%c0_8, %c0_9, %c0_10] : memref<1x1x7xf32, #tpu.memory_space<vmem>>, vector<1x1x7xf32>
    %7 = vector.shape_cast %6 : vector<1x1x7xf32> to vector<1x7xf32>
    %8 = vector.extract_strided_slice %1 {offsets = [0, 0], sizes = [7, 8], strides = [1, 1]} : vector<7x32xf32> to vector<7x8xf32>
    %9 = vector.extract_strided_slice %3 {offsets = [0, 0], sizes = [7, 8], strides = [1, 1]} : vector<7x32xf32> to vector<7x8xf32>
    %cst = arith.constant dense<0.000000e+00> : vector<7x7xf32>
    %10 = tpu.matmul %8, %9, %cst {dimension_numbers = #tpu.dot_dimension_numbers<[1], [1], [0], [0], [0, 0, 1, 0], [], []>} : vector<7x8xf32>, vector<7x8xf32>, vector<7x7xf32> -> vector<7x7xf32>
    %cst_11 = arith.constant 0.353553385 : f32
    %11 = vector.broadcast %cst_11 : f32 to vector<7x7xf32>
    %12 = arith.mulf %10, %11 : vector<7x7xf32>
    %13 = vector.broadcast %7 : vector<1x7xf32> to vector<7x7xf32>
    %14 = arith.addf %12, %13 : vector<7x7xf32>
    %cst_12 = arith.constant dense<0xFF800000> : vector<7xf32>
    %15 = vector.multi_reduction <maximumf>, %14, %cst_12 [1] : vector<7x7xf32> to vector<7xf32>
    %16 = vector.shape_cast %15 : vector<7xf32> to vector<7x1xf32>
    %17 = vector.broadcast %16 : vector<7x1xf32> to vector<7x7xf32>
    %18 = arith.subf %14, %17 : vector<7x7xf32>
    %19 = math.exp %18 : vector<7x7xf32>
    %cst_13 = arith.constant dense<0.000000e+00> : vector<7xf32>
    %20 = vector.multi_reduction <add>, %19, %cst_13 [1] : vector<7x7xf32> to vector<7xf32>
    %21 = vector.shape_cast %20 : vector<7xf32> to vector<7x1xf32>
    %22 = tpu.reciprocal %21 {approx = true} : vector<7x1xf32> -> vector<7x1xf32>
    %23 = vector.broadcast %22 : vector<7x1xf32> to vector<7x7xf32>
    %24 = arith.mulf %19, %23 : vector<7x7xf32>
    %25 = vector.extract_strided_slice %5 {offsets = [0, 0], sizes = [7, 8], strides = [1, 1]} : vector<7x32xf32> to vector<7x8xf32>
    %cst_14 = arith.constant dense<0.000000e+00> : vector<7x8xf32>
    %26 = tpu.matmul %24, %25, %cst_14 {dimension_numbers = #tpu.dot_dimension_numbers<[1], [0], [0], [1], [0, 0, 1, 1], [], []>} : vector<7x7xf32>, vector<7x8xf32>, vector<7x8xf32> -> vector<7x8xf32>
    %27 = vector.extract_strided_slice %1 {offsets = [0, 8], sizes = [7, 8], strides = [1, 1]} : vector<7x32xf32> to vector<7x8xf32>
    %28 = vector.extract_strided_slice %3 {offsets = [0, 8], sizes = [7, 8], strides = [1, 1]} : vector<7x32xf32> to vector<7x8xf32>
    %cst_15 = arith.constant dense<0.000000e+00> : vector<7x7xf32>
    %29 = tpu.matmul %27, %28, %cst_15 {dimension_numbers = #tpu.dot_dimension_numbers<[1], [1], [0], [0], [0, 0, 1, 0], [], []>} : vector<7x8xf32>, vector<7x8xf32>, vector<7x7xf32> -> vector<7x7xf32>
    %cst_16 = arith.constant 0.353553385 : f32
    %30 = vector.broadcast %cst_16 : f32 to vector<7x7xf32>
    %31 = arith.mulf %29, %30 : vector<7x7xf32>
    %32 = vector.broadcast %7 : vector<1x7xf32> to vector<7x7xf32>
    %33 = arith.addf %31, %32 : vector<7x7xf32>
    %cst_17 = arith.constant dense<0xFF800000> : vector<7xf32>
    %34 = vector.multi_reduction <maximumf>, %33, %cst_17 [1] : vector<7x7xf32> to vector<7xf32>
    %35 = vector.shape_cast %34 : vector<7xf32> to vector<7x1xf32>
    %36 = vector.broadcast %35 : vector<7x1xf32> to vector<7x7xf32>
    %37 = arith.subf %33, %36 : vector<7x7xf32>
    %38 = math.exp %37 : vector<7x7xf32>
    %cst_18 = arith.constant dense<0.000000e+00> : vector<7xf32>
    %39 = vector.multi_reduction <add>, %38, %cst_18 [1] : vector<7x7xf32> to vector<7xf32>
    %40 = vector.shape_cast %39 : vector<7xf32> to vector<7x1xf32>
    %41 = tpu.reciprocal %40 {approx = true} : vector<7x1xf32> -> vector<7x1xf32>
    %42 = vector.broadcast %41 : vector<7x1xf32> to vector<7x7xf32>
    %43 = arith.mulf %38, %42 : vector<7x7xf32>
    %44 = vector.extract_strided_slice %5 {offsets = [0, 8], sizes = [7, 8], strides = [1, 1]} : vector<7x32xf32> to vector<7x8xf32>
    %cst_19 = arith.constant dense<0.000000e+00> : vector<7x8xf32>
    %45 = tpu.matmul %43, %44, %cst_19 {dimension_numbers = #tpu.dot_dimension_numbers<[1], [0], [0], [1], [0, 0, 1, 1], [], []>} : vector<7x7xf32>, vector<7x8xf32>, vector<7x8xf32> -> vector<7x8xf32>
    %46 = vector.extract_strided_slice %1 {offsets = [0, 16], sizes = [7, 8], strides = [1, 1]} : vector<7x32xf32> to vector<7x8xf32>
    %47 = vector.extract_strided_slice %3 {offsets = [0, 16], sizes = [7, 8], strides = [1, 1]} : vector<7x32xf32> to vector<7x8xf32>
    %cst_20 = arith.constant dense<0.000000e+00> : vector<7x7xf32>
    %48 = tpu.matmul %46, %47, %cst_20 {dimension_numbers = #tpu.dot_dimension_numbers<[1], [1], [0], [0], [0, 0, 1, 0], [], []>} : vector<7x8xf32>, vector<7x8xf32>, vector<7x7xf32> -> vector<7x7xf32>
    %cst_21 = arith.constant 0.353553385 : f32
    %49 = vector.broadcast %cst_21 : f32 to vector<7x7xf32>
    %50 = arith.mulf %48, %49 : vector<7x7xf32>
    %51 = vector.broadcast %7 : vector<1x7xf32> to vector<7x7xf32>
    %52 = arith.addf %50, %51 : vector<7x7xf32>
    %cst_22 = arith.constant dense<0xFF800000> : vector<7xf32>
    %53 = vector.multi_reduction <maximumf>, %52, %cst_22 [1] : vector<7x7xf32> to vector<7xf32>
    %54 = vector.shape_cast %53 : vector<7xf32> to vector<7x1xf32>
    %55 = vector.broadcast %54 : vector<7x1xf32> to vector<7x7xf32>
    %56 = arith.subf %52, %55 : vector<7x7xf32>
    %57 = math.exp %56 : vector<7x7xf32>
    %cst_23 = arith.constant dense<0.000000e+00> : vector<7xf32>
    %58 = vector.multi_reduction <add>, %57, %cst_23 [1] : vector<7x7xf32> to vector<7xf32>
    %59 = vector.shape_cast %58 : vector<7xf32> to vector<7x1xf32>
    %60 = tpu.reciprocal %59 {approx = true} : vector<7x1xf32> -> vector<7x1xf32>
    %61 = vector.broadcast %60 : vector<7x1xf32> to vector<7x7xf32>
    %62 = arith.mulf %57, %61 : vector<7x7xf32>
    %63 = vector.extract_strided_slice %5 {offsets = [0, 16], sizes = [7, 8], strides = [1, 1]} : vector<7x32xf32> to vector<7x8xf32>
    %cst_24 = arith.constant dense<0.000000e+00> : vector<7x8xf32>
    %64 = tpu.matmul %62, %63, %cst_24 {dimension_numbers = #tpu.dot_dimension_numbers<[1], [0], [0], [1], [0, 0, 1, 1], [], []>} : vector<7x7xf32>, vector<7x8xf32>, vector<7x8xf32> -> vector<7x8xf32>
    %65 = vector.extract_strided_slice %1 {offsets = [0, 24], sizes = [7, 8], strides = [1, 1]} : vector<7x32xf32> to vector<7x8xf32>
    %66 = vector.extract_strided_slice %3 {offsets = [0, 24], sizes = [7, 8], strides = [1, 1]} : vector<7x32xf32> to vector<7x8xf32>
    %cst_25 = arith.constant dense<0.000000e+00> : vector<7x7xf32>
    %67 = tpu.matmul %65, %66, %cst_25 {dimension_numbers = #tpu.dot_dimension_numbers<[1], [1], [0], [0], [0, 0, 1, 0], [], []>} : vector<7x8xf32>, vector<7x8xf32>, vector<7x7xf32> -> vector<7x7xf32>
    %cst_26 = arith.constant 0.353553385 : f32
    %68 = vector.broadcast %cst_26 : f32 to vector<7x7xf32>
    %69 = arith.mulf %67, %68 : vector<7x7xf32>
    %70 = vector.broadcast %7 : vector<1x7xf32> to vector<7x7xf32>
    %71 = arith.addf %69, %70 : vector<7x7xf32>
    %cst_27 = arith.constant dense<0xFF800000> : vector<7xf32>
    %72 = vector.multi_reduction <maximumf>, %71, %cst_27 [1] : vector<7x7xf32> to vector<7xf32>
    %73 = vector.shape_cast %72 : vector<7xf32> to vector<7x1xf32>
    %74 = vector.broadcast %73 : vector<7x1xf32> to vector<7x7xf32>
    %75 = arith.subf %71, %74 : vector<7x7xf32>
    %76 = math.exp %75 : vector<7x7xf32>
    %cst_28 = arith.constant dense<0.000000e+00> : vector<7xf32>
    %77 = vector.multi_reduction <add>, %76, %cst_28 [1] : vector<7x7xf32> to vector<7xf32>
    %78 = vector.shape_cast %77 : vector<7xf32> to vector<7x1xf32>
    %79 = tpu.reciprocal %78 {approx = true} : vector<7x1xf32> -> vector<7x1xf32>
    %80 = vector.broadcast %79 : vector<7x1xf32> to vector<7x7xf32>
    %81 = arith.mulf %76, %80 : vector<7x7xf32>
    %82 = vector.extract_strided_slice %5 {offsets = [0, 24], sizes = [7, 8], strides = [1, 1]} : vector<7x32xf32> to vector<7x8xf32>
    %cst_29 = arith.constant dense<0.000000e+00> : vector<7x8xf32>
    %83 = tpu.matmul %81, %82, %cst_29 {dimension_numbers = #tpu.dot_dimension_numbers<[1], [0], [0], [1], [0, 0, 1, 1], [], []>} : vector<7x7xf32>, vector<7x8xf32>, vector<7x8xf32> -> vector<7x8xf32>
    %84 = tpu.concatenate %26, %45, %64, %83 in 1 : vector<7x8xf32>, vector<7x8xf32>, vector<7x8xf32>, vector<7x8xf32> -> vector<7x32xf32>
    %c0_30 = arith.constant 0 : index
    %c0_31 = arith.constant 0 : index
    %c0_32 = arith.constant 0 : index
    %85 = vector.load %arg5[%c0_30, %c0_31, %c0_32] : memref<1x7x32xf32, #tpu.memory_space<vmem>>, vector<1x7x32xf32>
    %86 = vector.shape_cast %85 : vector<1x7x32xf32> to vector<7x32xf32>
    %87 = vector.shape_cast %84 : vector<7x32xf32> to vector<1x7x32xf32>
    tpu.vector_store %arg5[%c0_30, %c0_31, %c0_32], %87 {strides = array<i32>} : memref<1x7x32xf32, #tpu.memory_space<vmem>>, vector<1x7x32xf32>,
    return
  }
  func.func @transform_0(%arg0: i32) -> (i32, i32, i32) {
    %c0_i32 = arith.constant 0 : i32
    %c0_i32_0 = arith.constant 0 : i32
    %c0_i32_1 = arith.constant 0 : i32
    return %arg0, %c0_i32, %c0_i32_0 : i32, i32, i32
  }
  func.func @transform_1(%arg0: i32) -> (i32, i32, i32) {
    %c0_i32 = arith.constant 0 : i32
    %c0_i32_0 = arith.constant 0 : i32
    %c0_i32_1 = arith.constant 0 : i32
    return %arg0, %c0_i32, %c0_i32_0 : i32, i32, i32
  }
  func.func @transform_2(%arg0: i32) -> (i32, i32, i32) {
    %c0_i32 = arith.constant 0 : i32
    %c0_i32_0 = arith.constant 0 : i32
    %c0_i32_1 = arith.constant 0 : i32
    return %arg0, %c0_i32, %c0_i32_0 : i32, i32, i32
  }
  func.func @transform_3(%arg0: i32) -> (i32, i32, i32) {
    %c0_i32 = arith.constant 0 : i32
    %c0_i32_0 = arith.constant 0 : i32
    %c0_i32_1 = arith.constant 0 : i32
    return %arg0, %c0_i32, %c0_i32_0 : i32, i32, i32
  }
  func.func @transform_4(%arg0: i32) -> (i32, i32, i32) {
    %c0_i32 = arith.constant 0 : i32
    %c0_i32_0 = arith.constant 0 : i32
    %c0_i32_1 = arith.constant 0 : i32
    return %arg0, %c0_i32, %c0_i32_0 : i32, i32, i32
  }
}

module attributes {stable_mosaic.version = 11 : i64} {
  func.func @_linear_res_ln_kernel(%arg0: i32, %arg1: memref<21x32xf32, #tpu.memory_space<vmem>>, %arg2: memref<21x32xf32, #tpu.memory_space<vmem>>, %arg3: memref<32x32xf32, #tpu.memory_space<vmem>>, %arg4: memref<1x32xf32, #tpu.memory_space<vmem>>, %arg5: memref<1x32xf32, #tpu.memory_space<vmem>>, %arg6: memref<1x32xf32, #tpu.memory_space<vmem>>, %arg7: memref<21x32xf32, #tpu.memory_space<vmem>>) attributes {dimension_semantics = [#tpu.dimension_semantics<parallel>], iteration_bounds = array<i64: 1>, scalar_prefetch = 0 : i64, scratch_operands = 0 : i64, tpu.core_type = #tpu.core_type<tc>, window_params = [{transform_indices = @transform_0, window_bounds = array<i64: 21, 32>}, {transform_indices = @transform_1, window_bounds = array<i64: 21, 32>}, {pipeline_mode = #tpu.pipeline_mode<synchronous>, transform_indices = @transform_2, window_bounds = array<i64: 32, 32>}, {pipeline_mode = #tpu.pipeline_mode<synchronous>, transform_indices = @transform_3, window_bounds = array<i64: 1, 32>}, {pipeline_mode = #tpu.pipeline_mode<synchronous>, transform_indices = @transform_4, window_bounds = array<i64: 1, 32>}, {pipeline_mode = #tpu.pipeline_mode<synchronous>, transform_indices = @transform_5, window_bounds = array<i64: 1, 32>}, {transform_indices = @transform_6, window_bounds = array<i64: 21, 32>}]} {
    %c0 = arith.constant 0 : index
    %c0_0 = arith.constant 0 : index
    %0 = vector.load %arg1[%c0, %c0_0] : memref<21x32xf32, #tpu.memory_space<vmem>>, vector<21x32xf32>
    %c0_1 = arith.constant 0 : index
    %c0_2 = arith.constant 0 : index
    %1 = vector.load %arg3[%c0_1, %c0_2] : memref<32x32xf32, #tpu.memory_space<vmem>>, vector<32x32xf32>
    %cst = arith.constant dense<0.000000e+00> : vector<21x32xf32>
    %2 = tpu.matmul %0, %1, %cst {dimension_numbers = #tpu.dot_dimension_numbers<[1], [0], [0], [1], [0, 0, 1, 1], [], []>} : vector<21x32xf32>, vector<32x32xf32>, vector<21x32xf32> -> vector<21x32xf32>
    %c0_3 = arith.constant 0 : index
    %c0_4 = arith.constant 0 : index
    %3 = vector.load %arg4[%c0_3, %c0_4] : memref<1x32xf32, #tpu.memory_space<vmem>>, vector<1x32xf32>
    %4 = vector.broadcast %3 : vector<1x32xf32> to vector<21x32xf32>
    %5 = arith.addf %2, %4 : vector<21x32xf32>
    %c0_5 = arith.constant 0 : index
    %c0_6 = arith.constant 0 : index
    %6 = vector.load %arg2[%c0_5, %c0_6] : memref<21x32xf32, #tpu.memory_space<vmem>>, vector<21x32xf32>
    %7 = arith.addf %5, %6 : vector<21x32xf32>
    %cst_7 = arith.constant dense<0.000000e+00> : vector<21xf32>
    %8 = vector.multi_reduction <add>, %7, %cst_7 [1] : vector<21x32xf32> to vector<21xf32>
    %9 = vector.shape_cast %8 : vector<21xf32> to vector<21x1xf32>
    %cst_8 = arith.constant 3.200000e+01 : f32
    %10 = vector.broadcast %cst_8 : f32 to vector<21x1xf32>
    %11 = arith.divf %9, %10 : vector<21x1xf32>
    %12 = vector.broadcast %11 : vector<21x1xf32> to vector<21x32xf32>
    %13 = arith.subf %7, %12 : vector<21x32xf32>
    %14 = arith.mulf %13, %13 : vector<21x32xf32>
    %cst_9 = arith.constant dense<0.000000e+00> : vector<21xf32>
    %15 = vector.multi_reduction <add>, %14, %cst_9 [1] : vector<21x32xf32> to vector<21xf32>
    %16 = vector.shape_cast %15 : vector<21xf32> to vector<21x1xf32>
    %cst_10 = arith.constant 3.200000e+01 : f32
    %17 = vector.broadcast %cst_10 : f32 to vector<21x1xf32>
    %18 = arith.divf %16, %17 : vector<21x1xf32>
    %cst_11 = arith.constant 9.99999996E-13 : f32
    %19 = vector.broadcast %cst_11 : f32 to vector<21x1xf32>
    %20 = arith.addf %18, %19 : vector<21x1xf32>
    %21 = math.rsqrt %20 : vector<21x1xf32>
    %22 = vector.broadcast %21 : vector<21x1xf32> to vector<21x32xf32>
    %23 = arith.mulf %13, %22 : vector<21x32xf32>
    %c0_12 = arith.constant 0 : index
    %c0_13 = arith.constant 0 : index
    %24 = vector.load %arg5[%c0_12, %c0_13] : memref<1x32xf32, #tpu.memory_space<vmem>>, vector<1x32xf32>
    %25 = vector.broadcast %24 : vector<1x32xf32> to vector<21x32xf32>
    %26 = arith.mulf %23, %25 : vector<21x32xf32>
    %c0_14 = arith.constant 0 : index
    %c0_15 = arith.constant 0 : index
    %27 = vector.load %arg6[%c0_14, %c0_15] : memref<1x32xf32, #tpu.memory_space<vmem>>, vector<1x32xf32>
    %28 = vector.broadcast %27 : vector<1x32xf32> to vector<21x32xf32>
    %29 = arith.addf %26, %28 : vector<21x32xf32>
    %c0_16 = arith.constant 0 : index
    %c0_17 = arith.constant 0 : index
    %30 = vector.load %arg7[%c0_16, %c0_17] : memref<21x32xf32, #tpu.memory_space<vmem>>, vector<21x32xf32>
    tpu.vector_store %arg7[%c0_16, %c0_17], %29 {strides = array<i32>} : memref<21x32xf32, #tpu.memory_space<vmem>>, vector<21x32xf32>,
    return
  }
  func.func @transform_0(%arg0: i32) -> (i32, i32) {
    %c0_i32 = arith.constant 0 : i32
    %c0_i32_0 = arith.constant 0 : i32
    return %arg0, %c0_i32 : i32, i32
  }
  func.func @transform_1(%arg0: i32) -> (i32, i32) {
    %c0_i32 = arith.constant 0 : i32
    %c0_i32_0 = arith.constant 0 : i32
    return %arg0, %c0_i32 : i32, i32
  }
  func.func @transform_2(%arg0: i32) -> (i32, i32) {
    %c0_i32 = arith.constant 0 : i32
    %c0_i32_0 = arith.constant 0 : i32
    %c0_i32_1 = arith.constant 0 : i32
    return %c0_i32, %c0_i32_0 : i32, i32
  }
  func.func @transform_3(%arg0: i32) -> (i32, i32) {
    %c0_i32 = arith.constant 0 : i32
    %c0_i32_0 = arith.constant 0 : i32
    %c0_i32_1 = arith.constant 0 : i32
    return %c0_i32, %c0_i32_0 : i32, i32
  }
  func.func @transform_4(%arg0: i32) -> (i32, i32) {
    %c0_i32 = arith.constant 0 : i32
    %c0_i32_0 = arith.constant 0 : i32
    %c0_i32_1 = arith.constant 0 : i32
    return %c0_i32, %c0_i32_0 : i32, i32
  }
  func.func @transform_5(%arg0: i32) -> (i32, i32) {
    %c0_i32 = arith.constant 0 : i32
    %c0_i32_0 = arith.constant 0 : i32
    %c0_i32_1 = arith.constant 0 : i32
    return %c0_i32, %c0_i32_0 : i32, i32
  }
  func.func @transform_6(%arg0: i32) -> (i32, i32) {
    %c0_i32 = arith.constant 0 : i32
    %c0_i32_0 = arith.constant 0 : i32
    return %arg0, %c0_i32 : i32, i32
  }
}

module attributes {stable_mosaic.version = 11 : i64} {
  func.func @_ffn_ln_kernel(%arg0: i32, %arg1: memref<21x32xf32, #tpu.memory_space<vmem>>, %arg2: memref<32x128xf32, #tpu.memory_space<vmem>>, %arg3: memref<1x128xf32, #tpu.memory_space<vmem>>, %arg4: memref<128x32xf32, #tpu.memory_space<vmem>>, %arg5: memref<1x32xf32, #tpu.memory_space<vmem>>, %arg6: memref<1x32xf32, #tpu.memory_space<vmem>>, %arg7: memref<1x32xf32, #tpu.memory_space<vmem>>, %arg8: memref<21x32xf32, #tpu.memory_space<vmem>>) attributes {dimension_semantics = [#tpu.dimension_semantics<parallel>], iteration_bounds = array<i64: 1>, scalar_prefetch = 0 : i64, scratch_operands = 0 : i64, tpu.core_type = #tpu.core_type<tc>, window_params = [{transform_indices = @transform_0, window_bounds = array<i64: 21, 32>}, {pipeline_mode = #tpu.pipeline_mode<synchronous>, transform_indices = @transform_1, window_bounds = array<i64: 32, 128>}, {pipeline_mode = #tpu.pipeline_mode<synchronous>, transform_indices = @transform_2, window_bounds = array<i64: 1, 128>}, {pipeline_mode = #tpu.pipeline_mode<synchronous>, transform_indices = @transform_3, window_bounds = array<i64: 128, 32>}, {pipeline_mode = #tpu.pipeline_mode<synchronous>, transform_indices = @transform_4, window_bounds = array<i64: 1, 32>}, {pipeline_mode = #tpu.pipeline_mode<synchronous>, transform_indices = @transform_5, window_bounds = array<i64: 1, 32>}, {pipeline_mode = #tpu.pipeline_mode<synchronous>, transform_indices = @transform_6, window_bounds = array<i64: 1, 32>}, {transform_indices = @transform_7, window_bounds = array<i64: 21, 32>}]} {
    %c0 = arith.constant 0 : index
    %c0_0 = arith.constant 0 : index
    %0 = vector.load %arg1[%c0, %c0_0] : memref<21x32xf32, #tpu.memory_space<vmem>>, vector<21x32xf32>
    %c0_1 = arith.constant 0 : index
    %c0_2 = arith.constant 0 : index
    %1 = vector.load %arg2[%c0_1, %c0_2] : memref<32x128xf32, #tpu.memory_space<vmem>>, vector<32x128xf32>
    %cst = arith.constant dense<0.000000e+00> : vector<21x128xf32>
    %2 = tpu.matmul %0, %1, %cst {dimension_numbers = #tpu.dot_dimension_numbers<[1], [0], [0], [1], [0, 0, 1, 1], [], []>} : vector<21x32xf32>, vector<32x128xf32>, vector<21x128xf32> -> vector<21x128xf32>
    %c0_3 = arith.constant 0 : index
    %c0_4 = arith.constant 0 : index
    %3 = vector.load %arg3[%c0_3, %c0_4] : memref<1x128xf32, #tpu.memory_space<vmem>>, vector<1x128xf32>
    %4 = vector.broadcast %3 : vector<1x128xf32> to vector<21x128xf32>
    %5 = arith.addf %2, %4 : vector<21x128xf32>
    %6 = arith.mulf %5, %5 : vector<21x128xf32>
    %7 = arith.mulf %5, %6 : vector<21x128xf32>
    %cst_5 = arith.constant 4.471500e-02 : f32
    %8 = vector.broadcast %cst_5 : f32 to vector<21x128xf32>
    %9 = arith.mulf %8, %7 : vector<21x128xf32>
    %10 = arith.addf %5, %9 : vector<21x128xf32>
    %cst_6 = arith.constant 0.797884583 : f32
    %11 = vector.broadcast %cst_6 : f32 to vector<21x128xf32>
    %12 = arith.mulf %11, %10 : vector<21x128xf32>
    %13 = math.tanh %12 : vector<21x128xf32>
    %cst_7 = arith.constant 1.000000e+00 : f32
    %14 = vector.broadcast %cst_7 : f32 to vector<21x128xf32>
    %15 = arith.addf %14, %13 : vector<21x128xf32>
    %cst_8 = arith.constant 5.000000e-01 : f32
    %16 = vector.broadcast %cst_8 : f32 to vector<21x128xf32>
    %17 = arith.mulf %16, %15 : vector<21x128xf32>
    %18 = arith.mulf %5, %17 : vector<21x128xf32>
    %c0_9 = arith.constant 0 : index
    %c0_10 = arith.constant 0 : index
    %19 = vector.load %arg4[%c0_9, %c0_10] : memref<128x32xf32, #tpu.memory_space<vmem>>, vector<128x32xf32>
    %cst_11 = arith.constant dense<0.000000e+00> : vector<21x32xf32>
    %20 = tpu.matmul %18, %19, %cst_11 {dimension_numbers = #tpu.dot_dimension_numbers<[1], [0], [0], [1], [0, 0, 1, 1], [], []>} : vector<21x128xf32>, vector<128x32xf32>, vector<21x32xf32> -> vector<21x32xf32>
    %c0_12 = arith.constant 0 : index
    %c0_13 = arith.constant 0 : index
    %21 = vector.load %arg5[%c0_12, %c0_13] : memref<1x32xf32, #tpu.memory_space<vmem>>, vector<1x32xf32>
    %22 = vector.broadcast %21 : vector<1x32xf32> to vector<21x32xf32>
    %23 = arith.addf %20, %22 : vector<21x32xf32>
    %24 = arith.addf %23, %0 : vector<21x32xf32>
    %cst_14 = arith.constant dense<0.000000e+00> : vector<21xf32>
    %25 = vector.multi_reduction <add>, %24, %cst_14 [1] : vector<21x32xf32> to vector<21xf32>
    %26 = vector.shape_cast %25 : vector<21xf32> to vector<21x1xf32>
    %cst_15 = arith.constant 3.200000e+01 : f32
    %27 = vector.broadcast %cst_15 : f32 to vector<21x1xf32>
    %28 = arith.divf %26, %27 : vector<21x1xf32>
    %29 = vector.broadcast %28 : vector<21x1xf32> to vector<21x32xf32>
    %30 = arith.subf %24, %29 : vector<21x32xf32>
    %31 = arith.mulf %30, %30 : vector<21x32xf32>
    %cst_16 = arith.constant dense<0.000000e+00> : vector<21xf32>
    %32 = vector.multi_reduction <add>, %31, %cst_16 [1] : vector<21x32xf32> to vector<21xf32>
    %33 = vector.shape_cast %32 : vector<21xf32> to vector<21x1xf32>
    %cst_17 = arith.constant 3.200000e+01 : f32
    %34 = vector.broadcast %cst_17 : f32 to vector<21x1xf32>
    %35 = arith.divf %33, %34 : vector<21x1xf32>
    %cst_18 = arith.constant 9.99999996E-13 : f32
    %36 = vector.broadcast %cst_18 : f32 to vector<21x1xf32>
    %37 = arith.addf %35, %36 : vector<21x1xf32>
    %38 = math.rsqrt %37 : vector<21x1xf32>
    %39 = vector.broadcast %38 : vector<21x1xf32> to vector<21x32xf32>
    %40 = arith.mulf %30, %39 : vector<21x32xf32>
    %c0_19 = arith.constant 0 : index
    %c0_20 = arith.constant 0 : index
    %41 = vector.load %arg6[%c0_19, %c0_20] : memref<1x32xf32, #tpu.memory_space<vmem>>, vector<1x32xf32>
    %42 = vector.broadcast %41 : vector<1x32xf32> to vector<21x32xf32>
    %43 = arith.mulf %40, %42 : vector<21x32xf32>
    %c0_21 = arith.constant 0 : index
    %c0_22 = arith.constant 0 : index
    %44 = vector.load %arg7[%c0_21, %c0_22] : memref<1x32xf32, #tpu.memory_space<vmem>>, vector<1x32xf32>
    %45 = vector.broadcast %44 : vector<1x32xf32> to vector<21x32xf32>
    %46 = arith.addf %43, %45 : vector<21x32xf32>
    %c0_23 = arith.constant 0 : index
    %c0_24 = arith.constant 0 : index
    %47 = vector.load %arg8[%c0_23, %c0_24] : memref<21x32xf32, #tpu.memory_space<vmem>>, vector<21x32xf32>
    tpu.vector_store %arg8[%c0_23, %c0_24], %46 {strides = array<i32>} : memref<21x32xf32, #tpu.memory_space<vmem>>, vector<21x32xf32>,
    return
  }
  func.func @transform_0(%arg0: i32) -> (i32, i32) {
    %c0_i32 = arith.constant 0 : i32
    %c0_i32_0 = arith.constant 0 : i32
    return %arg0, %c0_i32 : i32, i32
  }
  func.func @transform_1(%arg0: i32) -> (i32, i32) {
    %c0_i32 = arith.constant 0 : i32
    %c0_i32_0 = arith.constant 0 : i32
    %c0_i32_1 = arith.constant 0 : i32
    return %c0_i32, %c0_i32_0 : i32, i32
  }
  func.func @transform_2(%arg0: i32) -> (i32, i32) {
    %c0_i32 = arith.constant 0 : i32
    %c0_i32_0 = arith.constant 0 : i32
    %c0_i32_1 = arith.constant 0 : i32
    return %c0_i32, %c0_i32_0 : i32, i32
  }
  func.func @transform_3(%arg0: i32) -> (i32, i32) {
    %c0_i32 = arith.constant 0 : i32
    %c0_i32_0 = arith.constant 0 : i32
    %c0_i32_1 = arith.constant 0 : i32
    return %c0_i32, %c0_i32_0 : i32, i32
  }
  func.func @transform_4(%arg0: i32) -> (i32, i32) {
    %c0_i32 = arith.constant 0 : i32
    %c0_i32_0 = arith.constant 0 : i32
    %c0_i32_1 = arith.constant 0 : i32
    return %c0_i32, %c0_i32_0 : i32, i32
  }
  func.func @transform_5(%arg0: i32) -> (i32, i32) {
    %c0_i32 = arith.constant 0 : i32
    %c0_i32_0 = arith.constant 0 : i32
    %c0_i32_1 = arith.constant 0 : i32
    return %c0_i32, %c0_i32_0 : i32, i32
  }
  func.func @transform_6(%arg0: i32) -> (i32, i32) {
    %c0_i32 = arith.constant 0 : i32
    %c0_i32_0 = arith.constant 0 : i32
    %c0_i32_1 = arith.constant 0 : i32
    return %c0_i32, %c0_i32_0 : i32, i32
  }
  func.func @transform_7(%arg0: i32) -> (i32, i32) {
    %c0_i32 = arith.constant 0 : i32
    %c0_i32_0 = arith.constant 0 : i32
    return %arg0, %c0_i32 : i32, i32
  }
}

module attributes {stable_mosaic.version = 11 : i64} {
  func.func @_linear_kernel(%arg0: i32, %arg1: memref<48x32xf32, #tpu.memory_space<vmem>>, %arg2: memref<32x96xf32, #tpu.memory_space<vmem>>, %arg3: memref<1x96xf32, #tpu.memory_space<vmem>>, %arg4: memref<48x96xf32, #tpu.memory_space<vmem>>) attributes {dimension_semantics = [#tpu.dimension_semantics<parallel>], iteration_bounds = array<i64: 1>, scalar_prefetch = 0 : i64, scratch_operands = 0 : i64, tpu.core_type = #tpu.core_type<tc>, window_params = [{transform_indices = @transform_0, window_bounds = array<i64: 48, 32>}, {pipeline_mode = #tpu.pipeline_mode<synchronous>, transform_indices = @transform_1, window_bounds = array<i64: 32, 96>}, {pipeline_mode = #tpu.pipeline_mode<synchronous>, transform_indices = @transform_2, window_bounds = array<i64: 1, 96>}, {transform_indices = @transform_3, window_bounds = array<i64: 48, 96>}]} {
    %c0 = arith.constant 0 : index
    %c0_0 = arith.constant 0 : index
    %0 = vector.load %arg1[%c0, %c0_0] : memref<48x32xf32, #tpu.memory_space<vmem>>, vector<48x32xf32>
    %c0_1 = arith.constant 0 : index
    %c0_2 = arith.constant 0 : index
    %1 = vector.load %arg2[%c0_1, %c0_2] : memref<32x96xf32, #tpu.memory_space<vmem>>, vector<32x96xf32>
    %cst = arith.constant dense<0.000000e+00> : vector<48x96xf32>
    %2 = tpu.matmul %0, %1, %cst {dimension_numbers = #tpu.dot_dimension_numbers<[1], [0], [0], [1], [0, 0, 1, 1], [], []>} : vector<48x32xf32>, vector<32x96xf32>, vector<48x96xf32> -> vector<48x96xf32>
    %c0_3 = arith.constant 0 : index
    %c0_4 = arith.constant 0 : index
    %3 = vector.load %arg3[%c0_3, %c0_4] : memref<1x96xf32, #tpu.memory_space<vmem>>, vector<1x96xf32>
    %4 = vector.broadcast %3 : vector<1x96xf32> to vector<48x96xf32>
    %5 = arith.addf %2, %4 : vector<48x96xf32>
    %c0_5 = arith.constant 0 : index
    %c0_6 = arith.constant 0 : index
    %6 = vector.load %arg4[%c0_5, %c0_6] : memref<48x96xf32, #tpu.memory_space<vmem>>, vector<48x96xf32>
    tpu.vector_store %arg4[%c0_5, %c0_6], %5 {strides = array<i32>} : memref<48x96xf32, #tpu.memory_space<vmem>>, vector<48x96xf32>,
    return
  }
  func.func @transform_0(%arg0: i32) -> (i32, i32) {
    %c0_i32 = arith.constant 0 : i32
    %c0_i32_0 = arith.constant 0 : i32
    return %arg0, %c0_i32 : i32, i32
  }
  func.func @transform_1(%arg0: i32) -> (i32, i32) {
    %c0_i32 = arith.constant 0 : i32
    %c0_i32_0 = arith.constant 0 : i32
    %c0_i32_1 = arith.constant 0 : i32
    return %c0_i32, %c0_i32_0 : i32, i32
  }
  func.func @transform_2(%arg0: i32) -> (i32, i32) {
    %c0_i32 = arith.constant 0 : i32
    %c0_i32_0 = arith.constant 0 : i32
    %c0_i32_1 = arith.constant 0 : i32
    return %c0_i32, %c0_i32_0 : i32, i32
  }
  func.func @transform_3(%arg0: i32) -> (i32, i32) {
    %c0_i32 = arith.constant 0 : i32
    %c0_i32_0 = arith.constant 0 : i32
    return %arg0, %c0_i32 : i32, i32
  }
}

module attributes {stable_mosaic.version = 11 : i64} {
  func.func @_mha_kernel(%arg0: i32, %arg1: memref<1x1x32xf32, #tpu.memory_space<vmem>>, %arg2: memref<1x15x32xf32, #tpu.memory_space<vmem>>, %arg3: memref<1x15x32xf32, #tpu.memory_space<vmem>>, %arg4: memref<1x1x15xf32, #tpu.memory_space<vmem>>, %arg5: memref<1x1x32xf32, #tpu.memory_space<vmem>>) attributes {dimension_semantics = [#tpu.dimension_semantics<parallel>], iteration_bounds = array<i64: 3>, scalar_prefetch = 0 : i64, scratch_operands = 0 : i64, tpu.core_type = #tpu.core_type<tc>, window_params = [{transform_indices = @transform_0, window_bounds = array<i64: 1, 1, 32>}, {transform_indices = @transform_1, window_bounds = array<i64: 1, 15, 32>}, {transform_indices = @transform_2, window_bounds = array<i64: 1, 15, 32>}, {transform_indices = @transform_3, window_bounds = array<i64: 1, 1, 15>}, {transform_indices = @transform_4, window_bounds = array<i64: 1, 1, 32>}]} {
    %c0 = arith.constant 0 : index
    %c0_0 = arith.constant 0 : index
    %c0_1 = arith.constant 0 : index
    %0 = vector.load %arg1[%c0, %c0_0, %c0_1] : memref<1x1x32xf32, #tpu.memory_space<vmem>>, vector<1x1x32xf32>
    %1 = vector.shape_cast %0 : vector<1x1x32xf32> to vector<1x32xf32>
    %c0_2 = arith.constant 0 : index
    %c0_3 = arith.constant 0 : index
    %c0_4 = arith.constant 0 : index
    %2 = vector.load %arg2[%c0_2, %c0_3, %c0_4] : memref<1x15x32xf32, #tpu.memory_space<vmem>>, vector<1x15x32xf32>
    %3 = vector.shape_cast %2 : vector<1x15x32xf32> to vector<15x32xf32>
    %c0_5 = arith.constant 0 : index
    %c0_6 = arith.constant 0 : index
    %c0_7 = arith.constant 0 : index
    %4 = vector.load %arg3[%c0_5, %c0_6, %c0_7] : memref<1x15x32xf32, #tpu.memory_space<vmem>>, vector<1x15x32xf32>
    %5 = vector.shape_cast %4 : vector<1x15x32xf32> to vector<15x32xf32>
    %c0_8 = arith.constant 0 : index
    %c0_9 = arith.constant 0 : index
    %c0_10 = arith.constant 0 : index
    %6 = vector.load %arg4[%c0_8, %c0_9, %c0_10] : memref<1x1x15xf32, #tpu.memory_space<vmem>>, vector<1x1x15xf32>
    %7 = vector.shape_cast %6 : vector<1x1x15xf32> to vector<1x15xf32>
    %8 = vector.extract_strided_slice %1 {offsets = [0, 0], sizes = [1, 8], strides = [1, 1]} : vector<1x32xf32> to vector<1x8xf32>
    %9 = vector.extract_strided_slice %3 {offsets = [0, 0], sizes = [15, 8], strides = [1, 1]} : vector<15x32xf32> to vector<15x8xf32>
    %cst = arith.constant dense<0.000000e+00> : vector<1x15xf32>
    %10 = tpu.matmul %8, %9, %cst {dimension_numbers = #tpu.dot_dimension_numbers<[1], [1], [0], [0], [0, 0, 1, 0], [], []>} : vector<1x8xf32>, vector<15x8xf32>, vector<1x15xf32> -> vector<1x15xf32>
    %cst_11 = arith.constant 0.353553385 : f32
    %11 = vector.broadcast %cst_11 : f32 to vector<1x15xf32>
    %12 = arith.mulf %10, %11 : vector<1x15xf32>
    %13 = arith.addf %12, %7 : vector<1x15xf32>
    %cst_12 = arith.constant dense<0xFF800000> : vector<1xf32>
    %14 = vector.multi_reduction <maximumf>, %13, %cst_12 [1] : vector<1x15xf32> to vector<1xf32>
    %15 = vector.shape_cast %14 : vector<1xf32> to vector<1x1xf32>
    %16 = vector.broadcast %15 : vector<1x1xf32> to vector<1x15xf32>
    %17 = arith.subf %13, %16 : vector<1x15xf32>
    %18 = math.exp %17 : vector<1x15xf32>
    %cst_13 = arith.constant dense<0.000000e+00> : vector<1xf32>
    %19 = vector.multi_reduction <add>, %18, %cst_13 [1] : vector<1x15xf32> to vector<1xf32>
    %20 = vector.shape_cast %19 : vector<1xf32> to vector<1x1xf32>
    %21 = tpu.reciprocal %20 {approx = true} : vector<1x1xf32> -> vector<1x1xf32>
    %22 = vector.broadcast %21 : vector<1x1xf32> to vector<1x15xf32>
    %23 = arith.mulf %18, %22 : vector<1x15xf32>
    %24 = vector.extract_strided_slice %5 {offsets = [0, 0], sizes = [15, 8], strides = [1, 1]} : vector<15x32xf32> to vector<15x8xf32>
    %cst_14 = arith.constant dense<0.000000e+00> : vector<1x8xf32>
    %25 = tpu.matmul %23, %24, %cst_14 {dimension_numbers = #tpu.dot_dimension_numbers<[1], [0], [0], [1], [0, 0, 1, 1], [], []>} : vector<1x15xf32>, vector<15x8xf32>, vector<1x8xf32> -> vector<1x8xf32>
    %26 = vector.extract_strided_slice %1 {offsets = [0, 8], sizes = [1, 8], strides = [1, 1]} : vector<1x32xf32> to vector<1x8xf32>
    %27 = vector.extract_strided_slice %3 {offsets = [0, 8], sizes = [15, 8], strides = [1, 1]} : vector<15x32xf32> to vector<15x8xf32>
    %cst_15 = arith.constant dense<0.000000e+00> : vector<1x15xf32>
    %28 = tpu.matmul %26, %27, %cst_15 {dimension_numbers = #tpu.dot_dimension_numbers<[1], [1], [0], [0], [0, 0, 1, 0], [], []>} : vector<1x8xf32>, vector<15x8xf32>, vector<1x15xf32> -> vector<1x15xf32>
    %cst_16 = arith.constant 0.353553385 : f32
    %29 = vector.broadcast %cst_16 : f32 to vector<1x15xf32>
    %30 = arith.mulf %28, %29 : vector<1x15xf32>
    %31 = arith.addf %30, %7 : vector<1x15xf32>
    %cst_17 = arith.constant dense<0xFF800000> : vector<1xf32>
    %32 = vector.multi_reduction <maximumf>, %31, %cst_17 [1] : vector<1x15xf32> to vector<1xf32>
    %33 = vector.shape_cast %32 : vector<1xf32> to vector<1x1xf32>
    %34 = vector.broadcast %33 : vector<1x1xf32> to vector<1x15xf32>
    %35 = arith.subf %31, %34 : vector<1x15xf32>
    %36 = math.exp %35 : vector<1x15xf32>
    %cst_18 = arith.constant dense<0.000000e+00> : vector<1xf32>
    %37 = vector.multi_reduction <add>, %36, %cst_18 [1] : vector<1x15xf32> to vector<1xf32>
    %38 = vector.shape_cast %37 : vector<1xf32> to vector<1x1xf32>
    %39 = tpu.reciprocal %38 {approx = true} : vector<1x1xf32> -> vector<1x1xf32>
    %40 = vector.broadcast %39 : vector<1x1xf32> to vector<1x15xf32>
    %41 = arith.mulf %36, %40 : vector<1x15xf32>
    %42 = vector.extract_strided_slice %5 {offsets = [0, 8], sizes = [15, 8], strides = [1, 1]} : vector<15x32xf32> to vector<15x8xf32>
    %cst_19 = arith.constant dense<0.000000e+00> : vector<1x8xf32>
    %43 = tpu.matmul %41, %42, %cst_19 {dimension_numbers = #tpu.dot_dimension_numbers<[1], [0], [0], [1], [0, 0, 1, 1], [], []>} : vector<1x15xf32>, vector<15x8xf32>, vector<1x8xf32> -> vector<1x8xf32>
    %44 = vector.extract_strided_slice %1 {offsets = [0, 16], sizes = [1, 8], strides = [1, 1]} : vector<1x32xf32> to vector<1x8xf32>
    %45 = vector.extract_strided_slice %3 {offsets = [0, 16], sizes = [15, 8], strides = [1, 1]} : vector<15x32xf32> to vector<15x8xf32>
    %cst_20 = arith.constant dense<0.000000e+00> : vector<1x15xf32>
    %46 = tpu.matmul %44, %45, %cst_20 {dimension_numbers = #tpu.dot_dimension_numbers<[1], [1], [0], [0], [0, 0, 1, 0], [], []>} : vector<1x8xf32>, vector<15x8xf32>, vector<1x15xf32> -> vector<1x15xf32>
    %cst_21 = arith.constant 0.353553385 : f32
    %47 = vector.broadcast %cst_21 : f32 to vector<1x15xf32>
    %48 = arith.mulf %46, %47 : vector<1x15xf32>
    %49 = arith.addf %48, %7 : vector<1x15xf32>
    %cst_22 = arith.constant dense<0xFF800000> : vector<1xf32>
    %50 = vector.multi_reduction <maximumf>, %49, %cst_22 [1] : vector<1x15xf32> to vector<1xf32>
    %51 = vector.shape_cast %50 : vector<1xf32> to vector<1x1xf32>
    %52 = vector.broadcast %51 : vector<1x1xf32> to vector<1x15xf32>
    %53 = arith.subf %49, %52 : vector<1x15xf32>
    %54 = math.exp %53 : vector<1x15xf32>
    %cst_23 = arith.constant dense<0.000000e+00> : vector<1xf32>
    %55 = vector.multi_reduction <add>, %54, %cst_23 [1] : vector<1x15xf32> to vector<1xf32>
    %56 = vector.shape_cast %55 : vector<1xf32> to vector<1x1xf32>
    %57 = tpu.reciprocal %56 {approx = true} : vector<1x1xf32> -> vector<1x1xf32>
    %58 = vector.broadcast %57 : vector<1x1xf32> to vector<1x15xf32>
    %59 = arith.mulf %54, %58 : vector<1x15xf32>
    %60 = vector.extract_strided_slice %5 {offsets = [0, 16], sizes = [15, 8], strides = [1, 1]} : vector<15x32xf32> to vector<15x8xf32>
    %cst_24 = arith.constant dense<0.000000e+00> : vector<1x8xf32>
    %61 = tpu.matmul %59, %60, %cst_24 {dimension_numbers = #tpu.dot_dimension_numbers<[1], [0], [0], [1], [0, 0, 1, 1], [], []>} : vector<1x15xf32>, vector<15x8xf32>, vector<1x8xf32> -> vector<1x8xf32>
    %62 = vector.extract_strided_slice %1 {offsets = [0, 24], sizes = [1, 8], strides = [1, 1]} : vector<1x32xf32> to vector<1x8xf32>
    %63 = vector.extract_strided_slice %3 {offsets = [0, 24], sizes = [15, 8], strides = [1, 1]} : vector<15x32xf32> to vector<15x8xf32>
    %cst_25 = arith.constant dense<0.000000e+00> : vector<1x15xf32>
    %64 = tpu.matmul %62, %63, %cst_25 {dimension_numbers = #tpu.dot_dimension_numbers<[1], [1], [0], [0], [0, 0, 1, 0], [], []>} : vector<1x8xf32>, vector<15x8xf32>, vector<1x15xf32> -> vector<1x15xf32>
    %cst_26 = arith.constant 0.353553385 : f32
    %65 = vector.broadcast %cst_26 : f32 to vector<1x15xf32>
    %66 = arith.mulf %64, %65 : vector<1x15xf32>
    %67 = arith.addf %66, %7 : vector<1x15xf32>
    %cst_27 = arith.constant dense<0xFF800000> : vector<1xf32>
    %68 = vector.multi_reduction <maximumf>, %67, %cst_27 [1] : vector<1x15xf32> to vector<1xf32>
    %69 = vector.shape_cast %68 : vector<1xf32> to vector<1x1xf32>
    %70 = vector.broadcast %69 : vector<1x1xf32> to vector<1x15xf32>
    %71 = arith.subf %67, %70 : vector<1x15xf32>
    %72 = math.exp %71 : vector<1x15xf32>
    %cst_28 = arith.constant dense<0.000000e+00> : vector<1xf32>
    %73 = vector.multi_reduction <add>, %72, %cst_28 [1] : vector<1x15xf32> to vector<1xf32>
    %74 = vector.shape_cast %73 : vector<1xf32> to vector<1x1xf32>
    %75 = tpu.reciprocal %74 {approx = true} : vector<1x1xf32> -> vector<1x1xf32>
    %76 = vector.broadcast %75 : vector<1x1xf32> to vector<1x15xf32>
    %77 = arith.mulf %72, %76 : vector<1x15xf32>
    %78 = vector.extract_strided_slice %5 {offsets = [0, 24], sizes = [15, 8], strides = [1, 1]} : vector<15x32xf32> to vector<15x8xf32>
    %cst_29 = arith.constant dense<0.000000e+00> : vector<1x8xf32>
    %79 = tpu.matmul %77, %78, %cst_29 {dimension_numbers = #tpu.dot_dimension_numbers<[1], [0], [0], [1], [0, 0, 1, 1], [], []>} : vector<1x15xf32>, vector<15x8xf32>, vector<1x8xf32> -> vector<1x8xf32>
    %80 = tpu.concatenate %25, %43, %61, %79 in 1 : vector<1x8xf32>, vector<1x8xf32>, vector<1x8xf32>, vector<1x8xf32> -> vector<1x32xf32>
    %c0_30 = arith.constant 0 : index
    %c0_31 = arith.constant 0 : index
    %c0_32 = arith.constant 0 : index
    %81 = vector.load %arg5[%c0_30, %c0_31, %c0_32] : memref<1x1x32xf32, #tpu.memory_space<vmem>>, vector<1x1x32xf32>
    %82 = vector.shape_cast %81 : vector<1x1x32xf32> to vector<1x32xf32>
    %83 = vector.shape_cast %80 : vector<1x32xf32> to vector<1x1x32xf32>
    tpu.vector_store %arg5[%c0_30, %c0_31, %c0_32], %83 {strides = array<i32>} : memref<1x1x32xf32, #tpu.memory_space<vmem>>, vector<1x1x32xf32>,
    return
  }
  func.func @transform_0(%arg0: i32) -> (i32, i32, i32) {
    %c0_i32 = arith.constant 0 : i32
    %c0_i32_0 = arith.constant 0 : i32
    %c0_i32_1 = arith.constant 0 : i32
    return %arg0, %c0_i32, %c0_i32_0 : i32, i32, i32
  }
  func.func @transform_1(%arg0: i32) -> (i32, i32, i32) {
    %c0_i32 = arith.constant 0 : i32
    %c0_i32_0 = arith.constant 0 : i32
    %c0_i32_1 = arith.constant 0 : i32
    return %arg0, %c0_i32, %c0_i32_0 : i32, i32, i32
  }
  func.func @transform_2(%arg0: i32) -> (i32, i32, i32) {
    %c0_i32 = arith.constant 0 : i32
    %c0_i32_0 = arith.constant 0 : i32
    %c0_i32_1 = arith.constant 0 : i32
    return %arg0, %c0_i32, %c0_i32_0 : i32, i32, i32
  }
  func.func @transform_3(%arg0: i32) -> (i32, i32, i32) {
    %c0_i32 = arith.constant 0 : i32
    %c0_i32_0 = arith.constant 0 : i32
    %c0_i32_1 = arith.constant 0 : i32
    return %arg0, %c0_i32, %c0_i32_0 : i32, i32, i32
  }
  func.func @transform_4(%arg0: i32) -> (i32, i32, i32) {
    %c0_i32 = arith.constant 0 : i32
    %c0_i32_0 = arith.constant 0 : i32
    %c0_i32_1 = arith.constant 0 : i32
    return %arg0, %c0_i32, %c0_i32_0 : i32, i32, i32
  }
}

module attributes {stable_mosaic.version = 11 : i64} {
  func.func @_linear_res_ln_kernel(%arg0: i32, %arg1: memref<3x32xf32, #tpu.memory_space<vmem>>, %arg2: memref<3x32xf32, #tpu.memory_space<vmem>>, %arg3: memref<32x32xf32, #tpu.memory_space<vmem>>, %arg4: memref<1x32xf32, #tpu.memory_space<vmem>>, %arg5: memref<1x32xf32, #tpu.memory_space<vmem>>, %arg6: memref<1x32xf32, #tpu.memory_space<vmem>>, %arg7: memref<3x32xf32, #tpu.memory_space<vmem>>) attributes {dimension_semantics = [#tpu.dimension_semantics<parallel>], iteration_bounds = array<i64: 1>, scalar_prefetch = 0 : i64, scratch_operands = 0 : i64, tpu.core_type = #tpu.core_type<tc>, window_params = [{transform_indices = @transform_0, window_bounds = array<i64: 3, 32>}, {transform_indices = @transform_1, window_bounds = array<i64: 3, 32>}, {pipeline_mode = #tpu.pipeline_mode<synchronous>, transform_indices = @transform_2, window_bounds = array<i64: 32, 32>}, {pipeline_mode = #tpu.pipeline_mode<synchronous>, transform_indices = @transform_3, window_bounds = array<i64: 1, 32>}, {pipeline_mode = #tpu.pipeline_mode<synchronous>, transform_indices = @transform_4, window_bounds = array<i64: 1, 32>}, {pipeline_mode = #tpu.pipeline_mode<synchronous>, transform_indices = @transform_5, window_bounds = array<i64: 1, 32>}, {transform_indices = @transform_6, window_bounds = array<i64: 3, 32>}]} {
    %c0 = arith.constant 0 : index
    %c0_0 = arith.constant 0 : index
    %0 = vector.load %arg1[%c0, %c0_0] : memref<3x32xf32, #tpu.memory_space<vmem>>, vector<3x32xf32>
    %c0_1 = arith.constant 0 : index
    %c0_2 = arith.constant 0 : index
    %1 = vector.load %arg3[%c0_1, %c0_2] : memref<32x32xf32, #tpu.memory_space<vmem>>, vector<32x32xf32>
    %cst = arith.constant dense<0.000000e+00> : vector<3x32xf32>
    %2 = tpu.matmul %0, %1, %cst {dimension_numbers = #tpu.dot_dimension_numbers<[1], [0], [0], [1], [0, 0, 1, 1], [], []>} : vector<3x32xf32>, vector<32x32xf32>, vector<3x32xf32> -> vector<3x32xf32>
    %c0_3 = arith.constant 0 : index
    %c0_4 = arith.constant 0 : index
    %3 = vector.load %arg4[%c0_3, %c0_4] : memref<1x32xf32, #tpu.memory_space<vmem>>, vector<1x32xf32>
    %4 = vector.broadcast %3 : vector<1x32xf32> to vector<3x32xf32>
    %5 = arith.addf %2, %4 : vector<3x32xf32>
    %c0_5 = arith.constant 0 : index
    %c0_6 = arith.constant 0 : index
    %6 = vector.load %arg2[%c0_5, %c0_6] : memref<3x32xf32, #tpu.memory_space<vmem>>, vector<3x32xf32>
    %7 = arith.addf %5, %6 : vector<3x32xf32>
    %cst_7 = arith.constant dense<0.000000e+00> : vector<3xf32>
    %8 = vector.multi_reduction <add>, %7, %cst_7 [1] : vector<3x32xf32> to vector<3xf32>
    %9 = vector.shape_cast %8 : vector<3xf32> to vector<3x1xf32>
    %cst_8 = arith.constant 3.200000e+01 : f32
    %10 = vector.broadcast %cst_8 : f32 to vector<3x1xf32>
    %11 = arith.divf %9, %10 : vector<3x1xf32>
    %12 = vector.broadcast %11 : vector<3x1xf32> to vector<3x32xf32>
    %13 = arith.subf %7, %12 : vector<3x32xf32>
    %14 = arith.mulf %13, %13 : vector<3x32xf32>
    %cst_9 = arith.constant dense<0.000000e+00> : vector<3xf32>
    %15 = vector.multi_reduction <add>, %14, %cst_9 [1] : vector<3x32xf32> to vector<3xf32>
    %16 = vector.shape_cast %15 : vector<3xf32> to vector<3x1xf32>
    %cst_10 = arith.constant 3.200000e+01 : f32
    %17 = vector.broadcast %cst_10 : f32 to vector<3x1xf32>
    %18 = arith.divf %16, %17 : vector<3x1xf32>
    %cst_11 = arith.constant 9.99999996E-13 : f32
    %19 = vector.broadcast %cst_11 : f32 to vector<3x1xf32>
    %20 = arith.addf %18, %19 : vector<3x1xf32>
    %21 = math.rsqrt %20 : vector<3x1xf32>
    %22 = vector.broadcast %21 : vector<3x1xf32> to vector<3x32xf32>
    %23 = arith.mulf %13, %22 : vector<3x32xf32>
    %c0_12 = arith.constant 0 : index
    %c0_13 = arith.constant 0 : index
    %24 = vector.load %arg5[%c0_12, %c0_13] : memref<1x32xf32, #tpu.memory_space<vmem>>, vector<1x32xf32>
    %25 = vector.broadcast %24 : vector<1x32xf32> to vector<3x32xf32>
    %26 = arith.mulf %23, %25 : vector<3x32xf32>
    %c0_14 = arith.constant 0 : index
    %c0_15 = arith.constant 0 : index
    %27 = vector.load %arg6[%c0_14, %c0_15] : memref<1x32xf32, #tpu.memory_space<vmem>>, vector<1x32xf32>
    %28 = vector.broadcast %27 : vector<1x32xf32> to vector<3x32xf32>
    %29 = arith.addf %26, %28 : vector<3x32xf32>
    %c0_16 = arith.constant 0 : index
    %c0_17 = arith.constant 0 : index
    %30 = vector.load %arg7[%c0_16, %c0_17] : memref<3x32xf32, #tpu.memory_space<vmem>>, vector<3x32xf32>
    tpu.vector_store %arg7[%c0_16, %c0_17], %29 {strides = array<i32>} : memref<3x32xf32, #tpu.memory_space<vmem>>, vector<3x32xf32>,
    return
  }
  func.func @transform_0(%arg0: i32) -> (i32, i32) {
    %c0_i32 = arith.constant 0 : i32
    %c0_i32_0 = arith.constant 0 : i32
    return %arg0, %c0_i32 : i32, i32
  }
  func.func @transform_1(%arg0: i32) -> (i32, i32) {
    %c0_i32 = arith.constant 0 : i32
    %c0_i32_0 = arith.constant 0 : i32
    return %arg0, %c0_i32 : i32, i32
  }
  func.func @transform_2(%arg0: i32) -> (i32, i32) {
    %c0_i32 = arith.constant 0 : i32
    %c0_i32_0 = arith.constant 0 : i32
    %c0_i32_1 = arith.constant 0 : i32
    return %c0_i32, %c0_i32_0 : i32, i32
  }
  func.func @transform_3(%arg0: i32) -> (i32, i32) {
    %c0_i32 = arith.constant 0 : i32
    %c0_i32_0 = arith.constant 0 : i32
    %c0_i32_1 = arith.constant 0 : i32
    return %c0_i32, %c0_i32_0 : i32, i32
  }
  func.func @transform_4(%arg0: i32) -> (i32, i32) {
    %c0_i32 = arith.constant 0 : i32
    %c0_i32_0 = arith.constant 0 : i32
    %c0_i32_1 = arith.constant 0 : i32
    return %c0_i32, %c0_i32_0 : i32, i32
  }
  func.func @transform_5(%arg0: i32) -> (i32, i32) {
    %c0_i32 = arith.constant 0 : i32
    %c0_i32_0 = arith.constant 0 : i32
    %c0_i32_1 = arith.constant 0 : i32
    return %c0_i32, %c0_i32_0 : i32, i32
  }
  func.func @transform_6(%arg0: i32) -> (i32, i32) {
    %c0_i32 = arith.constant 0 : i32
    %c0_i32_0 = arith.constant 0 : i32
    return %arg0, %c0_i32 : i32, i32
  }
}

module attributes {stable_mosaic.version = 11 : i64} {
  func.func @_ffn_ln_kernel(%arg0: i32, %arg1: memref<3x32xf32, #tpu.memory_space<vmem>>, %arg2: memref<32x128xf32, #tpu.memory_space<vmem>>, %arg3: memref<1x128xf32, #tpu.memory_space<vmem>>, %arg4: memref<128x32xf32, #tpu.memory_space<vmem>>, %arg5: memref<1x32xf32, #tpu.memory_space<vmem>>, %arg6: memref<1x32xf32, #tpu.memory_space<vmem>>, %arg7: memref<1x32xf32, #tpu.memory_space<vmem>>, %arg8: memref<3x32xf32, #tpu.memory_space<vmem>>) attributes {dimension_semantics = [#tpu.dimension_semantics<parallel>], iteration_bounds = array<i64: 1>, scalar_prefetch = 0 : i64, scratch_operands = 0 : i64, tpu.core_type = #tpu.core_type<tc>, window_params = [{transform_indices = @transform_0, window_bounds = array<i64: 3, 32>}, {pipeline_mode = #tpu.pipeline_mode<synchronous>, transform_indices = @transform_1, window_bounds = array<i64: 32, 128>}, {pipeline_mode = #tpu.pipeline_mode<synchronous>, transform_indices = @transform_2, window_bounds = array<i64: 1, 128>}, {pipeline_mode = #tpu.pipeline_mode<synchronous>, transform_indices = @transform_3, window_bounds = array<i64: 128, 32>}, {pipeline_mode = #tpu.pipeline_mode<synchronous>, transform_indices = @transform_4, window_bounds = array<i64: 1, 32>}, {pipeline_mode = #tpu.pipeline_mode<synchronous>, transform_indices = @transform_5, window_bounds = array<i64: 1, 32>}, {pipeline_mode = #tpu.pipeline_mode<synchronous>, transform_indices = @transform_6, window_bounds = array<i64: 1, 32>}, {transform_indices = @transform_7, window_bounds = array<i64: 3, 32>}]} {
    %c0 = arith.constant 0 : index
    %c0_0 = arith.constant 0 : index
    %0 = vector.load %arg1[%c0, %c0_0] : memref<3x32xf32, #tpu.memory_space<vmem>>, vector<3x32xf32>
    %c0_1 = arith.constant 0 : index
    %c0_2 = arith.constant 0 : index
    %1 = vector.load %arg2[%c0_1, %c0_2] : memref<32x128xf32, #tpu.memory_space<vmem>>, vector<32x128xf32>
    %cst = arith.constant dense<0.000000e+00> : vector<3x128xf32>
    %2 = tpu.matmul %0, %1, %cst {dimension_numbers = #tpu.dot_dimension_numbers<[1], [0], [0], [1], [0, 0, 1, 1], [], []>} : vector<3x32xf32>, vector<32x128xf32>, vector<3x128xf32> -> vector<3x128xf32>
    %c0_3 = arith.constant 0 : index
    %c0_4 = arith.constant 0 : index
    %3 = vector.load %arg3[%c0_3, %c0_4] : memref<1x128xf32, #tpu.memory_space<vmem>>, vector<1x128xf32>
    %4 = vector.broadcast %3 : vector<1x128xf32> to vector<3x128xf32>
    %5 = arith.addf %2, %4 : vector<3x128xf32>
    %6 = arith.mulf %5, %5 : vector<3x128xf32>
    %7 = arith.mulf %5, %6 : vector<3x128xf32>
    %cst_5 = arith.constant 4.471500e-02 : f32
    %8 = vector.broadcast %cst_5 : f32 to vector<3x128xf32>
    %9 = arith.mulf %8, %7 : vector<3x128xf32>
    %10 = arith.addf %5, %9 : vector<3x128xf32>
    %cst_6 = arith.constant 0.797884583 : f32
    %11 = vector.broadcast %cst_6 : f32 to vector<3x128xf32>
    %12 = arith.mulf %11, %10 : vector<3x128xf32>
    %13 = math.tanh %12 : vector<3x128xf32>
    %cst_7 = arith.constant 1.000000e+00 : f32
    %14 = vector.broadcast %cst_7 : f32 to vector<3x128xf32>
    %15 = arith.addf %14, %13 : vector<3x128xf32>
    %cst_8 = arith.constant 5.000000e-01 : f32
    %16 = vector.broadcast %cst_8 : f32 to vector<3x128xf32>
    %17 = arith.mulf %16, %15 : vector<3x128xf32>
    %18 = arith.mulf %5, %17 : vector<3x128xf32>
    %c0_9 = arith.constant 0 : index
    %c0_10 = arith.constant 0 : index
    %19 = vector.load %arg4[%c0_9, %c0_10] : memref<128x32xf32, #tpu.memory_space<vmem>>, vector<128x32xf32>
    %cst_11 = arith.constant dense<0.000000e+00> : vector<3x32xf32>
    %20 = tpu.matmul %18, %19, %cst_11 {dimension_numbers = #tpu.dot_dimension_numbers<[1], [0], [0], [1], [0, 0, 1, 1], [], []>} : vector<3x128xf32>, vector<128x32xf32>, vector<3x32xf32> -> vector<3x32xf32>
    %c0_12 = arith.constant 0 : index
    %c0_13 = arith.constant 0 : index
    %21 = vector.load %arg5[%c0_12, %c0_13] : memref<1x32xf32, #tpu.memory_space<vmem>>, vector<1x32xf32>
    %22 = vector.broadcast %21 : vector<1x32xf32> to vector<3x32xf32>
    %23 = arith.addf %20, %22 : vector<3x32xf32>
    %24 = arith.addf %23, %0 : vector<3x32xf32>
    %cst_14 = arith.constant dense<0.000000e+00> : vector<3xf32>
    %25 = vector.multi_reduction <add>, %24, %cst_14 [1] : vector<3x32xf32> to vector<3xf32>
    %26 = vector.shape_cast %25 : vector<3xf32> to vector<3x1xf32>
    %cst_15 = arith.constant 3.200000e+01 : f32
    %27 = vector.broadcast %cst_15 : f32 to vector<3x1xf32>
    %28 = arith.divf %26, %27 : vector<3x1xf32>
    %29 = vector.broadcast %28 : vector<3x1xf32> to vector<3x32xf32>
    %30 = arith.subf %24, %29 : vector<3x32xf32>
    %31 = arith.mulf %30, %30 : vector<3x32xf32>
    %cst_16 = arith.constant dense<0.000000e+00> : vector<3xf32>
    %32 = vector.multi_reduction <add>, %31, %cst_16 [1] : vector<3x32xf32> to vector<3xf32>
    %33 = vector.shape_cast %32 : vector<3xf32> to vector<3x1xf32>
    %cst_17 = arith.constant 3.200000e+01 : f32
    %34 = vector.broadcast %cst_17 : f32 to vector<3x1xf32>
    %35 = arith.divf %33, %34 : vector<3x1xf32>
    %cst_18 = arith.constant 9.99999996E-13 : f32
    %36 = vector.broadcast %cst_18 : f32 to vector<3x1xf32>
    %37 = arith.addf %35, %36 : vector<3x1xf32>
    %38 = math.rsqrt %37 : vector<3x1xf32>
    %39 = vector.broadcast %38 : vector<3x1xf32> to vector<3x32xf32>
    %40 = arith.mulf %30, %39 : vector<3x32xf32>
    %c0_19 = arith.constant 0 : index
    %c0_20 = arith.constant 0 : index
    %41 = vector.load %arg6[%c0_19, %c0_20] : memref<1x32xf32, #tpu.memory_space<vmem>>, vector<1x32xf32>
    %42 = vector.broadcast %41 : vector<1x32xf32> to vector<3x32xf32>
    %43 = arith.mulf %40, %42 : vector<3x32xf32>
    %c0_21 = arith.constant 0 : index
    %c0_22 = arith.constant 0 : index
    %44 = vector.load %arg7[%c0_21, %c0_22] : memref<1x32xf32, #tpu.memory_space<vmem>>, vector<1x32xf32>
    %45 = vector.broadcast %44 : vector<1x32xf32> to vector<3x32xf32>
    %46 = arith.addf %43, %45 : vector<3x32xf32>
    %c0_23 = arith.constant 0 : index
    %c0_24 = arith.constant 0 : index
    %47 = vector.load %arg8[%c0_23, %c0_24] : memref<3x32xf32, #tpu.memory_space<vmem>>, vector<3x32xf32>
    tpu.vector_store %arg8[%c0_23, %c0_24], %46 {strides = array<i32>} : memref<3x32xf32, #tpu.memory_space<vmem>>, vector<3x32xf32>,
    return
  }
  func.func @transform_0(%arg0: i32) -> (i32, i32) {
    %c0_i32 = arith.constant 0 : i32
    %c0_i32_0 = arith.constant 0 : i32
    return %arg0, %c0_i32 : i32, i32
  }
  func.func @transform_1(%arg0: i32) -> (i32, i32) {
    %c0_i32 = arith.constant 0 : i32
    %c0_i32_0 = arith.constant 0 : i32
    %c0_i32_1 = arith.constant 0 : i32
    return %c0_i32, %c0_i32_0 : i32, i32
  }
  func.func @transform_2(%arg0: i32) -> (i32, i32) {
    %c0_i32 = arith.constant 0 : i32
    %c0_i32_0 = arith.constant 0 : i32
    %c0_i32_1 = arith.constant 0 : i32
    return %c0_i32, %c0_i32_0 : i32, i32
  }
  func.func @transform_3(%arg0: i32) -> (i32, i32) {
    %c0_i32 = arith.constant 0 : i32
    %c0_i32_0 = arith.constant 0 : i32
    %c0_i32_1 = arith.constant 0 : i32
    return %c0_i32, %c0_i32_0 : i32, i32
  }
  func.func @transform_4(%arg0: i32) -> (i32, i32) {
    %c0_i32 = arith.constant 0 : i32
    %c0_i32_0 = arith.constant 0 : i32
    %c0_i32_1 = arith.constant 0 : i32
    return %c0_i32, %c0_i32_0 : i32, i32
  }
  func.func @transform_5(%arg0: i32) -> (i32, i32) {
    %c0_i32 = arith.constant 0 : i32
    %c0_i32_0 = arith.constant 0 : i32
    %c0_i32_1 = arith.constant 0 : i32
    return %c0_i32, %c0_i32_0 : i32, i32
  }
  func.func @transform_6(%arg0: i32) -> (i32, i32) {
    %c0_i32 = arith.constant 0 : i32
    %c0_i32_0 = arith.constant 0 : i32
    %c0_i32_1 = arith.constant 0 : i32
    return %c0_i32, %c0_i32_0 : i32, i32
  }
  func.func @transform_7(%arg0: i32) -> (i32, i32) {
    %c0_i32 = arith.constant 0 : i32
    %c0_i32_0 = arith.constant 0 : i32
    return %arg0, %c0_i32 : i32, i32
  }
}

module attributes {stable_mosaic.version = 11 : i64} {
  func.func @_linear_kernel(%arg0: i32, %arg1: memref<3x32xf32, #tpu.memory_space<vmem>>, %arg2: memref<32x96xf32, #tpu.memory_space<vmem>>, %arg3: memref<1x96xf32, #tpu.memory_space<vmem>>, %arg4: memref<3x96xf32, #tpu.memory_space<vmem>>) attributes {dimension_semantics = [#tpu.dimension_semantics<parallel>], iteration_bounds = array<i64: 1>, scalar_prefetch = 0 : i64, scratch_operands = 0 : i64, tpu.core_type = #tpu.core_type<tc>, window_params = [{transform_indices = @transform_0, window_bounds = array<i64: 3, 32>}, {pipeline_mode = #tpu.pipeline_mode<synchronous>, transform_indices = @transform_1, window_bounds = array<i64: 32, 96>}, {pipeline_mode = #tpu.pipeline_mode<synchronous>, transform_indices = @transform_2, window_bounds = array<i64: 1, 96>}, {transform_indices = @transform_3, window_bounds = array<i64: 3, 96>}]} {
    %c0 = arith.constant 0 : index
    %c0_0 = arith.constant 0 : index
    %0 = vector.load %arg1[%c0, %c0_0] : memref<3x32xf32, #tpu.memory_space<vmem>>, vector<3x32xf32>
    %c0_1 = arith.constant 0 : index
    %c0_2 = arith.constant 0 : index
    %1 = vector.load %arg2[%c0_1, %c0_2] : memref<32x96xf32, #tpu.memory_space<vmem>>, vector<32x96xf32>
    %cst = arith.constant dense<0.000000e+00> : vector<3x96xf32>
    %2 = tpu.matmul %0, %1, %cst {dimension_numbers = #tpu.dot_dimension_numbers<[1], [0], [0], [1], [0, 0, 1, 1], [], []>} : vector<3x32xf32>, vector<32x96xf32>, vector<3x96xf32> -> vector<3x96xf32>
    %c0_3 = arith.constant 0 : index
    %c0_4 = arith.constant 0 : index
    %3 = vector.load %arg3[%c0_3, %c0_4] : memref<1x96xf32, #tpu.memory_space<vmem>>, vector<1x96xf32>
    %4 = vector.broadcast %3 : vector<1x96xf32> to vector<3x96xf32>
    %5 = arith.addf %2, %4 : vector<3x96xf32>
    %c0_5 = arith.constant 0 : index
    %c0_6 = arith.constant 0 : index
    %6 = vector.load %arg4[%c0_5, %c0_6] : memref<3x96xf32, #tpu.memory_space<vmem>>, vector<3x96xf32>
    tpu.vector_store %arg4[%c0_5, %c0_6], %5 {strides = array<i32>} : memref<3x96xf32, #tpu.memory_space<vmem>>, vector<3x96xf32>,
    return
  }
  func.func @transform_0(%arg0: i32) -> (i32, i32) {
    %c0_i32 = arith.constant 0 : i32
    %c0_i32_0 = arith.constant 0 : i32
    return %arg0, %c0_i32 : i32, i32
  }
  func.func @transform_1(%arg0: i32) -> (i32, i32) {
    %c0_i32 = arith.constant 0 : i32
    %c0_i32_0 = arith.constant 0 : i32
    %c0_i32_1 = arith.constant 0 : i32
    return %c0_i32, %c0_i32_0 : i32, i32
  }
  func.func @transform_2(%arg0: i32) -> (i32, i32) {
    %c0_i32 = arith.constant 0 : i32
    %c0_i32_0 = arith.constant 0 : i32
    %c0_i32_1 = arith.constant 0 : i32
    return %c0_i32, %c0_i32_0 : i32, i32
  }
  func.func @transform_3(%arg0: i32) -> (i32, i32) {
    %c0_i32 = arith.constant 0 : i32
    %c0_i32_0 = arith.constant 0 : i32
    return %arg0, %c0_i32 : i32, i32
  }
}

module attributes {stable_mosaic.version = 11 : i64} {
  func.func @_mha_kernel(%arg0: i32, %arg1: memref<1x3x32xf32, #tpu.memory_space<vmem>>, %arg2: memref<1x3x32xf32, #tpu.memory_space<vmem>>, %arg3: memref<1x3x32xf32, #tpu.memory_space<vmem>>, %arg4: memref<1x3x3xf32, #tpu.memory_space<vmem>>, %arg5: memref<1x3x32xf32, #tpu.memory_space<vmem>>) attributes {dimension_semantics = [#tpu.dimension_semantics<parallel>], iteration_bounds = array<i64: 1>, scalar_prefetch = 0 : i64, scratch_operands = 0 : i64, tpu.core_type = #tpu.core_type<tc>, window_params = [{transform_indices = @transform_0, window_bounds = array<i64: 1, 3, 32>}, {transform_indices = @transform_1, window_bounds = array<i64: 1, 3, 32>}, {transform_indices = @transform_2, window_bounds = array<i64: 1, 3, 32>}, {transform_indices = @transform_3, window_bounds = array<i64: 1, 3, 3>}, {transform_indices = @transform_4, window_bounds = array<i64: 1, 3, 32>}]} {
    %c0 = arith.constant 0 : index
    %c0_0 = arith.constant 0 : index
    %c0_1 = arith.constant 0 : index
    %0 = vector.load %arg1[%c0, %c0_0, %c0_1] : memref<1x3x32xf32, #tpu.memory_space<vmem>>, vector<1x3x32xf32>
    %1 = vector.shape_cast %0 : vector<1x3x32xf32> to vector<3x32xf32>
    %c0_2 = arith.constant 0 : index
    %c0_3 = arith.constant 0 : index
    %c0_4 = arith.constant 0 : index
    %2 = vector.load %arg2[%c0_2, %c0_3, %c0_4] : memref<1x3x32xf32, #tpu.memory_space<vmem>>, vector<1x3x32xf32>
    %3 = vector.shape_cast %2 : vector<1x3x32xf32> to vector<3x32xf32>
    %c0_5 = arith.constant 0 : index
    %c0_6 = arith.constant 0 : index
    %c0_7 = arith.constant 0 : index
    %4 = vector.load %arg3[%c0_5, %c0_6, %c0_7] : memref<1x3x32xf32, #tpu.memory_space<vmem>>, vector<1x3x32xf32>
    %5 = vector.shape_cast %4 : vector<1x3x32xf32> to vector<3x32xf32>
    %c0_8 = arith.constant 0 : index
    %c0_9 = arith.constant 0 : index
    %c0_10 = arith.constant 0 : index
    %6 = vector.load %arg4[%c0_8, %c0_9, %c0_10] : memref<1x3x3xf32, #tpu.memory_space<vmem>>, vector<1x3x3xf32>
    %7 = vector.shape_cast %6 : vector<1x3x3xf32> to vector<3x3xf32>
    %8 = vector.extract_strided_slice %1 {offsets = [0, 0], sizes = [3, 4], strides = [1, 1]} : vector<3x32xf32> to vector<3x4xf32>
    %9 = vector.extract_strided_slice %3 {offsets = [0, 0], sizes = [3, 4], strides = [1, 1]} : vector<3x32xf32> to vector<3x4xf32>
    %cst = arith.constant dense<0.000000e+00> : vector<3x3xf32>
    %10 = tpu.matmul %8, %9, %cst {dimension_numbers = #tpu.dot_dimension_numbers<[1], [1], [0], [0], [0, 0, 1, 0], [], []>} : vector<3x4xf32>, vector<3x4xf32>, vector<3x3xf32> -> vector<3x3xf32>
    %cst_11 = arith.constant 5.000000e-01 : f32
    %11 = vector.broadcast %cst_11 : f32 to vector<3x3xf32>
    %12 = arith.mulf %10, %11 : vector<3x3xf32>
    %13 = arith.addf %12, %7 : vector<3x3xf32>
    %cst_12 = arith.constant dense<0xFF800000> : vector<3xf32>
    %14 = vector.multi_reduction <maximumf>, %13, %cst_12 [1] : vector<3x3xf32> to vector<3xf32>
    %15 = vector.shape_cast %14 : vector<3xf32> to vector<3x1xf32>
    %16 = vector.broadcast %15 : vector<3x1xf32> to vector<3x3xf32>
    %17 = arith.subf %13, %16 : vector<3x3xf32>
    %18 = math.exp %17 : vector<3x3xf32>
    %cst_13 = arith.constant dense<0.000000e+00> : vector<3xf32>
    %19 = vector.multi_reduction <add>, %18, %cst_13 [1] : vector<3x3xf32> to vector<3xf32>
    %20 = vector.shape_cast %19 : vector<3xf32> to vector<3x1xf32>
    %21 = tpu.reciprocal %20 {approx = true} : vector<3x1xf32> -> vector<3x1xf32>
    %22 = vector.broadcast %21 : vector<3x1xf32> to vector<3x3xf32>
    %23 = arith.mulf %18, %22 : vector<3x3xf32>
    %24 = vector.extract_strided_slice %5 {offsets = [0, 0], sizes = [3, 4], strides = [1, 1]} : vector<3x32xf32> to vector<3x4xf32>
    %cst_14 = arith.constant dense<0.000000e+00> : vector<3x4xf32>
    %25 = tpu.matmul %23, %24, %cst_14 {dimension_numbers = #tpu.dot_dimension_numbers<[1], [0], [0], [1], [0, 0, 1, 1], [], []>} : vector<3x3xf32>, vector<3x4xf32>, vector<3x4xf32> -> vector<3x4xf32>
    %26 = vector.extract_strided_slice %1 {offsets = [0, 4], sizes = [3, 4], strides = [1, 1]} : vector<3x32xf32> to vector<3x4xf32>
    %27 = vector.extract_strided_slice %3 {offsets = [0, 4], sizes = [3, 4], strides = [1, 1]} : vector<3x32xf32> to vector<3x4xf32>
    %cst_15 = arith.constant dense<0.000000e+00> : vector<3x3xf32>
    %28 = tpu.matmul %26, %27, %cst_15 {dimension_numbers = #tpu.dot_dimension_numbers<[1], [1], [0], [0], [0, 0, 1, 0], [], []>} : vector<3x4xf32>, vector<3x4xf32>, vector<3x3xf32> -> vector<3x3xf32>
    %cst_16 = arith.constant 5.000000e-01 : f32
    %29 = vector.broadcast %cst_16 : f32 to vector<3x3xf32>
    %30 = arith.mulf %28, %29 : vector<3x3xf32>
    %31 = arith.addf %30, %7 : vector<3x3xf32>
    %cst_17 = arith.constant dense<0xFF800000> : vector<3xf32>
    %32 = vector.multi_reduction <maximumf>, %31, %cst_17 [1] : vector<3x3xf32> to vector<3xf32>
    %33 = vector.shape_cast %32 : vector<3xf32> to vector<3x1xf32>
    %34 = vector.broadcast %33 : vector<3x1xf32> to vector<3x3xf32>
    %35 = arith.subf %31, %34 : vector<3x3xf32>
    %36 = math.exp %35 : vector<3x3xf32>
    %cst_18 = arith.constant dense<0.000000e+00> : vector<3xf32>
    %37 = vector.multi_reduction <add>, %36, %cst_18 [1] : vector<3x3xf32> to vector<3xf32>
    %38 = vector.shape_cast %37 : vector<3xf32> to vector<3x1xf32>
    %39 = tpu.reciprocal %38 {approx = true} : vector<3x1xf32> -> vector<3x1xf32>
    %40 = vector.broadcast %39 : vector<3x1xf32> to vector<3x3xf32>
    %41 = arith.mulf %36, %40 : vector<3x3xf32>
    %42 = vector.extract_strided_slice %5 {offsets = [0, 4], sizes = [3, 4], strides = [1, 1]} : vector<3x32xf32> to vector<3x4xf32>
    %cst_19 = arith.constant dense<0.000000e+00> : vector<3x4xf32>
    %43 = tpu.matmul %41, %42, %cst_19 {dimension_numbers = #tpu.dot_dimension_numbers<[1], [0], [0], [1], [0, 0, 1, 1], [], []>} : vector<3x3xf32>, vector<3x4xf32>, vector<3x4xf32> -> vector<3x4xf32>
    %44 = vector.extract_strided_slice %1 {offsets = [0, 8], sizes = [3, 4], strides = [1, 1]} : vector<3x32xf32> to vector<3x4xf32>
    %45 = vector.extract_strided_slice %3 {offsets = [0, 8], sizes = [3, 4], strides = [1, 1]} : vector<3x32xf32> to vector<3x4xf32>
    %cst_20 = arith.constant dense<0.000000e+00> : vector<3x3xf32>
    %46 = tpu.matmul %44, %45, %cst_20 {dimension_numbers = #tpu.dot_dimension_numbers<[1], [1], [0], [0], [0, 0, 1, 0], [], []>} : vector<3x4xf32>, vector<3x4xf32>, vector<3x3xf32> -> vector<3x3xf32>
    %cst_21 = arith.constant 5.000000e-01 : f32
    %47 = vector.broadcast %cst_21 : f32 to vector<3x3xf32>
    %48 = arith.mulf %46, %47 : vector<3x3xf32>
    %49 = arith.addf %48, %7 : vector<3x3xf32>
    %cst_22 = arith.constant dense<0xFF800000> : vector<3xf32>
    %50 = vector.multi_reduction <maximumf>, %49, %cst_22 [1] : vector<3x3xf32> to vector<3xf32>
    %51 = vector.shape_cast %50 : vector<3xf32> to vector<3x1xf32>
    %52 = vector.broadcast %51 : vector<3x1xf32> to vector<3x3xf32>
    %53 = arith.subf %49, %52 : vector<3x3xf32>
    %54 = math.exp %53 : vector<3x3xf32>
    %cst_23 = arith.constant dense<0.000000e+00> : vector<3xf32>
    %55 = vector.multi_reduction <add>, %54, %cst_23 [1] : vector<3x3xf32> to vector<3xf32>
    %56 = vector.shape_cast %55 : vector<3xf32> to vector<3x1xf32>
    %57 = tpu.reciprocal %56 {approx = true} : vector<3x1xf32> -> vector<3x1xf32>
    %58 = vector.broadcast %57 : vector<3x1xf32> to vector<3x3xf32>
    %59 = arith.mulf %54, %58 : vector<3x3xf32>
    %60 = vector.extract_strided_slice %5 {offsets = [0, 8], sizes = [3, 4], strides = [1, 1]} : vector<3x32xf32> to vector<3x4xf32>
    %cst_24 = arith.constant dense<0.000000e+00> : vector<3x4xf32>
    %61 = tpu.matmul %59, %60, %cst_24 {dimension_numbers = #tpu.dot_dimension_numbers<[1], [0], [0], [1], [0, 0, 1, 1], [], []>} : vector<3x3xf32>, vector<3x4xf32>, vector<3x4xf32> -> vector<3x4xf32>
    %62 = vector.extract_strided_slice %1 {offsets = [0, 12], sizes = [3, 4], strides = [1, 1]} : vector<3x32xf32> to vector<3x4xf32>
    %63 = vector.extract_strided_slice %3 {offsets = [0, 12], sizes = [3, 4], strides = [1, 1]} : vector<3x32xf32> to vector<3x4xf32>
    %cst_25 = arith.constant dense<0.000000e+00> : vector<3x3xf32>
    %64 = tpu.matmul %62, %63, %cst_25 {dimension_numbers = #tpu.dot_dimension_numbers<[1], [1], [0], [0], [0, 0, 1, 0], [], []>} : vector<3x4xf32>, vector<3x4xf32>, vector<3x3xf32> -> vector<3x3xf32>
    %cst_26 = arith.constant 5.000000e-01 : f32
    %65 = vector.broadcast %cst_26 : f32 to vector<3x3xf32>
    %66 = arith.mulf %64, %65 : vector<3x3xf32>
    %67 = arith.addf %66, %7 : vector<3x3xf32>
    %cst_27 = arith.constant dense<0xFF800000> : vector<3xf32>
    %68 = vector.multi_reduction <maximumf>, %67, %cst_27 [1] : vector<3x3xf32> to vector<3xf32>
    %69 = vector.shape_cast %68 : vector<3xf32> to vector<3x1xf32>
    %70 = vector.broadcast %69 : vector<3x1xf32> to vector<3x3xf32>
    %71 = arith.subf %67, %70 : vector<3x3xf32>
    %72 = math.exp %71 : vector<3x3xf32>
    %cst_28 = arith.constant dense<0.000000e+00> : vector<3xf32>
    %73 = vector.multi_reduction <add>, %72, %cst_28 [1] : vector<3x3xf32> to vector<3xf32>
    %74 = vector.shape_cast %73 : vector<3xf32> to vector<3x1xf32>
    %75 = tpu.reciprocal %74 {approx = true} : vector<3x1xf32> -> vector<3x1xf32>
    %76 = vector.broadcast %75 : vector<3x1xf32> to vector<3x3xf32>
    %77 = arith.mulf %72, %76 : vector<3x3xf32>
    %78 = vector.extract_strided_slice %5 {offsets = [0, 12], sizes = [3, 4], strides = [1, 1]} : vector<3x32xf32> to vector<3x4xf32>
    %cst_29 = arith.constant dense<0.000000e+00> : vector<3x4xf32>
    %79 = tpu.matmul %77, %78, %cst_29 {dimension_numbers = #tpu.dot_dimension_numbers<[1], [0], [0], [1], [0, 0, 1, 1], [], []>} : vector<3x3xf32>, vector<3x4xf32>, vector<3x4xf32> -> vector<3x4xf32>
    %80 = vector.extract_strided_slice %1 {offsets = [0, 16], sizes = [3, 4], strides = [1, 1]} : vector<3x32xf32> to vector<3x4xf32>
    %81 = vector.extract_strided_slice %3 {offsets = [0, 16], sizes = [3, 4], strides = [1, 1]} : vector<3x32xf32> to vector<3x4xf32>
    %cst_30 = arith.constant dense<0.000000e+00> : vector<3x3xf32>
    %82 = tpu.matmul %80, %81, %cst_30 {dimension_numbers = #tpu.dot_dimension_numbers<[1], [1], [0], [0], [0, 0, 1, 0], [], []>} : vector<3x4xf32>, vector<3x4xf32>, vector<3x3xf32> -> vector<3x3xf32>
    %cst_31 = arith.constant 5.000000e-01 : f32
    %83 = vector.broadcast %cst_31 : f32 to vector<3x3xf32>
    %84 = arith.mulf %82, %83 : vector<3x3xf32>
    %85 = arith.addf %84, %7 : vector<3x3xf32>
    %cst_32 = arith.constant dense<0xFF800000> : vector<3xf32>
    %86 = vector.multi_reduction <maximumf>, %85, %cst_32 [1] : vector<3x3xf32> to vector<3xf32>
    %87 = vector.shape_cast %86 : vector<3xf32> to vector<3x1xf32>
    %88 = vector.broadcast %87 : vector<3x1xf32> to vector<3x3xf32>
    %89 = arith.subf %85, %88 : vector<3x3xf32>
    %90 = math.exp %89 : vector<3x3xf32>
    %cst_33 = arith.constant dense<0.000000e+00> : vector<3xf32>
    %91 = vector.multi_reduction <add>, %90, %cst_33 [1] : vector<3x3xf32> to vector<3xf32>
    %92 = vector.shape_cast %91 : vector<3xf32> to vector<3x1xf32>
    %93 = tpu.reciprocal %92 {approx = true} : vector<3x1xf32> -> vector<3x1xf32>
    %94 = vector.broadcast %93 : vector<3x1xf32> to vector<3x3xf32>
    %95 = arith.mulf %90, %94 : vector<3x3xf32>
    %96 = vector.extract_strided_slice %5 {offsets = [0, 16], sizes = [3, 4], strides = [1, 1]} : vector<3x32xf32> to vector<3x4xf32>
    %cst_34 = arith.constant dense<0.000000e+00> : vector<3x4xf32>
    %97 = tpu.matmul %95, %96, %cst_34 {dimension_numbers = #tpu.dot_dimension_numbers<[1], [0], [0], [1], [0, 0, 1, 1], [], []>} : vector<3x3xf32>, vector<3x4xf32>, vector<3x4xf32> -> vector<3x4xf32>
    %98 = vector.extract_strided_slice %1 {offsets = [0, 20], sizes = [3, 4], strides = [1, 1]} : vector<3x32xf32> to vector<3x4xf32>
    %99 = vector.extract_strided_slice %3 {offsets = [0, 20], sizes = [3, 4], strides = [1, 1]} : vector<3x32xf32> to vector<3x4xf32>
    %cst_35 = arith.constant dense<0.000000e+00> : vector<3x3xf32>
    %100 = tpu.matmul %98, %99, %cst_35 {dimension_numbers = #tpu.dot_dimension_numbers<[1], [1], [0], [0], [0, 0, 1, 0], [], []>} : vector<3x4xf32>, vector<3x4xf32>, vector<3x3xf32> -> vector<3x3xf32>
    %cst_36 = arith.constant 5.000000e-01 : f32
    %101 = vector.broadcast %cst_36 : f32 to vector<3x3xf32>
    %102 = arith.mulf %100, %101 : vector<3x3xf32>
    %103 = arith.addf %102, %7 : vector<3x3xf32>
    %cst_37 = arith.constant dense<0xFF800000> : vector<3xf32>
    %104 = vector.multi_reduction <maximumf>, %103, %cst_37 [1] : vector<3x3xf32> to vector<3xf32>
    %105 = vector.shape_cast %104 : vector<3xf32> to vector<3x1xf32>
    %106 = vector.broadcast %105 : vector<3x1xf32> to vector<3x3xf32>
    %107 = arith.subf %103, %106 : vector<3x3xf32>
    %108 = math.exp %107 : vector<3x3xf32>
    %cst_38 = arith.constant dense<0.000000e+00> : vector<3xf32>
    %109 = vector.multi_reduction <add>, %108, %cst_38 [1] : vector<3x3xf32> to vector<3xf32>
    %110 = vector.shape_cast %109 : vector<3xf32> to vector<3x1xf32>
    %111 = tpu.reciprocal %110 {approx = true} : vector<3x1xf32> -> vector<3x1xf32>
    %112 = vector.broadcast %111 : vector<3x1xf32> to vector<3x3xf32>
    %113 = arith.mulf %108, %112 : vector<3x3xf32>
    %114 = vector.extract_strided_slice %5 {offsets = [0, 20], sizes = [3, 4], strides = [1, 1]} : vector<3x32xf32> to vector<3x4xf32>
    %cst_39 = arith.constant dense<0.000000e+00> : vector<3x4xf32>
    %115 = tpu.matmul %113, %114, %cst_39 {dimension_numbers = #tpu.dot_dimension_numbers<[1], [0], [0], [1], [0, 0, 1, 1], [], []>} : vector<3x3xf32>, vector<3x4xf32>, vector<3x4xf32> -> vector<3x4xf32>
    %116 = vector.extract_strided_slice %1 {offsets = [0, 24], sizes = [3, 4], strides = [1, 1]} : vector<3x32xf32> to vector<3x4xf32>
    %117 = vector.extract_strided_slice %3 {offsets = [0, 24], sizes = [3, 4], strides = [1, 1]} : vector<3x32xf32> to vector<3x4xf32>
    %cst_40 = arith.constant dense<0.000000e+00> : vector<3x3xf32>
    %118 = tpu.matmul %116, %117, %cst_40 {dimension_numbers = #tpu.dot_dimension_numbers<[1], [1], [0], [0], [0, 0, 1, 0], [], []>} : vector<3x4xf32>, vector<3x4xf32>, vector<3x3xf32> -> vector<3x3xf32>
    %cst_41 = arith.constant 5.000000e-01 : f32
    %119 = vector.broadcast %cst_41 : f32 to vector<3x3xf32>
    %120 = arith.mulf %118, %119 : vector<3x3xf32>
    %121 = arith.addf %120, %7 : vector<3x3xf32>
    %cst_42 = arith.constant dense<0xFF800000> : vector<3xf32>
    %122 = vector.multi_reduction <maximumf>, %121, %cst_42 [1] : vector<3x3xf32> to vector<3xf32>
    %123 = vector.shape_cast %122 : vector<3xf32> to vector<3x1xf32>
    %124 = vector.broadcast %123 : vector<3x1xf32> to vector<3x3xf32>
    %125 = arith.subf %121, %124 : vector<3x3xf32>
    %126 = math.exp %125 : vector<3x3xf32>
    %cst_43 = arith.constant dense<0.000000e+00> : vector<3xf32>
    %127 = vector.multi_reduction <add>, %126, %cst_43 [1] : vector<3x3xf32> to vector<3xf32>
    %128 = vector.shape_cast %127 : vector<3xf32> to vector<3x1xf32>
    %129 = tpu.reciprocal %128 {approx = true} : vector<3x1xf32> -> vector<3x1xf32>
    %130 = vector.broadcast %129 : vector<3x1xf32> to vector<3x3xf32>
    %131 = arith.mulf %126, %130 : vector<3x3xf32>
    %132 = vector.extract_strided_slice %5 {offsets = [0, 24], sizes = [3, 4], strides = [1, 1]} : vector<3x32xf32> to vector<3x4xf32>
    %cst_44 = arith.constant dense<0.000000e+00> : vector<3x4xf32>
    %133 = tpu.matmul %131, %132, %cst_44 {dimension_numbers = #tpu.dot_dimension_numbers<[1], [0], [0], [1], [0, 0, 1, 1], [], []>} : vector<3x3xf32>, vector<3x4xf32>, vector<3x4xf32> -> vector<3x4xf32>
    %134 = vector.extract_strided_slice %1 {offsets = [0, 28], sizes = [3, 4], strides = [1, 1]} : vector<3x32xf32> to vector<3x4xf32>
    %135 = vector.extract_strided_slice %3 {offsets = [0, 28], sizes = [3, 4], strides = [1, 1]} : vector<3x32xf32> to vector<3x4xf32>
    %cst_45 = arith.constant dense<0.000000e+00> : vector<3x3xf32>
    %136 = tpu.matmul %134, %135, %cst_45 {dimension_numbers = #tpu.dot_dimension_numbers<[1], [1], [0], [0], [0, 0, 1, 0], [], []>} : vector<3x4xf32>, vector<3x4xf32>, vector<3x3xf32> -> vector<3x3xf32>
    %cst_46 = arith.constant 5.000000e-01 : f32
    %137 = vector.broadcast %cst_46 : f32 to vector<3x3xf32>
    %138 = arith.mulf %136, %137 : vector<3x3xf32>
    %139 = arith.addf %138, %7 : vector<3x3xf32>
    %cst_47 = arith.constant dense<0xFF800000> : vector<3xf32>
    %140 = vector.multi_reduction <maximumf>, %139, %cst_47 [1] : vector<3x3xf32> to vector<3xf32>
    %141 = vector.shape_cast %140 : vector<3xf32> to vector<3x1xf32>
    %142 = vector.broadcast %141 : vector<3x1xf32> to vector<3x3xf32>
    %143 = arith.subf %139, %142 : vector<3x3xf32>
    %144 = math.exp %143 : vector<3x3xf32>
    %cst_48 = arith.constant dense<0.000000e+00> : vector<3xf32>
    %145 = vector.multi_reduction <add>, %144, %cst_48 [1] : vector<3x3xf32> to vector<3xf32>
    %146 = vector.shape_cast %145 : vector<3xf32> to vector<3x1xf32>
    %147 = tpu.reciprocal %146 {approx = true} : vector<3x1xf32> -> vector<3x1xf32>
    %148 = vector.broadcast %147 : vector<3x1xf32> to vector<3x3xf32>
    %149 = arith.mulf %144, %148 : vector<3x3xf32>
    %150 = vector.extract_strided_slice %5 {offsets = [0, 28], sizes = [3, 4], strides = [1, 1]} : vector<3x32xf32> to vector<3x4xf32>
    %cst_49 = arith.constant dense<0.000000e+00> : vector<3x4xf32>
    %151 = tpu.matmul %149, %150, %cst_49 {dimension_numbers = #tpu.dot_dimension_numbers<[1], [0], [0], [1], [0, 0, 1, 1], [], []>} : vector<3x3xf32>, vector<3x4xf32>, vector<3x4xf32> -> vector<3x4xf32>
    %152 = tpu.concatenate %25, %43, %61, %79, %97, %115, %133, %151 in 1 : vector<3x4xf32>, vector<3x4xf32>, vector<3x4xf32>, vector<3x4xf32>, vector<3x4xf32>, vector<3x4xf32>, vector<3x4xf32>, vector<3x4xf32> -> vector<3x32xf32>
    %c0_50 = arith.constant 0 : index
    %c0_51 = arith.constant 0 : index
    %c0_52 = arith.constant 0 : index
    %153 = vector.load %arg5[%c0_50, %c0_51, %c0_52] : memref<1x3x32xf32, #tpu.memory_space<vmem>>, vector<1x3x32xf32>
    %154 = vector.shape_cast %153 : vector<1x3x32xf32> to vector<3x32xf32>
    %155 = vector.shape_cast %152 : vector<3x32xf32> to vector<1x3x32xf32>
    tpu.vector_store %arg5[%c0_50, %c0_51, %c0_52], %155 {strides = array<i32>} : memref<1x3x32xf32, #tpu.memory_space<vmem>>, vector<1x3x32xf32>,
    return
  }
  func.func @transform_0(%arg0: i32) -> (i32, i32, i32) {
    %c0_i32 = arith.constant 0 : i32
    %c0_i32_0 = arith.constant 0 : i32
    %c0_i32_1 = arith.constant 0 : i32
    return %arg0, %c0_i32, %c0_i32_0 : i32, i32, i32
  }
  func.func @transform_1(%arg0: i32) -> (i32, i32, i32) {
    %c0_i32 = arith.constant 0 : i32
    %c0_i32_0 = arith.constant 0 : i32
    %c0_i32_1 = arith.constant 0 : i32
    return %arg0, %c0_i32, %c0_i32_0 : i32, i32, i32
  }
  func.func @transform_2(%arg0: i32) -> (i32, i32, i32) {
    %c0_i32 = arith.constant 0 : i32
    %c0_i32_0 = arith.constant 0 : i32
    %c0_i32_1 = arith.constant 0 : i32
    return %arg0, %c0_i32, %c0_i32_0 : i32, i32, i32
  }
  func.func @transform_3(%arg0: i32) -> (i32, i32, i32) {
    %c0_i32 = arith.constant 0 : i32
    %c0_i32_0 = arith.constant 0 : i32
    %c0_i32_1 = arith.constant 0 : i32
    return %arg0, %c0_i32, %c0_i32_0 : i32, i32, i32
  }
  func.func @transform_4(%arg0: i32) -> (i32, i32, i32) {
    %c0_i32 = arith.constant 0 : i32
    %c0_i32_0 = arith.constant 0 : i32
    %c0_i32_1 = arith.constant 0 : i32
    return %arg0, %c0_i32, %c0_i32_0 : i32, i32, i32
  }
}

module attributes {stable_mosaic.version = 11 : i64} {
  func.func @_linear_res_ln_kernel(%arg0: i32, %arg1: memref<3x32xf32, #tpu.memory_space<vmem>>, %arg2: memref<3x32xf32, #tpu.memory_space<vmem>>, %arg3: memref<32x32xf32, #tpu.memory_space<vmem>>, %arg4: memref<1x32xf32, #tpu.memory_space<vmem>>, %arg5: memref<1x32xf32, #tpu.memory_space<vmem>>, %arg6: memref<1x32xf32, #tpu.memory_space<vmem>>, %arg7: memref<3x32xf32, #tpu.memory_space<vmem>>) attributes {dimension_semantics = [#tpu.dimension_semantics<parallel>], iteration_bounds = array<i64: 1>, scalar_prefetch = 0 : i64, scratch_operands = 0 : i64, tpu.core_type = #tpu.core_type<tc>, window_params = [{transform_indices = @transform_0, window_bounds = array<i64: 3, 32>}, {transform_indices = @transform_1, window_bounds = array<i64: 3, 32>}, {pipeline_mode = #tpu.pipeline_mode<synchronous>, transform_indices = @transform_2, window_bounds = array<i64: 32, 32>}, {pipeline_mode = #tpu.pipeline_mode<synchronous>, transform_indices = @transform_3, window_bounds = array<i64: 1, 32>}, {pipeline_mode = #tpu.pipeline_mode<synchronous>, transform_indices = @transform_4, window_bounds = array<i64: 1, 32>}, {pipeline_mode = #tpu.pipeline_mode<synchronous>, transform_indices = @transform_5, window_bounds = array<i64: 1, 32>}, {transform_indices = @transform_6, window_bounds = array<i64: 3, 32>}]} {
    %c0 = arith.constant 0 : index
    %c0_0 = arith.constant 0 : index
    %0 = vector.load %arg1[%c0, %c0_0] : memref<3x32xf32, #tpu.memory_space<vmem>>, vector<3x32xf32>
    %c0_1 = arith.constant 0 : index
    %c0_2 = arith.constant 0 : index
    %1 = vector.load %arg3[%c0_1, %c0_2] : memref<32x32xf32, #tpu.memory_space<vmem>>, vector<32x32xf32>
    %cst = arith.constant dense<0.000000e+00> : vector<3x32xf32>
    %2 = tpu.matmul %0, %1, %cst {dimension_numbers = #tpu.dot_dimension_numbers<[1], [0], [0], [1], [0, 0, 1, 1], [], []>} : vector<3x32xf32>, vector<32x32xf32>, vector<3x32xf32> -> vector<3x32xf32>
    %c0_3 = arith.constant 0 : index
    %c0_4 = arith.constant 0 : index
    %3 = vector.load %arg4[%c0_3, %c0_4] : memref<1x32xf32, #tpu.memory_space<vmem>>, vector<1x32xf32>
    %4 = vector.broadcast %3 : vector<1x32xf32> to vector<3x32xf32>
    %5 = arith.addf %2, %4 : vector<3x32xf32>
    %c0_5 = arith.constant 0 : index
    %c0_6 = arith.constant 0 : index
    %6 = vector.load %arg2[%c0_5, %c0_6] : memref<3x32xf32, #tpu.memory_space<vmem>>, vector<3x32xf32>
    %7 = arith.addf %5, %6 : vector<3x32xf32>
    %cst_7 = arith.constant dense<0.000000e+00> : vector<3xf32>
    %8 = vector.multi_reduction <add>, %7, %cst_7 [1] : vector<3x32xf32> to vector<3xf32>
    %9 = vector.shape_cast %8 : vector<3xf32> to vector<3x1xf32>
    %cst_8 = arith.constant 3.200000e+01 : f32
    %10 = vector.broadcast %cst_8 : f32 to vector<3x1xf32>
    %11 = arith.divf %9, %10 : vector<3x1xf32>
    %12 = vector.broadcast %11 : vector<3x1xf32> to vector<3x32xf32>
    %13 = arith.subf %7, %12 : vector<3x32xf32>
    %14 = arith.mulf %13, %13 : vector<3x32xf32>
    %cst_9 = arith.constant dense<0.000000e+00> : vector<3xf32>
    %15 = vector.multi_reduction <add>, %14, %cst_9 [1] : vector<3x32xf32> to vector<3xf32>
    %16 = vector.shape_cast %15 : vector<3xf32> to vector<3x1xf32>
    %cst_10 = arith.constant 3.200000e+01 : f32
    %17 = vector.broadcast %cst_10 : f32 to vector<3x1xf32>
    %18 = arith.divf %16, %17 : vector<3x1xf32>
    %cst_11 = arith.constant 9.99999974E-6 : f32
    %19 = vector.broadcast %cst_11 : f32 to vector<3x1xf32>
    %20 = arith.addf %18, %19 : vector<3x1xf32>
    %21 = math.rsqrt %20 : vector<3x1xf32>
    %22 = vector.broadcast %21 : vector<3x1xf32> to vector<3x32xf32>
    %23 = arith.mulf %13, %22 : vector<3x32xf32>
    %c0_12 = arith.constant 0 : index
    %c0_13 = arith.constant 0 : index
    %24 = vector.load %arg5[%c0_12, %c0_13] : memref<1x32xf32, #tpu.memory_space<vmem>>, vector<1x32xf32>
    %25 = vector.broadcast %24 : vector<1x32xf32> to vector<3x32xf32>
    %26 = arith.mulf %23, %25 : vector<3x32xf32>
    %c0_14 = arith.constant 0 : index
    %c0_15 = arith.constant 0 : index
    %27 = vector.load %arg6[%c0_14, %c0_15] : memref<1x32xf32, #tpu.memory_space<vmem>>, vector<1x32xf32>
    %28 = vector.broadcast %27 : vector<1x32xf32> to vector<3x32xf32>
    %29 = arith.addf %26, %28 : vector<3x32xf32>
    %c0_16 = arith.constant 0 : index
    %c0_17 = arith.constant 0 : index
    %30 = vector.load %arg7[%c0_16, %c0_17] : memref<3x32xf32, #tpu.memory_space<vmem>>, vector<3x32xf32>
    tpu.vector_store %arg7[%c0_16, %c0_17], %29 {strides = array<i32>} : memref<3x32xf32, #tpu.memory_space<vmem>>, vector<3x32xf32>,
    return
  }
  func.func @transform_0(%arg0: i32) -> (i32, i32) {
    %c0_i32 = arith.constant 0 : i32
    %c0_i32_0 = arith.constant 0 : i32
    return %arg0, %c0_i32 : i32, i32
  }
  func.func @transform_1(%arg0: i32) -> (i32, i32) {
    %c0_i32 = arith.constant 0 : i32
    %c0_i32_0 = arith.constant 0 : i32
    return %arg0, %c0_i32 : i32, i32
  }
  func.func @transform_2(%arg0: i32) -> (i32, i32) {
    %c0_i32 = arith.constant 0 : i32
    %c0_i32_0 = arith.constant 0 : i32
    %c0_i32_1 = arith.constant 0 : i32
    return %c0_i32, %c0_i32_0 : i32, i32
  }
  func.func @transform_3(%arg0: i32) -> (i32, i32) {
    %c0_i32 = arith.constant 0 : i32
    %c0_i32_0 = arith.constant 0 : i32
    %c0_i32_1 = arith.constant 0 : i32
    return %c0_i32, %c0_i32_0 : i32, i32
  }
  func.func @transform_4(%arg0: i32) -> (i32, i32) {
    %c0_i32 = arith.constant 0 : i32
    %c0_i32_0 = arith.constant 0 : i32
    %c0_i32_1 = arith.constant 0 : i32
    return %c0_i32, %c0_i32_0 : i32, i32
  }
  func.func @transform_5(%arg0: i32) -> (i32, i32) {
    %c0_i32 = arith.constant 0 : i32
    %c0_i32_0 = arith.constant 0 : i32
    %c0_i32_1 = arith.constant 0 : i32
    return %c0_i32, %c0_i32_0 : i32, i32
  }
  func.func @transform_6(%arg0: i32) -> (i32, i32) {
    %c0_i32 = arith.constant 0 : i32
    %c0_i32_0 = arith.constant 0 : i32
    return %arg0, %c0_i32 : i32, i32
  }
}

module attributes {stable_mosaic.version = 11 : i64} {
  func.func @_ffn_ln_kernel(%arg0: i32, %arg1: memref<3x32xf32, #tpu.memory_space<vmem>>, %arg2: memref<32x128xf32, #tpu.memory_space<vmem>>, %arg3: memref<1x128xf32, #tpu.memory_space<vmem>>, %arg4: memref<128x32xf32, #tpu.memory_space<vmem>>, %arg5: memref<1x32xf32, #tpu.memory_space<vmem>>, %arg6: memref<1x32xf32, #tpu.memory_space<vmem>>, %arg7: memref<1x32xf32, #tpu.memory_space<vmem>>, %arg8: memref<3x32xf32, #tpu.memory_space<vmem>>) attributes {dimension_semantics = [#tpu.dimension_semantics<parallel>], iteration_bounds = array<i64: 1>, scalar_prefetch = 0 : i64, scratch_operands = 0 : i64, tpu.core_type = #tpu.core_type<tc>, window_params = [{transform_indices = @transform_0, window_bounds = array<i64: 3, 32>}, {pipeline_mode = #tpu.pipeline_mode<synchronous>, transform_indices = @transform_1, window_bounds = array<i64: 32, 128>}, {pipeline_mode = #tpu.pipeline_mode<synchronous>, transform_indices = @transform_2, window_bounds = array<i64: 1, 128>}, {pipeline_mode = #tpu.pipeline_mode<synchronous>, transform_indices = @transform_3, window_bounds = array<i64: 128, 32>}, {pipeline_mode = #tpu.pipeline_mode<synchronous>, transform_indices = @transform_4, window_bounds = array<i64: 1, 32>}, {pipeline_mode = #tpu.pipeline_mode<synchronous>, transform_indices = @transform_5, window_bounds = array<i64: 1, 32>}, {pipeline_mode = #tpu.pipeline_mode<synchronous>, transform_indices = @transform_6, window_bounds = array<i64: 1, 32>}, {transform_indices = @transform_7, window_bounds = array<i64: 3, 32>}]} {
    %c0 = arith.constant 0 : index
    %c0_0 = arith.constant 0 : index
    %0 = vector.load %arg1[%c0, %c0_0] : memref<3x32xf32, #tpu.memory_space<vmem>>, vector<3x32xf32>
    %c0_1 = arith.constant 0 : index
    %c0_2 = arith.constant 0 : index
    %1 = vector.load %arg2[%c0_1, %c0_2] : memref<32x128xf32, #tpu.memory_space<vmem>>, vector<32x128xf32>
    %cst = arith.constant dense<0.000000e+00> : vector<3x128xf32>
    %2 = tpu.matmul %0, %1, %cst {dimension_numbers = #tpu.dot_dimension_numbers<[1], [0], [0], [1], [0, 0, 1, 1], [], []>} : vector<3x32xf32>, vector<32x128xf32>, vector<3x128xf32> -> vector<3x128xf32>
    %c0_3 = arith.constant 0 : index
    %c0_4 = arith.constant 0 : index
    %3 = vector.load %arg3[%c0_3, %c0_4] : memref<1x128xf32, #tpu.memory_space<vmem>>, vector<1x128xf32>
    %4 = vector.broadcast %3 : vector<1x128xf32> to vector<3x128xf32>
    %5 = arith.addf %2, %4 : vector<3x128xf32>
    %cst_5 = arith.constant 0.000000e+00 : f32
    %6 = vector.broadcast %cst_5 : f32 to vector<3x128xf32>
    %7 = arith.maximumf %5, %6 : vector<3x128xf32>
    %c0_6 = arith.constant 0 : index
    %c0_7 = arith.constant 0 : index
    %8 = vector.load %arg4[%c0_6, %c0_7] : memref<128x32xf32, #tpu.memory_space<vmem>>, vector<128x32xf32>
    %cst_8 = arith.constant dense<0.000000e+00> : vector<3x32xf32>
    %9 = tpu.matmul %7, %8, %cst_8 {dimension_numbers = #tpu.dot_dimension_numbers<[1], [0], [0], [1], [0, 0, 1, 1], [], []>} : vector<3x128xf32>, vector<128x32xf32>, vector<3x32xf32> -> vector<3x32xf32>
    %c0_9 = arith.constant 0 : index
    %c0_10 = arith.constant 0 : index
    %10 = vector.load %arg5[%c0_9, %c0_10] : memref<1x32xf32, #tpu.memory_space<vmem>>, vector<1x32xf32>
    %11 = vector.broadcast %10 : vector<1x32xf32> to vector<3x32xf32>
    %12 = arith.addf %9, %11 : vector<3x32xf32>
    %13 = arith.addf %12, %0 : vector<3x32xf32>
    %cst_11 = arith.constant dense<0.000000e+00> : vector<3xf32>
    %14 = vector.multi_reduction <add>, %13, %cst_11 [1] : vector<3x32xf32> to vector<3xf32>
    %15 = vector.shape_cast %14 : vector<3xf32> to vector<3x1xf32>
    %cst_12 = arith.constant 3.200000e+01 : f32
    %16 = vector.broadcast %cst_12 : f32 to vector<3x1xf32>
    %17 = arith.divf %15, %16 : vector<3x1xf32>
    %18 = vector.broadcast %17 : vector<3x1xf32> to vector<3x32xf32>
    %19 = arith.subf %13, %18 : vector<3x32xf32>
    %20 = arith.mulf %19, %19 : vector<3x32xf32>
    %cst_13 = arith.constant dense<0.000000e+00> : vector<3xf32>
    %21 = vector.multi_reduction <add>, %20, %cst_13 [1] : vector<3x32xf32> to vector<3xf32>
    %22 = vector.shape_cast %21 : vector<3xf32> to vector<3x1xf32>
    %cst_14 = arith.constant 3.200000e+01 : f32
    %23 = vector.broadcast %cst_14 : f32 to vector<3x1xf32>
    %24 = arith.divf %22, %23 : vector<3x1xf32>
    %cst_15 = arith.constant 9.99999974E-6 : f32
    %25 = vector.broadcast %cst_15 : f32 to vector<3x1xf32>
    %26 = arith.addf %24, %25 : vector<3x1xf32>
    %27 = math.rsqrt %26 : vector<3x1xf32>
    %28 = vector.broadcast %27 : vector<3x1xf32> to vector<3x32xf32>
    %29 = arith.mulf %19, %28 : vector<3x32xf32>
    %c0_16 = arith.constant 0 : index
    %c0_17 = arith.constant 0 : index
    %30 = vector.load %arg6[%c0_16, %c0_17] : memref<1x32xf32, #tpu.memory_space<vmem>>, vector<1x32xf32>
    %31 = vector.broadcast %30 : vector<1x32xf32> to vector<3x32xf32>
    %32 = arith.mulf %29, %31 : vector<3x32xf32>
    %c0_18 = arith.constant 0 : index
    %c0_19 = arith.constant 0 : index
    %33 = vector.load %arg7[%c0_18, %c0_19] : memref<1x32xf32, #tpu.memory_space<vmem>>, vector<1x32xf32>
    %34 = vector.broadcast %33 : vector<1x32xf32> to vector<3x32xf32>
    %35 = arith.addf %32, %34 : vector<3x32xf32>
    %c0_20 = arith.constant 0 : index
    %c0_21 = arith.constant 0 : index
    %36 = vector.load %arg8[%c0_20, %c0_21] : memref<3x32xf32, #tpu.memory_space<vmem>>, vector<3x32xf32>
    tpu.vector_store %arg8[%c0_20, %c0_21], %35 {strides = array<i32>} : memref<3x32xf32, #tpu.memory_space<vmem>>, vector<3x32xf32>,
    return
  }
  func.func @transform_0(%arg0: i32) -> (i32, i32) {
    %c0_i32 = arith.constant 0 : i32
    %c0_i32_0 = arith.constant 0 : i32
    return %arg0, %c0_i32 : i32, i32
  }
  func.func @transform_1(%arg0: i32) -> (i32, i32) {
    %c0_i32 = arith.constant 0 : i32
    %c0_i32_0 = arith.constant 0 : i32
    %c0_i32_1 = arith.constant 0 : i32
    return %c0_i32, %c0_i32_0 : i32, i32
  }
  func.func @transform_2(%arg0: i32) -> (i32, i32) {
    %c0_i32 = arith.constant 0 : i32
    %c0_i32_0 = arith.constant 0 : i32
    %c0_i32_1 = arith.constant 0 : i32
    return %c0_i32, %c0_i32_0 : i32, i32
  }
  func.func @transform_3(%arg0: i32) -> (i32, i32) {
    %c0_i32 = arith.constant 0 : i32
    %c0_i32_0 = arith.constant 0 : i32
    %c0_i32_1 = arith.constant 0 : i32
    return %c0_i32, %c0_i32_0 : i32, i32
  }
  func.func @transform_4(%arg0: i32) -> (i32, i32) {
    %c0_i32 = arith.constant 0 : i32
    %c0_i32_0 = arith.constant 0 : i32
    %c0_i32_1 = arith.constant 0 : i32
    return %c0_i32, %c0_i32_0 : i32, i32
  }
  func.func @transform_5(%arg0: i32) -> (i32, i32) {
    %c0_i32 = arith.constant 0 : i32
    %c0_i32_0 = arith.constant 0 : i32
    %c0_i32_1 = arith.constant 0 : i32
    return %c0_i32, %c0_i32_0 : i32, i32
  }
  func.func @transform_6(%arg0: i32) -> (i32, i32) {
    %c0_i32 = arith.constant 0 : i32
    %c0_i32_0 = arith.constant 0 : i32
    %c0_i32_1 = arith.constant 0 : i32
    return %c0_i32, %c0_i32_0 : i32, i32
  }
  func.func @transform_7(%arg0: i32) -> (i32, i32) {
    %c0_i32 = arith.constant 0 : i32
    %c0_i32_0 = arith.constant 0 : i32
    return %arg0, %c0_i32 : i32, i32
  }
}

module attributes {stable_mosaic.version = 11 : i64} {
  func.func @_mha_kernel(%arg0: i32, %arg1: memref<1x15x32xf32, #tpu.memory_space<vmem>>, %arg2: memref<1x1x32xf32, #tpu.memory_space<vmem>>, %arg3: memref<1x1x32xf32, #tpu.memory_space<vmem>>, %arg4: memref<1x1x1xf32, #tpu.memory_space<vmem>>, %arg5: memref<1x15x32xf32, #tpu.memory_space<vmem>>) attributes {dimension_semantics = [#tpu.dimension_semantics<parallel>], iteration_bounds = array<i64: 3>, scalar_prefetch = 0 : i64, scratch_operands = 0 : i64, tpu.core_type = #tpu.core_type<tc>, window_params = [{transform_indices = @transform_0, window_bounds = array<i64: 1, 15, 32>}, {transform_indices = @transform_1, window_bounds = array<i64: 1, 1, 32>}, {transform_indices = @transform_2, window_bounds = array<i64: 1, 1, 32>}, {transform_indices = @transform_3, window_bounds = array<i64: 1, 1, 1>}, {transform_indices = @transform_4, window_bounds = array<i64: 1, 15, 32>}]} {
    %c0 = arith.constant 0 : index
    %c0_0 = arith.constant 0 : index
    %c0_1 = arith.constant 0 : index
    %0 = vector.load %arg1[%c0, %c0_0, %c0_1] : memref<1x15x32xf32, #tpu.memory_space<vmem>>, vector<1x15x32xf32>
    %1 = vector.shape_cast %0 : vector<1x15x32xf32> to vector<15x32xf32>
    %c0_2 = arith.constant 0 : index
    %c0_3 = arith.constant 0 : index
    %c0_4 = arith.constant 0 : index
    %2 = vector.load %arg2[%c0_2, %c0_3, %c0_4] : memref<1x1x32xf32, #tpu.memory_space<vmem>>, vector<1x1x32xf32>
    %3 = vector.shape_cast %2 : vector<1x1x32xf32> to vector<1x32xf32>
    %c0_5 = arith.constant 0 : index
    %c0_6 = arith.constant 0 : index
    %c0_7 = arith.constant 0 : index
    %4 = vector.load %arg3[%c0_5, %c0_6, %c0_7] : memref<1x1x32xf32, #tpu.memory_space<vmem>>, vector<1x1x32xf32>
    %5 = vector.shape_cast %4 : vector<1x1x32xf32> to vector<1x32xf32>
    %c0_8 = arith.constant 0 : index
    %c0_9 = arith.constant 0 : index
    %c0_10 = arith.constant 0 : index
    %6 = vector.load %arg4[%c0_8, %c0_9, %c0_10] : memref<1x1x1xf32, #tpu.memory_space<vmem>>, vector<1x1x1xf32>
    %7 = vector.shape_cast %6 : vector<1x1x1xf32> to vector<1x1xf32>
    %8 = vector.extract_strided_slice %1 {offsets = [0, 0], sizes = [15, 8], strides = [1, 1]} : vector<15x32xf32> to vector<15x8xf32>
    %9 = vector.extract_strided_slice %3 {offsets = [0, 0], sizes = [1, 8], strides = [1, 1]} : vector<1x32xf32> to vector<1x8xf32>
    %cst = arith.constant dense<0.000000e+00> : vector<15x1xf32>
    %10 = tpu.matmul %8, %9, %cst {dimension_numbers = #tpu.dot_dimension_numbers<[1], [1], [0], [0], [0, 0, 1, 0], [], []>} : vector<15x8xf32>, vector<1x8xf32>, vector<15x1xf32> -> vector<15x1xf32>
    %cst_11 = arith.constant 0.353553385 : f32
    %11 = vector.broadcast %cst_11 : f32 to vector<15x1xf32>
    %12 = arith.mulf %10, %11 : vector<15x1xf32>
    %13 = vector.broadcast %7 : vector<1x1xf32> to vector<15x1xf32>
    %14 = arith.addf %12, %13 : vector<15x1xf32>
    %cst_12 = arith.constant dense<0xFF800000> : vector<15xf32>
    %15 = vector.multi_reduction <maximumf>, %14, %cst_12 [1] : vector<15x1xf32> to vector<15xf32>
    %16 = vector.shape_cast %15 : vector<15xf32> to vector<15x1xf32>
    %17 = arith.subf %14, %16 : vector<15x1xf32>
    %18 = math.exp %17 : vector<15x1xf32>
    %cst_13 = arith.constant dense<0.000000e+00> : vector<15xf32>
    %19 = vector.multi_reduction <add>, %18, %cst_13 [1] : vector<15x1xf32> to vector<15xf32>
    %20 = vector.shape_cast %19 : vector<15xf32> to vector<15x1xf32>
    %21 = tpu.reciprocal %20 {approx = true} : vector<15x1xf32> -> vector<15x1xf32>
    %22 = arith.mulf %18, %21 : vector<15x1xf32>
    %23 = vector.extract_strided_slice %5 {offsets = [0, 0], sizes = [1, 8], strides = [1, 1]} : vector<1x32xf32> to vector<1x8xf32>
    %cst_14 = arith.constant dense<0.000000e+00> : vector<15x8xf32>
    %24 = tpu.matmul %22, %23, %cst_14 {dimension_numbers = #tpu.dot_dimension_numbers<[1], [0], [0], [1], [0, 0, 1, 1], [], []>} : vector<15x1xf32>, vector<1x8xf32>, vector<15x8xf32> -> vector<15x8xf32>
    %25 = vector.extract_strided_slice %1 {offsets = [0, 8], sizes = [15, 8], strides = [1, 1]} : vector<15x32xf32> to vector<15x8xf32>
    %26 = vector.extract_strided_slice %3 {offsets = [0, 8], sizes = [1, 8], strides = [1, 1]} : vector<1x32xf32> to vector<1x8xf32>
    %cst_15 = arith.constant dense<0.000000e+00> : vector<15x1xf32>
    %27 = tpu.matmul %25, %26, %cst_15 {dimension_numbers = #tpu.dot_dimension_numbers<[1], [1], [0], [0], [0, 0, 1, 0], [], []>} : vector<15x8xf32>, vector<1x8xf32>, vector<15x1xf32> -> vector<15x1xf32>
    %cst_16 = arith.constant 0.353553385 : f32
    %28 = vector.broadcast %cst_16 : f32 to vector<15x1xf32>
    %29 = arith.mulf %27, %28 : vector<15x1xf32>
    %30 = vector.broadcast %7 : vector<1x1xf32> to vector<15x1xf32>
    %31 = arith.addf %29, %30 : vector<15x1xf32>
    %cst_17 = arith.constant dense<0xFF800000> : vector<15xf32>
    %32 = vector.multi_reduction <maximumf>, %31, %cst_17 [1] : vector<15x1xf32> to vector<15xf32>
    %33 = vector.shape_cast %32 : vector<15xf32> to vector<15x1xf32>
    %34 = arith.subf %31, %33 : vector<15x1xf32>
    %35 = math.exp %34 : vector<15x1xf32>
    %cst_18 = arith.constant dense<0.000000e+00> : vector<15xf32>
    %36 = vector.multi_reduction <add>, %35, %cst_18 [1] : vector<15x1xf32> to vector<15xf32>
    %37 = vector.shape_cast %36 : vector<15xf32> to vector<15x1xf32>
    %38 = tpu.reciprocal %37 {approx = true} : vector<15x1xf32> -> vector<15x1xf32>
    %39 = arith.mulf %35, %38 : vector<15x1xf32>
    %40 = vector.extract_strided_slice %5 {offsets = [0, 8], sizes = [1, 8], strides = [1, 1]} : vector<1x32xf32> to vector<1x8xf32>
    %cst_19 = arith.constant dense<0.000000e+00> : vector<15x8xf32>
    %41 = tpu.matmul %39, %40, %cst_19 {dimension_numbers = #tpu.dot_dimension_numbers<[1], [0], [0], [1], [0, 0, 1, 1], [], []>} : vector<15x1xf32>, vector<1x8xf32>, vector<15x8xf32> -> vector<15x8xf32>
    %42 = vector.extract_strided_slice %1 {offsets = [0, 16], sizes = [15, 8], strides = [1, 1]} : vector<15x32xf32> to vector<15x8xf32>
    %43 = vector.extract_strided_slice %3 {offsets = [0, 16], sizes = [1, 8], strides = [1, 1]} : vector<1x32xf32> to vector<1x8xf32>
    %cst_20 = arith.constant dense<0.000000e+00> : vector<15x1xf32>
    %44 = tpu.matmul %42, %43, %cst_20 {dimension_numbers = #tpu.dot_dimension_numbers<[1], [1], [0], [0], [0, 0, 1, 0], [], []>} : vector<15x8xf32>, vector<1x8xf32>, vector<15x1xf32> -> vector<15x1xf32>
    %cst_21 = arith.constant 0.353553385 : f32
    %45 = vector.broadcast %cst_21 : f32 to vector<15x1xf32>
    %46 = arith.mulf %44, %45 : vector<15x1xf32>
    %47 = vector.broadcast %7 : vector<1x1xf32> to vector<15x1xf32>
    %48 = arith.addf %46, %47 : vector<15x1xf32>
    %cst_22 = arith.constant dense<0xFF800000> : vector<15xf32>
    %49 = vector.multi_reduction <maximumf>, %48, %cst_22 [1] : vector<15x1xf32> to vector<15xf32>
    %50 = vector.shape_cast %49 : vector<15xf32> to vector<15x1xf32>
    %51 = arith.subf %48, %50 : vector<15x1xf32>
    %52 = math.exp %51 : vector<15x1xf32>
    %cst_23 = arith.constant dense<0.000000e+00> : vector<15xf32>
    %53 = vector.multi_reduction <add>, %52, %cst_23 [1] : vector<15x1xf32> to vector<15xf32>
    %54 = vector.shape_cast %53 : vector<15xf32> to vector<15x1xf32>
    %55 = tpu.reciprocal %54 {approx = true} : vector<15x1xf32> -> vector<15x1xf32>
    %56 = arith.mulf %52, %55 : vector<15x1xf32>
    %57 = vector.extract_strided_slice %5 {offsets = [0, 16], sizes = [1, 8], strides = [1, 1]} : vector<1x32xf32> to vector<1x8xf32>
    %cst_24 = arith.constant dense<0.000000e+00> : vector<15x8xf32>
    %58 = tpu.matmul %56, %57, %cst_24 {dimension_numbers = #tpu.dot_dimension_numbers<[1], [0], [0], [1], [0, 0, 1, 1], [], []>} : vector<15x1xf32>, vector<1x8xf32>, vector<15x8xf32> -> vector<15x8xf32>
    %59 = vector.extract_strided_slice %1 {offsets = [0, 24], sizes = [15, 8], strides = [1, 1]} : vector<15x32xf32> to vector<15x8xf32>
    %60 = vector.extract_strided_slice %3 {offsets = [0, 24], sizes = [1, 8], strides = [1, 1]} : vector<1x32xf32> to vector<1x8xf32>
    %cst_25 = arith.constant dense<0.000000e+00> : vector<15x1xf32>
    %61 = tpu.matmul %59, %60, %cst_25 {dimension_numbers = #tpu.dot_dimension_numbers<[1], [1], [0], [0], [0, 0, 1, 0], [], []>} : vector<15x8xf32>, vector<1x8xf32>, vector<15x1xf32> -> vector<15x1xf32>
    %cst_26 = arith.constant 0.353553385 : f32
    %62 = vector.broadcast %cst_26 : f32 to vector<15x1xf32>
    %63 = arith.mulf %61, %62 : vector<15x1xf32>
    %64 = vector.broadcast %7 : vector<1x1xf32> to vector<15x1xf32>
    %65 = arith.addf %63, %64 : vector<15x1xf32>
    %cst_27 = arith.constant dense<0xFF800000> : vector<15xf32>
    %66 = vector.multi_reduction <maximumf>, %65, %cst_27 [1] : vector<15x1xf32> to vector<15xf32>
    %67 = vector.shape_cast %66 : vector<15xf32> to vector<15x1xf32>
    %68 = arith.subf %65, %67 : vector<15x1xf32>
    %69 = math.exp %68 : vector<15x1xf32>
    %cst_28 = arith.constant dense<0.000000e+00> : vector<15xf32>
    %70 = vector.multi_reduction <add>, %69, %cst_28 [1] : vector<15x1xf32> to vector<15xf32>
    %71 = vector.shape_cast %70 : vector<15xf32> to vector<15x1xf32>
    %72 = tpu.reciprocal %71 {approx = true} : vector<15x1xf32> -> vector<15x1xf32>
    %73 = arith.mulf %69, %72 : vector<15x1xf32>
    %74 = vector.extract_strided_slice %5 {offsets = [0, 24], sizes = [1, 8], strides = [1, 1]} : vector<1x32xf32> to vector<1x8xf32>
    %cst_29 = arith.constant dense<0.000000e+00> : vector<15x8xf32>
    %75 = tpu.matmul %73, %74, %cst_29 {dimension_numbers = #tpu.dot_dimension_numbers<[1], [0], [0], [1], [0, 0, 1, 1], [], []>} : vector<15x1xf32>, vector<1x8xf32>, vector<15x8xf32> -> vector<15x8xf32>
    %76 = tpu.concatenate %24, %41, %58, %75 in 1 : vector<15x8xf32>, vector<15x8xf32>, vector<15x8xf32>, vector<15x8xf32> -> vector<15x32xf32>
    %c0_30 = arith.constant 0 : index
    %c0_31 = arith.constant 0 : index
    %c0_32 = arith.constant 0 : index
    %77 = vector.load %arg5[%c0_30, %c0_31, %c0_32] : memref<1x15x32xf32, #tpu.memory_space<vmem>>, vector<1x15x32xf32>
    %78 = vector.shape_cast %77 : vector<1x15x32xf32> to vector<15x32xf32>
    %79 = vector.shape_cast %76 : vector<15x32xf32> to vector<1x15x32xf32>
    tpu.vector_store %arg5[%c0_30, %c0_31, %c0_32], %79 {strides = array<i32>} : memref<1x15x32xf32, #tpu.memory_space<vmem>>, vector<1x15x32xf32>,
    return
  }
  func.func @transform_0(%arg0: i32) -> (i32, i32, i32) {
    %c0_i32 = arith.constant 0 : i32
    %c0_i32_0 = arith.constant 0 : i32
    %c0_i32_1 = arith.constant 0 : i32
    return %arg0, %c0_i32, %c0_i32_0 : i32, i32, i32
  }
  func.func @transform_1(%arg0: i32) -> (i32, i32, i32) {
    %c0_i32 = arith.constant 0 : i32
    %c0_i32_0 = arith.constant 0 : i32
    %c0_i32_1 = arith.constant 0 : i32
    return %arg0, %c0_i32, %c0_i32_0 : i32, i32, i32
  }
  func.func @transform_2(%arg0: i32) -> (i32, i32, i32) {
    %c0_i32 = arith.constant 0 : i32
    %c0_i32_0 = arith.constant 0 : i32
    %c0_i32_1 = arith.constant 0 : i32
    return %arg0, %c0_i32, %c0_i32_0 : i32, i32, i32
  }
  func.func @transform_3(%arg0: i32) -> (i32, i32, i32) {
    %c0_i32 = arith.constant 0 : i32
    %c0_i32_0 = arith.constant 0 : i32
    %c0_i32_1 = arith.constant 0 : i32
    return %arg0, %c0_i32, %c0_i32_0 : i32, i32, i32
  }
  func.func @transform_4(%arg0: i32) -> (i32, i32, i32) {
    %c0_i32 = arith.constant 0 : i32
    %c0_i32_0 = arith.constant 0 : i32
    %c0_i32_1 = arith.constant 0 : i32
    return %arg0, %c0_i32, %c0_i32_0 : i32, i32, i32
  }
}

module attributes {stable_mosaic.version = 11 : i64} {
  func.func @_linear_res_ln_kernel(%arg0: i32, %arg1: memref<45x32xf32, #tpu.memory_space<vmem>>, %arg2: memref<45x32xf32, #tpu.memory_space<vmem>>, %arg3: memref<32x32xf32, #tpu.memory_space<vmem>>, %arg4: memref<1x32xf32, #tpu.memory_space<vmem>>, %arg5: memref<1x32xf32, #tpu.memory_space<vmem>>, %arg6: memref<1x32xf32, #tpu.memory_space<vmem>>, %arg7: memref<45x32xf32, #tpu.memory_space<vmem>>) attributes {dimension_semantics = [#tpu.dimension_semantics<parallel>], iteration_bounds = array<i64: 1>, scalar_prefetch = 0 : i64, scratch_operands = 0 : i64, tpu.core_type = #tpu.core_type<tc>, window_params = [{transform_indices = @transform_0, window_bounds = array<i64: 45, 32>}, {transform_indices = @transform_1, window_bounds = array<i64: 45, 32>}, {pipeline_mode = #tpu.pipeline_mode<synchronous>, transform_indices = @transform_2, window_bounds = array<i64: 32, 32>}, {pipeline_mode = #tpu.pipeline_mode<synchronous>, transform_indices = @transform_3, window_bounds = array<i64: 1, 32>}, {pipeline_mode = #tpu.pipeline_mode<synchronous>, transform_indices = @transform_4, window_bounds = array<i64: 1, 32>}, {pipeline_mode = #tpu.pipeline_mode<synchronous>, transform_indices = @transform_5, window_bounds = array<i64: 1, 32>}, {transform_indices = @transform_6, window_bounds = array<i64: 45, 32>}]} {
    %c0 = arith.constant 0 : index
    %c0_0 = arith.constant 0 : index
    %0 = vector.load %arg1[%c0, %c0_0] : memref<45x32xf32, #tpu.memory_space<vmem>>, vector<45x32xf32>
    %c0_1 = arith.constant 0 : index
    %c0_2 = arith.constant 0 : index
    %1 = vector.load %arg3[%c0_1, %c0_2] : memref<32x32xf32, #tpu.memory_space<vmem>>, vector<32x32xf32>
    %cst = arith.constant dense<0.000000e+00> : vector<45x32xf32>
    %2 = tpu.matmul %0, %1, %cst {dimension_numbers = #tpu.dot_dimension_numbers<[1], [0], [0], [1], [0, 0, 1, 1], [], []>} : vector<45x32xf32>, vector<32x32xf32>, vector<45x32xf32> -> vector<45x32xf32>
    %c0_3 = arith.constant 0 : index
    %c0_4 = arith.constant 0 : index
    %3 = vector.load %arg4[%c0_3, %c0_4] : memref<1x32xf32, #tpu.memory_space<vmem>>, vector<1x32xf32>
    %4 = vector.broadcast %3 : vector<1x32xf32> to vector<45x32xf32>
    %5 = arith.addf %2, %4 : vector<45x32xf32>
    %c0_5 = arith.constant 0 : index
    %c0_6 = arith.constant 0 : index
    %6 = vector.load %arg2[%c0_5, %c0_6] : memref<45x32xf32, #tpu.memory_space<vmem>>, vector<45x32xf32>
    %7 = arith.addf %5, %6 : vector<45x32xf32>
    %cst_7 = arith.constant dense<0.000000e+00> : vector<45xf32>
    %8 = vector.multi_reduction <add>, %7, %cst_7 [1] : vector<45x32xf32> to vector<45xf32>
    %9 = vector.shape_cast %8 : vector<45xf32> to vector<45x1xf32>
    %cst_8 = arith.constant 3.200000e+01 : f32
    %10 = vector.broadcast %cst_8 : f32 to vector<45x1xf32>
    %11 = arith.divf %9, %10 : vector<45x1xf32>
    %12 = vector.broadcast %11 : vector<45x1xf32> to vector<45x32xf32>
    %13 = arith.subf %7, %12 : vector<45x32xf32>
    %14 = arith.mulf %13, %13 : vector<45x32xf32>
    %cst_9 = arith.constant dense<0.000000e+00> : vector<45xf32>
    %15 = vector.multi_reduction <add>, %14, %cst_9 [1] : vector<45x32xf32> to vector<45xf32>
    %16 = vector.shape_cast %15 : vector<45xf32> to vector<45x1xf32>
    %cst_10 = arith.constant 3.200000e+01 : f32
    %17 = vector.broadcast %cst_10 : f32 to vector<45x1xf32>
    %18 = arith.divf %16, %17 : vector<45x1xf32>
    %cst_11 = arith.constant 9.99999996E-13 : f32
    %19 = vector.broadcast %cst_11 : f32 to vector<45x1xf32>
    %20 = arith.addf %18, %19 : vector<45x1xf32>
    %21 = math.rsqrt %20 : vector<45x1xf32>
    %22 = vector.broadcast %21 : vector<45x1xf32> to vector<45x32xf32>
    %23 = arith.mulf %13, %22 : vector<45x32xf32>
    %c0_12 = arith.constant 0 : index
    %c0_13 = arith.constant 0 : index
    %24 = vector.load %arg5[%c0_12, %c0_13] : memref<1x32xf32, #tpu.memory_space<vmem>>, vector<1x32xf32>
    %25 = vector.broadcast %24 : vector<1x32xf32> to vector<45x32xf32>
    %26 = arith.mulf %23, %25 : vector<45x32xf32>
    %c0_14 = arith.constant 0 : index
    %c0_15 = arith.constant 0 : index
    %27 = vector.load %arg6[%c0_14, %c0_15] : memref<1x32xf32, #tpu.memory_space<vmem>>, vector<1x32xf32>
    %28 = vector.broadcast %27 : vector<1x32xf32> to vector<45x32xf32>
    %29 = arith.addf %26, %28 : vector<45x32xf32>
    %c0_16 = arith.constant 0 : index
    %c0_17 = arith.constant 0 : index
    %30 = vector.load %arg7[%c0_16, %c0_17] : memref<45x32xf32, #tpu.memory_space<vmem>>, vector<45x32xf32>
    tpu.vector_store %arg7[%c0_16, %c0_17], %29 {strides = array<i32>} : memref<45x32xf32, #tpu.memory_space<vmem>>, vector<45x32xf32>,
    return
  }
  func.func @transform_0(%arg0: i32) -> (i32, i32) {
    %c0_i32 = arith.constant 0 : i32
    %c0_i32_0 = arith.constant 0 : i32
    return %arg0, %c0_i32 : i32, i32
  }
  func.func @transform_1(%arg0: i32) -> (i32, i32) {
    %c0_i32 = arith.constant 0 : i32
    %c0_i32_0 = arith.constant 0 : i32
    return %arg0, %c0_i32 : i32, i32
  }
  func.func @transform_2(%arg0: i32) -> (i32, i32) {
    %c0_i32 = arith.constant 0 : i32
    %c0_i32_0 = arith.constant 0 : i32
    %c0_i32_1 = arith.constant 0 : i32
    return %c0_i32, %c0_i32_0 : i32, i32
  }
  func.func @transform_3(%arg0: i32) -> (i32, i32) {
    %c0_i32 = arith.constant 0 : i32
    %c0_i32_0 = arith.constant 0 : i32
    %c0_i32_1 = arith.constant 0 : i32
    return %c0_i32, %c0_i32_0 : i32, i32
  }
  func.func @transform_4(%arg0: i32) -> (i32, i32) {
    %c0_i32 = arith.constant 0 : i32
    %c0_i32_0 = arith.constant 0 : i32
    %c0_i32_1 = arith.constant 0 : i32
    return %c0_i32, %c0_i32_0 : i32, i32
  }
  func.func @transform_5(%arg0: i32) -> (i32, i32) {
    %c0_i32 = arith.constant 0 : i32
    %c0_i32_0 = arith.constant 0 : i32
    %c0_i32_1 = arith.constant 0 : i32
    return %c0_i32, %c0_i32_0 : i32, i32
  }
  func.func @transform_6(%arg0: i32) -> (i32, i32) {
    %c0_i32 = arith.constant 0 : i32
    %c0_i32_0 = arith.constant 0 : i32
    return %arg0, %c0_i32 : i32, i32
  }
}

module attributes {stable_mosaic.version = 11 : i64} {
  func.func @_ffn_ln_kernel(%arg0: i32, %arg1: memref<45x32xf32, #tpu.memory_space<vmem>>, %arg2: memref<32x128xf32, #tpu.memory_space<vmem>>, %arg3: memref<1x128xf32, #tpu.memory_space<vmem>>, %arg4: memref<128x32xf32, #tpu.memory_space<vmem>>, %arg5: memref<1x32xf32, #tpu.memory_space<vmem>>, %arg6: memref<1x32xf32, #tpu.memory_space<vmem>>, %arg7: memref<1x32xf32, #tpu.memory_space<vmem>>, %arg8: memref<45x32xf32, #tpu.memory_space<vmem>>) attributes {dimension_semantics = [#tpu.dimension_semantics<parallel>], iteration_bounds = array<i64: 1>, scalar_prefetch = 0 : i64, scratch_operands = 0 : i64, tpu.core_type = #tpu.core_type<tc>, window_params = [{transform_indices = @transform_0, window_bounds = array<i64: 45, 32>}, {pipeline_mode = #tpu.pipeline_mode<synchronous>, transform_indices = @transform_1, window_bounds = array<i64: 32, 128>}, {pipeline_mode = #tpu.pipeline_mode<synchronous>, transform_indices = @transform_2, window_bounds = array<i64: 1, 128>}, {pipeline_mode = #tpu.pipeline_mode<synchronous>, transform_indices = @transform_3, window_bounds = array<i64: 128, 32>}, {pipeline_mode = #tpu.pipeline_mode<synchronous>, transform_indices = @transform_4, window_bounds = array<i64: 1, 32>}, {pipeline_mode = #tpu.pipeline_mode<synchronous>, transform_indices = @transform_5, window_bounds = array<i64: 1, 32>}, {pipeline_mode = #tpu.pipeline_mode<synchronous>, transform_indices = @transform_6, window_bounds = array<i64: 1, 32>}, {transform_indices = @transform_7, window_bounds = array<i64: 45, 32>}]} {
    %c0 = arith.constant 0 : index
    %c0_0 = arith.constant 0 : index
    %0 = vector.load %arg1[%c0, %c0_0] : memref<45x32xf32, #tpu.memory_space<vmem>>, vector<45x32xf32>
    %c0_1 = arith.constant 0 : index
    %c0_2 = arith.constant 0 : index
    %1 = vector.load %arg2[%c0_1, %c0_2] : memref<32x128xf32, #tpu.memory_space<vmem>>, vector<32x128xf32>
    %cst = arith.constant dense<0.000000e+00> : vector<45x128xf32>
    %2 = tpu.matmul %0, %1, %cst {dimension_numbers = #tpu.dot_dimension_numbers<[1], [0], [0], [1], [0, 0, 1, 1], [], []>} : vector<45x32xf32>, vector<32x128xf32>, vector<45x128xf32> -> vector<45x128xf32>
    %c0_3 = arith.constant 0 : index
    %c0_4 = arith.constant 0 : index
    %3 = vector.load %arg3[%c0_3, %c0_4] : memref<1x128xf32, #tpu.memory_space<vmem>>, vector<1x128xf32>
    %4 = vector.broadcast %3 : vector<1x128xf32> to vector<45x128xf32>
    %5 = arith.addf %2, %4 : vector<45x128xf32>
    %6 = arith.mulf %5, %5 : vector<45x128xf32>
    %7 = arith.mulf %5, %6 : vector<45x128xf32>
    %cst_5 = arith.constant 4.471500e-02 : f32
    %8 = vector.broadcast %cst_5 : f32 to vector<45x128xf32>
    %9 = arith.mulf %8, %7 : vector<45x128xf32>
    %10 = arith.addf %5, %9 : vector<45x128xf32>
    %cst_6 = arith.constant 0.797884583 : f32
    %11 = vector.broadcast %cst_6 : f32 to vector<45x128xf32>
    %12 = arith.mulf %11, %10 : vector<45x128xf32>
    %13 = math.tanh %12 : vector<45x128xf32>
    %cst_7 = arith.constant 1.000000e+00 : f32
    %14 = vector.broadcast %cst_7 : f32 to vector<45x128xf32>
    %15 = arith.addf %14, %13 : vector<45x128xf32>
    %cst_8 = arith.constant 5.000000e-01 : f32
    %16 = vector.broadcast %cst_8 : f32 to vector<45x128xf32>
    %17 = arith.mulf %16, %15 : vector<45x128xf32>
    %18 = arith.mulf %5, %17 : vector<45x128xf32>
    %c0_9 = arith.constant 0 : index
    %c0_10 = arith.constant 0 : index
    %19 = vector.load %arg4[%c0_9, %c0_10] : memref<128x32xf32, #tpu.memory_space<vmem>>, vector<128x32xf32>
    %cst_11 = arith.constant dense<0.000000e+00> : vector<45x32xf32>
    %20 = tpu.matmul %18, %19, %cst_11 {dimension_numbers = #tpu.dot_dimension_numbers<[1], [0], [0], [1], [0, 0, 1, 1], [], []>} : vector<45x128xf32>, vector<128x32xf32>, vector<45x32xf32> -> vector<45x32xf32>
    %c0_12 = arith.constant 0 : index
    %c0_13 = arith.constant 0 : index
    %21 = vector.load %arg5[%c0_12, %c0_13] : memref<1x32xf32, #tpu.memory_space<vmem>>, vector<1x32xf32>
    %22 = vector.broadcast %21 : vector<1x32xf32> to vector<45x32xf32>
    %23 = arith.addf %20, %22 : vector<45x32xf32>
    %24 = arith.addf %23, %0 : vector<45x32xf32>
    %cst_14 = arith.constant dense<0.000000e+00> : vector<45xf32>
    %25 = vector.multi_reduction <add>, %24, %cst_14 [1] : vector<45x32xf32> to vector<45xf32>
    %26 = vector.shape_cast %25 : vector<45xf32> to vector<45x1xf32>
    %cst_15 = arith.constant 3.200000e+01 : f32
    %27 = vector.broadcast %cst_15 : f32 to vector<45x1xf32>
    %28 = arith.divf %26, %27 : vector<45x1xf32>
    %29 = vector.broadcast %28 : vector<45x1xf32> to vector<45x32xf32>
    %30 = arith.subf %24, %29 : vector<45x32xf32>
    %31 = arith.mulf %30, %30 : vector<45x32xf32>
    %cst_16 = arith.constant dense<0.000000e+00> : vector<45xf32>
    %32 = vector.multi_reduction <add>, %31, %cst_16 [1] : vector<45x32xf32> to vector<45xf32>
    %33 = vector.shape_cast %32 : vector<45xf32> to vector<45x1xf32>
    %cst_17 = arith.constant 3.200000e+01 : f32
    %34 = vector.broadcast %cst_17 : f32 to vector<45x1xf32>
    %35 = arith.divf %33, %34 : vector<45x1xf32>
    %cst_18 = arith.constant 9.99999996E-13 : f32
    %36 = vector.broadcast %cst_18 : f32 to vector<45x1xf32>
    %37 = arith.addf %35, %36 : vector<45x1xf32>
    %38 = math.rsqrt %37 : vector<45x1xf32>
    %39 = vector.broadcast %38 : vector<45x1xf32> to vector<45x32xf32>
    %40 = arith.mulf %30, %39 : vector<45x32xf32>
    %c0_19 = arith.constant 0 : index
    %c0_20 = arith.constant 0 : index
    %41 = vector.load %arg6[%c0_19, %c0_20] : memref<1x32xf32, #tpu.memory_space<vmem>>, vector<1x32xf32>
    %42 = vector.broadcast %41 : vector<1x32xf32> to vector<45x32xf32>
    %43 = arith.mulf %40, %42 : vector<45x32xf32>
    %c0_21 = arith.constant 0 : index
    %c0_22 = arith.constant 0 : index
    %44 = vector.load %arg7[%c0_21, %c0_22] : memref<1x32xf32, #tpu.memory_space<vmem>>, vector<1x32xf32>
    %45 = vector.broadcast %44 : vector<1x32xf32> to vector<45x32xf32>
    %46 = arith.addf %43, %45 : vector<45x32xf32>
    %c0_23 = arith.constant 0 : index
    %c0_24 = arith.constant 0 : index
    %47 = vector.load %arg8[%c0_23, %c0_24] : memref<45x32xf32, #tpu.memory_space<vmem>>, vector<45x32xf32>
    tpu.vector_store %arg8[%c0_23, %c0_24], %46 {strides = array<i32>} : memref<45x32xf32, #tpu.memory_space<vmem>>, vector<45x32xf32>,
    return
  }
  func.func @transform_0(%arg0: i32) -> (i32, i32) {
    %c0_i32 = arith.constant 0 : i32
    %c0_i32_0 = arith.constant 0 : i32
    return %arg0, %c0_i32 : i32, i32
  }
  func.func @transform_1(%arg0: i32) -> (i32, i32) {
    %c0_i32 = arith.constant 0 : i32
    %c0_i32_0 = arith.constant 0 : i32
    %c0_i32_1 = arith.constant 0 : i32
    return %c0_i32, %c0_i32_0 : i32, i32
  }
  func.func @transform_2(%arg0: i32) -> (i32, i32) {
    %c0_i32 = arith.constant 0 : i32
    %c0_i32_0 = arith.constant 0 : i32
    %c0_i32_1 = arith.constant 0 : i32
    return %c0_i32, %c0_i32_0 : i32, i32
  }
  func.func @transform_3(%arg0: i32) -> (i32, i32) {
    %c0_i32 = arith.constant 0 : i32
    %c0_i32_0 = arith.constant 0 : i32
    %c0_i32_1 = arith.constant 0 : i32
    return %c0_i32, %c0_i32_0 : i32, i32
  }
  func.func @transform_4(%arg0: i32) -> (i32, i32) {
    %c0_i32 = arith.constant 0 : i32
    %c0_i32_0 = arith.constant 0 : i32
    %c0_i32_1 = arith.constant 0 : i32
    return %c0_i32, %c0_i32_0 : i32, i32
  }
  func.func @transform_5(%arg0: i32) -> (i32, i32) {
    %c0_i32 = arith.constant 0 : i32
    %c0_i32_0 = arith.constant 0 : i32
    %c0_i32_1 = arith.constant 0 : i32
    return %c0_i32, %c0_i32_0 : i32, i32
  }
  func.func @transform_6(%arg0: i32) -> (i32, i32) {
    %c0_i32 = arith.constant 0 : i32
    %c0_i32_0 = arith.constant 0 : i32
    %c0_i32_1 = arith.constant 0 : i32
    return %c0_i32, %c0_i32_0 : i32, i32
  }
  func.func @transform_7(%arg0: i32) -> (i32, i32) {
    %c0_i32 = arith.constant 0 : i32
    %c0_i32_0 = arith.constant 0 : i32
    return %arg0, %c0_i32 : i32, i32
  }
}

module attributes {stable_mosaic.version = 11 : i64} {
  func.func @_linear_kernel(%arg0: i32, %arg1: memref<3x32xf32, #tpu.memory_space<vmem>>, %arg2: memref<32x4xf32, #tpu.memory_space<vmem>>, %arg3: memref<1x4xf32, #tpu.memory_space<vmem>>, %arg4: memref<3x4xf32, #tpu.memory_space<vmem>>) attributes {dimension_semantics = [#tpu.dimension_semantics<parallel>], iteration_bounds = array<i64: 1>, scalar_prefetch = 0 : i64, scratch_operands = 0 : i64, tpu.core_type = #tpu.core_type<tc>, window_params = [{transform_indices = @transform_0, window_bounds = array<i64: 3, 32>}, {pipeline_mode = #tpu.pipeline_mode<synchronous>, transform_indices = @transform_1, window_bounds = array<i64: 32, 4>}, {pipeline_mode = #tpu.pipeline_mode<synchronous>, transform_indices = @transform_2, window_bounds = array<i64: 1, 4>}, {transform_indices = @transform_3, window_bounds = array<i64: 3, 4>}]} {
    %c0 = arith.constant 0 : index
    %c0_0 = arith.constant 0 : index
    %0 = vector.load %arg1[%c0, %c0_0] : memref<3x32xf32, #tpu.memory_space<vmem>>, vector<3x32xf32>
    %c0_1 = arith.constant 0 : index
    %c0_2 = arith.constant 0 : index
    %1 = vector.load %arg2[%c0_1, %c0_2] : memref<32x4xf32, #tpu.memory_space<vmem>>, vector<32x4xf32>
    %cst = arith.constant dense<0.000000e+00> : vector<3x4xf32>
    %2 = tpu.matmul %0, %1, %cst {dimension_numbers = #tpu.dot_dimension_numbers<[1], [0], [0], [1], [0, 0, 1, 1], [], []>} : vector<3x32xf32>, vector<32x4xf32>, vector<3x4xf32> -> vector<3x4xf32>
    %c0_3 = arith.constant 0 : index
    %c0_4 = arith.constant 0 : index
    %3 = vector.load %arg3[%c0_3, %c0_4] : memref<1x4xf32, #tpu.memory_space<vmem>>, vector<1x4xf32>
    %4 = vector.broadcast %3 : vector<1x4xf32> to vector<3x4xf32>
    %5 = arith.addf %2, %4 : vector<3x4xf32>
    %c0_5 = arith.constant 0 : index
    %c0_6 = arith.constant 0 : index
    %6 = vector.load %arg4[%c0_5, %c0_6] : memref<3x4xf32, #tpu.memory_space<vmem>>, vector<3x4xf32>
    tpu.vector_store %arg4[%c0_5, %c0_6], %5 {strides = array<i32>} : memref<3x4xf32, #tpu.memory_space<vmem>>, vector<3x4xf32>,
    return
  }
  func.func @transform_0(%arg0: i32) -> (i32, i32) {
    %c0_i32 = arith.constant 0 : i32
    %c0_i32_0 = arith.constant 0 : i32
    return %arg0, %c0_i32 : i32, i32
  }
  func.func @transform_1(%arg0: i32) -> (i32, i32) {
    %c0_i32 = arith.constant 0 : i32
    %c0_i32_0 = arith.constant 0 : i32
    %c0_i32_1 = arith.constant 0 : i32
    return %c0_i32, %c0_i32_0 : i32, i32
  }
  func.func @transform_2(%arg0: i32) -> (i32, i32) {
    %c0_i32 = arith.constant 0 : i32
    %c0_i32_0 = arith.constant 0 : i32
    %c0_i32_1 = arith.constant 0 : i32
    return %c0_i32, %c0_i32_0 : i32, i32
  }
  func.func @transform_3(%arg0: i32) -> (i32, i32) {
    %c0_i32 = arith.constant 0 : i32
    %c0_i32_0 = arith.constant 0 : i32
    return %arg0, %c0_i32 : i32, i32
  }
}

</mosaic_0001>

<bundles_post_ra>
// kernel: _device_forward.30
= control target key start
LH: loop header
LB: loop body
LE: loop exit
PB: predicated region body
PF: predicated region fallthrough
CT: control target
= control target key end

     0   :  { %v165_v0 = vmov 0.0   ;;  %vm28_vm0 = vcmask 261120   ;;  %vm166_vm1 = vmmov 0   ;;  %vm118_vm2 = vcmask 785408   ;;  %s220_s1 = inlined_call_operand.vmem [shape: f32[32,96], index: 1, kind: input, shape index: {}]   ;;  %s221_s0 = inlined_call_operand.vmem [shape: f32[21,32], index: 0, kind: input, shape index: {}]   ;;  %s222_s2 = inlined_call_operand.vmem [shape: f32[1,96], index: 2, kind: input, shape index: {}]   ;;  %s223_s3 = inlined_call_operand.vmem [shape: f32[21,96], index: 3, kind: output, shape index: {}]  }
   0x1   :  { %155 = vmatprep.subr.mxu1 %v165_v0  ;;  %v20_v1 = vld [vmem:[%s220_s1 + $0x18] sm:$0xff]  ;;  %138 = vmatprep.subr.mxu0 %v165_v0  ;;  %v19_v2 = vld [vmem:[%s220_s1 + $0x10] sm:$0xff]  ;;  %v18_v3 = vld [vmem:[%s220_s1 + $0x8] sm:$0xff]  ;;  %vm121_vm3 = vcmask 782336  }
   0x2   :  { %159 = vmatpush3.msra.mxu1 %v20_v1  ;;  %139 = vmatpush3.msra.mxu0 %v20_v1  ;;  %v17_v4 = vld [vmem:[%s220_s1] sm:$0xff]  ;;  %v15_v5 = vld [vmem:[%s221_s0 + $0x8] sm:$0xff]  ;;  %v16_v7 = vld [vmem:[%s221_s0 + $0x10] sm:$0x1f] }
   0x3   :  { %156 = vmatprep.subr.mxu1 %v165_v0  ;;  %140 = vmatprep.subr.mxu0 %v165_v0  ;;  %v14_v6 = vld [vmem:[%s221_s0] sm:$0xff] }
   0x4   :  { %160 = vmatpush3.msra.mxu1 %v19_v2  ;;  %141 = vmatpush3.msra.mxu0 %v19_v2  ;;  %v127_v8 = vld [vmem:[%s222_s2] ss:$0 sm:$0xff] }
   0x5   :  { %157 = vmatprep.subr.mxu1 %v165_v0  ;;  %142 = vmatprep.subr.mxu0 %v165_v0 }
   0x6   :  { %161 = vmatpush3.msra.mxu1 %v18_v3  ;;  %143 = vmatpush3.msra.mxu0 %v18_v3 }
   0x7   :  { %158 = vmatprep.subr.mxu1 %v165_v0  ;;  %149 = vmatprep.mubr.msk.f32.mxu1 %vm166_vm1, %v165_v0 }
   0x8   :  { %162 = vmatpush3.msra.mxu1 %v17_v4  ;;  %144 = vmatprep.subr.mxu0 %v165_v0 }
   0x9   :  { %150 = vmatmul.mubr.msk.f32.vlgmr.msra.gmra.mxu1 %vm28_vm0, %v15_v5  ;;  %145 = vmatpush3.msra.mxu0 %v17_v4 }
   0xa   :  { %146 = vmatprep.mubr.msk.f32.mxu0 %vm166_vm1, %v165_v0  ;;  %152 = vmatprep.mubr.msk.f32.mxu1 %vm166_vm1, %v165_v0 }
   0xb   :  { %147 = vmatmul.mubr.msk.f32.vlgmr.msra.gmra.mxu0 %vm28_vm0, %v14_v6 }
   0xd   :  { %153 = vmatmul.mubr.msk.f32.gmra.mxu1 %vm28_vm0, %v16_v7 }
  0xc9   :  { %v109_v9 = vpop.f32.mrf.mxu1 }
  0xca   :  { %v110_v10 = vadd.f32 %v127_v8, %v109_v9 }
  0xcb   :  { %v104_v11 = vpop.f32.mrf.mxu0  ;;  %v151_v12 = vpop.f32.mrf.mxu1 }
  0xcc   :  { %120 = vst.msk [vmem:[%s223_s3 + $0x8] sm:$0xff] %vm118_vm2, %v110_v10  ;;  %v105_v13 = vadd.f32 %v127_v8, %v104_v11 }
  0xcd   :  { %v148_v14 = vpop.f32.mrf.mxu0  ;;  %v114_v15 = vpop.f32.mrf.mxu1 }
  0xce   :  { %119 = vst.msk [vmem:[%s223_s3] sm:$0xff] %vm118_vm2, %v105_v13  ;;  %v115_v16 = vadd.f32 %v127_v8, %v114_v15 }
  0xcf   :  { %v154_v17 = vpop.f32.mrf.mxu1 }
  0xd0   :  { %122 = vst.msk [vmem:[%s223_s3 + $0x10] sm:$0x1f] %vm121_vm3, %v115_v16 }

// kernel: _device_forward.29
= control target key start
LH: loop header
LB: loop body
LE: loop exit
PB: predicated region body
PF: predicated region fallthrough
CT: control target
= control target key end

     0   :  { %vm24_vm0 = vcmask 130048   ;;  %vm34_vm1 = vcmask 124928   ;;  %vm207_vm2 = vcmask 261120   ;;  %vm211_vm3 = vcmask 256000   ;;  %s333_s0 = inlined_call_operand.vmem [shape: f32[27,16], index: 0, kind: input, shape index: {}]   ;;  %s334_s3 = inlined_call_operand.vmem [shape: f32[16,32], index: 3, kind: input, shape index: {}]   ;;  %s335_s1 = inlined_call_operand.vmem [shape: f32[1,16], index: 1, kind: input, shape index: {}]   ;;  %s336_s2 = inlined_call_operand.vmem [shape: f32[1,16], index: 2, kind: input, shape index: {}]   ;;  %s337_s4 = inlined_call_operand.vmem [shape: f32[1,32], index: 4, kind: input, shape index: {}]   ;;  %s338_s5 = inlined_call_operand.vmem [shape: f32[27,32], index: 5, kind: output, shape index: {}]  }
   0x1   :  { %v20_v0 = vld [vmem:[%s333_s0] sm:$0xff]  ;;  %v21_v1 = vld [vmem:[%s333_s0 + $0x8] sm:$0xff]  ;;  %v22_v2 = vld [vmem:[%s333_s0 + $0x10] sm:$0xff] }
   0x2   :  { %v25_v3 = vsel %vm24_vm0, %v20_v0, 0.0  ;;  %v28_v4 = vsel %vm24_vm0, %v21_v1, 0.0  ;;  %v23_v5 = vld [vmem:[%s333_s0 + $0x18] sm:$0x7]  ;;  %v31_v6 = vsel %vm24_vm0, %v22_v2, 0.0  ;;  %v102_v28 = vld [vmem:[%s334_s3 + $0x8] sm:$0xff] }
   0x3   :  { %26 = vadd.xlane.f32.xlu0 %v25_v3  ;;  %29 = vadd.xlane.f32.xlu1 %v28_v4  ;;  %v35_v7 = vsel %vm34_vm1, %v23_v5, 0.0  ;;  %v101_v29 = vld [vmem:[%s334_s3] sm:$0xff] }
   0x4   :  { %230 = vmatprep.subr.mxu0 %v102_v28  ;;  %240 = vmatprep.subr.mxu1 %v102_v28  ;;  %v217_v43 = vld [vmem:[%s335_s1] ss:$0 sm:$0xff] }
   0x5   :  { %231 = vmatpush3.msra.mxu0 %v102_v28  ;;  %242 = vmatpush3.msra.mxu1 %v102_v28  ;;  %v218_v45 = vld [vmem:[%s336_s2] ss:$0 sm:$0xff] }
   0x6   :  { %232 = vmatprep.subr.mxu0 %v101_v29  ;;  %241 = vmatprep.subr.mxu1 %v101_v29  ;;  %v219_v60 = vld [vmem:[%s337_s4] ss:$0 sm:$0xff] }
   0x7   :  { %32 = vadd.xlane.f32.xlu0 %v31_v6  ;;  %36 = vadd.xlane.f32.xlu1 %v35_v7 }
   0x8   :  { %233 = vmatpush3.msra.mxu0 %v101_v29  ;;  %243 = vmatpush3.msra.mxu1 %v101_v29 }
  0x8c   :  { %v27_v8 = vpop.xlane.xlu0 %26  ;;  %v30_v9 = vpop.xlane.xlu1 %29 }
  0x8d   :  { %v39_v10 = vmul.f32 0.0625, %v27_v8  ;;  %v40_v11 = vmul.f32 0.0625, %v30_v9 }
  0x8f   :  { %v43_v12 = vsub.f32 %v20_v0, %v39_v10  ;;  %v44_v13 = vsub.f32 %v21_v1, %v40_v11 }
  0x90   :  { %v33_v14 = vpop.xlane.xlu0 %32  ;;  %v37_v15 = vpop.xlane.xlu1 %36 }
  0x91   :  { %v41_v16 = vmul.f32 0.0625, %v33_v14  ;;  %v42_v17 = vmul.f32 0.0625, %v37_v15  ;;  %v47_v18 = vmul.f32 %v43_v12, %v43_v12  ;;  %v48_v19 = vmul.f32 %v44_v13, %v44_v13 }
  0x93   :  { %v45_v20 = vsub.f32 %v22_v2, %v41_v16  ;;  %v46_v21 = vsub.f32 %v23_v5, %v42_v17  ;;  %v51_v22 = vsel %vm24_vm0, %v47_v18, 0.0  ;;  %v54_v23 = vsel %vm24_vm0, %v48_v19, 0.0 }
  0x94   :  { %52 = vadd.xlane.f32.xlu0 %v51_v22 }
  0x95   :  { %v49_v24 = vmul.f32 %v45_v20, %v45_v20  ;;  %v50_v25 = vmul.f32 %v46_v21, %v46_v21 }
  0x97   :  { %v57_v26 = vsel %vm24_vm0, %v49_v24, 0.0  ;;  %v60_v27 = vsel %vm34_vm1, %v50_v25, 0.0 }
  0x98   :  { %55 = vadd.xlane.f32.xlu0 %v54_v23  ;;  %58 = vadd.xlane.f32.xlu1 %v57_v26 }
  0x9c   :  { %61 = vadd.xlane.f32.xlu1 %v60_v27 }
 0x11d   :  { %v53_v30 = vpop.xlane.xlu0 %52 }
 0x11e   :  { %v63_v31 = vmul.f32 0.0625, %v53_v30 }
 0x120   :  { %v67_v32 = vadd.f32 1e-12, %v63_v31 }
 0x121   :  { %v59_v33 = vpop.xlane.xlu1 %58  ;;  %v56_v34 = vpop.xlane.xlu0 %55 }
 0x122   :  { %244 = vrsqrt.f32 %v67_v32  ;;  %v65_v35 = vmul.f32 0.0625, %v59_v33  ;;  %v64_v36 = vmul.f32 0.0625, %v56_v34 }
 0x124   :  { %v69_v37 = vadd.f32 1e-12, %v65_v35  ;;  %v68_v38 = vadd.f32 1e-12, %v64_v36 }
 0x125   :  { %v62_v39 = vpop.xlane.xlu1 %61 }
 0x126   :  { %246 = vrsqrt.f32 %v69_v37  ;;  %v66_v40 = vmul.f32 0.0625, %v62_v39 }
 0x127   :  { %248 = vrsqrt.f32 %v68_v38 }
 0x128   :  { %v70_v41 = vadd.f32 1e-12, %v66_v40 }
 0x12a   :  { %250 = vrsqrt.f32 %v70_v41 }
 0x12f   :  { %v245_v42 = vpop.eup %244 }
 0x130   :  { %v75_v44 = vmul.f32 %v245_v42, %v43_v12 }
 0x132   :  { %v86_v46 = vmul.f32 %v217_v43, %v75_v44 }
 0x133   :  { %v247_v47 = vpop.eup %246 }
 0x134   :  { %v249_v48 = vpop.eup %248  ;;  %v97_v49 = vadd.f32 %v218_v45, %v86_v46  ;;  %v77_v50 = vmul.f32 %v247_v47, %v45_v20 }
 0x135   :  { %v76_v51 = vmul.f32 %v249_v48, %v44_v13 }
 0x136   :  { %234 = vmatprep.mubr.msk.f32.mxu0 %vm24_vm0, %v97_v49  ;;  %v88_v52 = vmul.f32 %v217_v43, %v77_v50 }
 0x137   :  { %v251_v53 = vpop.eup %250  ;;  %v87_v54 = vmul.f32 %v217_v43, %v76_v51 }
 0x138   :  { %v99_v55 = vadd.f32 %v218_v45, %v88_v52  ;;  %v78_v56 = vmul.f32 %v251_v53, %v46_v21 }
 0x139   :  { %v98_v57 = vadd.f32 %v218_v45, %v87_v54 }
 0x13a   :  { %237 = vmatprep.mubr.msk.f32.mxu1 %vm24_vm0, %v99_v55  ;;  %v89_v58 = vmul.f32 %v217_v43, %v78_v56 }
 0x13b   :  { %235 = vmatmul.mubr.msk.f32.vlgmr.msra.gmra.mxu0 %vm24_vm0, %v98_v57 }
 0x13c   :  { %v100_v59 = vadd.f32 %v218_v45, %v89_v58 }
 0x13e   :  { %238 = vmatmul.mubr.msk.f32.vlgmr.msra.gmra.mxu1 %vm24_vm0, %v100_v59 }
 0x1fb   :  { %v236_v61 = vpop.f32.mrf.mxu0 }
 0x1fc   :  { %v194_v62 = vadd.f32 %v236_v61, %v219_v60 }
 0x1fd   :  { %v188_v63 = vpop.f32.mrf.mxu0 }
 0x1fe   :  { %209 = vst.msk [vmem:[%s338_s5 + $0x8] sm:$0xff] %vm207_vm2, %v194_v62  ;;  %v189_v0 = vadd.f32 %v219_v60, %v188_v63  ;;  %v239_v1 = vpop.f32.mrf.mxu1 }
 0x1ff   :  { %v204_v2 = vadd.f32 %v239_v1, %v219_v60 }
 0x200   :  { %208 = vst.msk [vmem:[%s338_s5] sm:$0xff] %vm207_vm2, %v189_v0  ;;  %v198_v3 = vpop.f32.mrf.mxu1 }
 0x201   :  { %212 = vst.msk [vmem:[%s338_s5 + $0x18] sm:$0x7] %vm211_vm3, %v204_v2  ;;  %v199_v4 = vadd.f32 %v219_v60, %v198_v3 }
 0x203   :  { %210 = vst.msk [vmem:[%s338_s5 + $0x10] sm:$0xff] %vm207_vm2, %v199_v4 }

// kernel: _device_forward.32
= control target key start
LH: loop header
LB: loop body
LE: loop exit
PB: predicated region body
PF: predicated region fallthrough
CT: control target
= control target key end

     0   :  { %v247_v0 = vmov 0.0   ;;  %vm37_vm0 = vcmask 261120   ;;  %vm248_vm1 = vmmov 0   ;;  %vm139_vm2 = vcmask 258048   ;;  %s344_s2 = inlined_call_operand.vmem [shape: f32[32,32], index: 2, kind: input, shape index: {}]   ;;  %s345_s0 = inlined_call_operand.vmem [shape: f32[21,32], index: 0, kind: input, shape index: {}]   ;;  %s346_s3 = inlined_call_operand.vmem [shape: f32[1,32], index: 3, kind: input, shape index: {}]   ;;  %s347_s1 = inlined_call_operand.vmem [shape: f32[21,32], index: 1, kind: input, shape index: {}]   ;;  %s348_s4 = inlined_call_operand.vmem [shape: f32[1,32], index: 4, kind: input, shape index: {}]   ;;  %s349_s5 = inlined_call_operand.vmem [shape: f32[1,32], index: 5, kind: input, shape index: {}]   ;;  %s350_s6 = inlined_call_operand.vmem [shape: f32[21,32], index: 6, kind: output, shape index: {}]  }
   0x1   :  { %214 = vmatprep.subr.mxu0 %v247_v0  ;;  %231 = vmatprep.subr.mxu1 %v247_v0  ;;  %v29_v1 = vld [vmem:[%s344_s2 + $0x18] sm:$0xff]  ;;  %v28_v2 = vld [vmem:[%s344_s2 + $0x10] sm:$0xff]  ;;  %v27_v3 = vld [vmem:[%s344_s2 + $0x8] sm:$0xff] }
   0x2   :  { %215 = vmatpush3.msra.mxu0 %v29_v1  ;;  %235 = vmatpush3.msra.mxu1 %v29_v1  ;;  %v26_v4 = vld [vmem:[%s344_s2] sm:$0xff]  ;;  %v24_v6 = vld [vmem:[%s345_s0 + $0x8] sm:$0xff]  ;;  %v25_v7 = vld [vmem:[%s345_s0 + $0x10] sm:$0x1f] }
   0x3   :  { %216 = vmatprep.subr.mxu0 %v247_v0  ;;  %232 = vmatprep.subr.mxu1 %v247_v0  ;;  %v23_v5 = vld [vmem:[%s345_s0] sm:$0xff]  ;;  %v128_v16 = vld [vmem:[%s347_s1 + $0x8] sm:$0xff]  ;;  %v129_v19 = vld [vmem:[%s347_s1 + $0x10] sm:$0x1f] }
   0x4   :  { %217 = vmatpush3.msra.mxu0 %v28_v2  ;;  %236 = vmatpush3.msra.mxu1 %v28_v2  ;;  %v201_v8 = vld [vmem:[%s346_s3] ss:$0 sm:$0xff] }
   0x5   :  { %218 = vmatprep.subr.mxu0 %v247_v0  ;;  %233 = vmatprep.subr.mxu1 %v247_v0  ;;  %v127_v11 = vld [vmem:[%s347_s1] sm:$0xff] }
   0x6   :  { %219 = vmatpush3.msra.mxu0 %v27_v3  ;;  %237 = vmatpush3.msra.mxu1 %v27_v3  ;;  %v205_v52 = vld [vmem:[%s348_s4] ss:$0 sm:$0xff] }
   0x7   :  { %220 = vmatprep.subr.mxu0 %v247_v0  ;;  %234 = vmatprep.subr.mxu1 %v247_v0  ;;  %v206_v54 = vld [vmem:[%s349_s5] ss:$0 sm:$0xff] }
   0x8   :  { %221 = vmatpush3.msra.mxu0 %v26_v4  ;;  %238 = vmatpush3.msra.mxu1 %v26_v4 }
   0x9   :  { %222 = vmatprep.mubr.msk.f32.mxu0 %vm248_vm1, %v247_v0  ;;  %225 = vmatprep.mubr.msk.f32.mxu1 %vm248_vm1, %v247_v0 }
   0xa   :  { %223 = vmatmul.mubr.msk.f32.vlgmr.msra.gmra.mxu0 %vm37_vm0, %v23_v5  ;;  %226 = vmatmul.mubr.msk.f32.vlgmr.msra.gmra.mxu1 %vm37_vm0, %v24_v6 }
   0xb   :  { %228 = vmatprep.mubr.msk.f32.mxu1 %vm248_vm1, %v247_v0 }
   0xe   :  { %229 = vmatmul.mubr.msk.f32.gmra.mxu1 %vm37_vm0, %v25_v7 }
  0xca   :  { %v113_v9 = vpop.f32.mrf.mxu0  ;;  %v118_v10 = vpop.f32.mrf.mxu1 }
  0xcb   :  { %v114_v12 = vadd.f32 %v201_v8, %v113_v9  ;;  %v119_v13 = vadd.f32 %v201_v8, %v118_v10 }
  0xcc   :  { %v224_v14 = vpop.f32.mrf.mxu0  ;;  %v227_v15 = vpop.f32.mrf.mxu1 }
  0xcd   :  { %v130_v17 = vadd.f32 %v127_v11, %v114_v12  ;;  %v131_v22 = vadd.f32 %v128_v16, %v119_v13 }
  0xce   :  { %v123_v18 = vpop.f32.mrf.mxu1 }
  0xcf   :  { %v124_v20 = vadd.f32 %v201_v8, %v123_v18  ;;  %v133_v21 = vsel %vm37_vm0, %v130_v17, 0.0  ;;  %v136_v26 = vsel %vm37_vm0, %v131_v22, 0.0 }
  0xd0   :  { %v230_v23 = vpop.f32.mrf.mxu1  ;;  %134 = vadd.xlane.f32.xlu0 %v133_v21 }
  0xd1   :  { %v132_v24 = vadd.f32 %v129_v19, %v124_v20 }
  0xd3   :  { %v140_v25 = vsel %vm139_vm2, %v132_v24, 0.0 }
  0xd4   :  { %141 = vadd.xlane.f32.xlu1 %v140_v25  ;;  %137 = vadd.xlane.f32.xlu0 %v136_v26 }
 0x159   :  { %v135_v27 = vpop.xlane.xlu0 %134 }
 0x15a   :  { %v144_v28 = vmul.f32 0.03125, %v135_v27 }
 0x15c   :  { %v147_v29 = vsub.f32 %v130_v17, %v144_v28 }
 0x15d   :  { %v142_v30 = vpop.xlane.xlu1 %141  ;;  %v138_v31 = vpop.xlane.xlu0 %137 }
 0x15e   :  { %v146_v32 = vmul.f32 0.03125, %v142_v30  ;;  %v145_v33 = vmul.f32 0.03125, %v138_v31  ;;  %v150_v34 = vmul.f32 %v147_v29, %v147_v29 }
 0x160   :  { %v149_v35 = vsub.f32 %v132_v24, %v146_v32  ;;  %v148_v36 = vsub.f32 %v131_v22, %v145_v33  ;;  %v153_v37 = vsel %vm37_vm0, %v150_v34, 0.0 }
 0x161   :  { %154 = vadd.xlane.f32.xlu1 %v153_v37 }
 0x162   :  { %v152_v38 = vmul.f32 %v149_v35, %v149_v35  ;;  %v151_v39 = vmul.f32 %v148_v36, %v148_v36 }
 0x164   :  { %v159_v40 = vsel %vm139_vm2, %v152_v38, 0.0  ;;  %v156_v41 = vsel %vm37_vm0, %v151_v39, 0.0 }
 0x165   :  { %160 = vadd.xlane.f32.xlu1 %v159_v40  ;;  %157 = vadd.xlane.f32.xlu0 %v156_v41 }
 0x1ea   :  { %v155_v42 = vpop.xlane.xlu1 %154 }
 0x1eb   :  { %v162_v43 = vmul.f32 0.03125, %v155_v42 }
 0x1ed   :  { %v165_v44 = vadd.f32 1e-12, %v162_v43 }
 0x1ee   :  { %v161_v45 = vpop.xlane.xlu1 %160  ;;  %v158_v46 = vpop.xlane.xlu0 %157 }
 0x1ef   :  { %241 = vrsqrt.f32 %v165_v44  ;;  %v164_v47 = vmul.f32 0.03125, %v161_v45  ;;  %v163_v48 = vmul.f32 0.03125, %v158_v46 }
 0x1f1   :  { %v167_v49 = vadd.f32 1e-12, %v164_v47  ;;  %v166_v50 = vadd.f32 1e-12, %v163_v48 }
 0x1f3   :  { %243 = vrsqrt.f32 %v167_v49 }
 0x1f4   :  { %245 = vrsqrt.f32 %v166_v50 }
 0x1fc   :  { %v242_v51 = vpop.eup %241 }
 0x1fd   :  { %v171_v53 = vmul.f32 %v242_v51, %v147_v29 }
 0x1ff   :  { %v181_v55 = vmul.f32 %v205_v52, %v171_v53 }
 0x200   :  { %v244_v56 = vpop.eup %243 }
 0x201   :  { %v246_v57 = vpop.eup %245  ;;  %v191_v58 = vadd.f32 %v206_v54, %v181_v55  ;;  %v173_v59 = vmul.f32 %v244_v56, %v149_v35 }
 0x202   :  { %v172_v60 = vmul.f32 %v246_v57, %v148_v36 }
 0x203   :  { %194 = vst.msk [vmem:[%s350_s6] sm:$0xff] %vm37_vm0, %v191_v58  ;;  %v183_v61 = vmul.f32 %v205_v52, %v173_v59 }
 0x204   :  { %v182_v62 = vmul.f32 %v205_v52, %v172_v60 }
 0x205   :  { %v193_v63 = vadd.f32 %v206_v54, %v183_v61 }
 0x206   :  { %v192_v0 = vadd.f32 %v206_v54, %v182_v62 }
 0x207   :  { %196 = vst.msk [vmem:[%s350_s6 + $0x10] sm:$0x1f] %vm139_vm2, %v193_v63 }
 0x208   :  { %195 = vst.msk [vmem:[%s350_s6 + $0x8] sm:$0xff] %vm37_vm0, %v192_v0 }

// kernel: _device_forward.31
= control target key start
LH: loop header
LB: loop body
LE: loop exit
PB: predicated region body
PF: predicated region fallthrough
CT: control target
= control target key end

     0   :  { %s1186_s15 = smov 0   ;;  %s1291_s0 = inlined_call_operand.vmem [shape: f32[3,7,32], index: 0, kind: input, shape index: {}]   ;;  %s1292_s1 = inlined_call_operand.vmem [shape: f32[3,7,32], index: 1, kind: input, shape index: {}]   ;;  %s1293_s2 = inlined_call_operand.vmem [shape: f32[3,7,32], index: 2, kind: input, shape index: {}]   ;;  %s1294_s3 = inlined_call_operand.vmem [shape: f32[3,1,7], index: 3, kind: input, shape index: {}]   ;;  %s1295_s4 = inlined_call_operand.vmem [shape: f32[3,7,32], index: 4, kind: output, shape index: {}]  }
   0x1 LB: > { %s1029_s16 = sadd.s32 4294967295, %s1151_s15   ;;  %p1033_p0 = scmp.ge.s32.totalorder %s1151_s15, 1  ;;  %s1151_s15 = sphi %s1186_s15, %s14_s15  }
   0x2   : > { %p187_p1 = scmp.lt.s32.totalorder %s1151_s15, 4 }
   0x4   : > { %p188_p2 = pnand %p1033_p0, %p187_p1 }
   0x5   : > { %p222_p3 = scmp.lt.s32.totalorder (!%p188_p2), %s1029_s16, 2  ;;  %s1155_s27 = smov (!%p188_p2), 120  }
   0x6   : > { %191 = sbr.rel (%p188_p2) target bundleno = 1403 (0x57b), region = 36  ;;  %s1156_s28 = smov (!%p188_p2), 112  }
   0x7   : > { %s1157_s29 = smov (!%p188_p2), 104   ;;  %s1158_s7 = smov (!%p188_p2), 8  }
   0x8   : > { %s1159_s8 = smov (!%p188_p2), 16   ;;  %s1160_s9 = smov (!%p188_p2), 24  }
   0xb   : > { %v1153_v0 = vmov 0.0   ;;  %vm1154_vm0 = vmmov 0   ;;  %s1297_s16 = smov (!%p222_p3, %s1029_s16), 2  ;;  %vm245_vm1 = vcmask 64512   ;;  %vm330_vm2 = vcmask 55296  }
   0xc   : > { %1073 = vmatprep.subr.mxu0 %v1153_v0  ;;  %1075 = vmatprep.mubr.msk.f32.mxu0 %vm1154_vm0, %v1153_v0  ;;  %s1200_s17 = sshll.u32 %s1297_s16, 3  ;;  %s236_s26 = scalar_lea.vmem %s1294_s3, %s1297_s16  ;;  %vm346_vm3 = vcmask 1046528   ;;  %vm342_vm4 = vcmask 56320   ;;  %vm937_vm5 = vcmask 130048   ;;  %vm939_vm6 = vcmask 195584  }
   0xd   : > { %1078 = vmatprep.subr.mxu1 %v1153_v0  ;;  %1080 = vmatprep.mubr.msk.f32.mxu1 %vm1154_vm0, %v1153_v0  ;;  %s229_s20 = scalar_lea.vmem %s1292_s1, %s1200_s17  ;;  %s225_s23 = scalar_lea.vmem %s1291_s0, %s1200_s17  ;;  %v1218_v4 = vld [vmem:[%s236_s26] ss:$0 sm:$0xff]  ;;  %vm941_vm7 = vcmask 260096  }
   0xe   : > { %v242_v1 = vld [vmem:[%s229_s20] sm:$0x7f]  ;;  %s233_s6 = scalar_lea.vmem %s1293_s2, %s1200_s17  ;;  %s240_s12 = scalar_lea.vmem %s1295_s4, %s1200_s17 }
   0xf   : > { %1074 = vmatpush3.xpose.msk.msra.mxu0 %vm245_vm1, %v242_v1  ;;  %v241_v2 = vld [vmem:[%s225_s23] sm:$0x7f]  ;;  %422 = vrot.lane.b32.xlu1 %v242_v1, %s1155_s27 }
  0x10   : > { %1088 = vmatprep.subr.mxu0 %v1153_v0  ;;  %v1232_v14 = vld [vmem:[%s233_s6] sm:$0x7f] }
  0x11   : > { %1079 = vmatpush3.msk.msra.mxu1 %vm346_vm3, %v1232_v14 }
  0x12   : > { %1076 = vmatmul.mubr.msk.f32.vlgmr.msra.gmra.mxu0 %vm245_vm1, %v241_v2  ;;  %1083 = vmatprep.subr.mxu1 %v1153_v0 }
  0x13   : > { %1090 = vmatprep.mubr.msk.f32.mxu0 %vm1154_vm0, %v1153_v0  ;;  %420 = vrot.lane.b32.xlu1 %v241_v2, %s1155_s27 }
  0x17   : > { %588 = vrot.lane.b32.xlu1 %v241_v2, %s1156_s28 }
  0x1b   : > { %758 = vrot.lane.b32.xlu1 %v242_v1, %s1157_s29 }
  0x1f   : > { %756 = vrot.lane.b32.xlu1 %v241_v2, %s1157_s29 }
  0x81   : > { %v423_v16 = vpop.permute.xlu1 %422 }
  0x85   : > { %v421_v17 = vpop.permute.xlu1 %420 }
  0x89   : > { %v589_v19 = vpop.permute.xlu1 %588 }
  0x8d   : > { %v759_v22 = vpop.permute.xlu1 %758 }
  0x91   : > { %v757_v23 = vpop.permute.xlu1 %756 }
  0xd2   : > { %v318_v3 = vpop.f32.mrf.mxu0 }
  0xd3   : > { %v322_v5 = vmul.f32 0.35355338, %v318_v3 }
  0xd4   : > { %v1077_v6 = vpop.f32.mrf.mxu0 }
  0xd5   : > { %v329_v7 = vadd.f32 %v1218_v4, %v322_v5 }
  0xd7   : > { %v331_v8 = vsel %vm330_vm2, %v329_v7, -inf }
  0xd8   : > { %332 = vmax.xlane.f32.xlu0 %v331_v8 }
 0x161   : > { %v333_v9 = vpop.xlane.xlu0 %332 }
 0x162   : > { %v334_v10 = vsub.f32 %v329_v7, %v333_v9 }
 0x164   : > { %v335_v11 = vmul.f32 1.442695, %v334_v10 }
 0x166   : > { %1129 = vpow2.f32 %v335_v11 }
 0x173   : > { %v1130_v12 = vpop.eup %1129 }
 0x174   : > { %v337_v13 = vsel %vm330_vm2, %v1130_v12, 0.0 }
 0x175   : > { %338 = vadd.xlane.f32.xlu0 %v337_v13 }
 0x18b   : > { %590 = vrot.lane.b32.xlu0 %v242_v1, %s1156_s28 }
 0x1fe   : > { %v339_v15 = vpop.xlane.xlu0 %338 }
 0x1ff   : > { %1131 = vrcp.f32 %v339_v15 }
 0x202   : > { %v591_v21 = vpop.permute.xlu0 %590 }
 0x20c   : > { %v1132_v18 = vpop.eup %1131 }
 0x20d   : > { %v341_v20 = vmul.f32 %v1132_v18, %v1130_v12 }
 0x20f   : > { %1081 = vmatmul.mubr.msk.f32.vlgmr.msra.gmra.mxu1 %vm342_vm4, %v341_v20 }
 0x210   : > { %1084 = vmatpush3.xpose.msk.msra.mxu1 %vm245_vm1, %v423_v16  ;;  %1085 = vmatprep.mubr.msk.f32.mxu1 %vm1154_vm0, %v1153_v0 }
 0x211   : > { %1093 = vmatprep.subr.mxu1 %v1153_v0 }
 0x213   : > { %1086 = vmatmul.mubr.msk.f32.vlgmr.msra.gmra.mxu1 %vm245_vm1, %v421_v17 }
 0x214   : > { %1094 = vmatpush3.xpose.msk.msra.mxu1 %vm245_vm1, %v591_v21  ;;  %1095 = vmatprep.mubr.msk.f32.mxu1 %vm1154_vm0, %v1153_v0 }
 0x215   : > { %1103 = vmatprep.subr.mxu1 %v1153_v0 }
 0x217   : > { %1096 = vmatmul.mubr.msk.f32.vlgmr.msra.gmra.mxu1 %vm245_vm1, %v589_v19 }
 0x218   : > { %1104 = vmatpush3.xpose.msk.msra.mxu1 %vm245_vm1, %v759_v22  ;;  %1105 = vmatprep.mubr.msk.f32.mxu1 %vm1154_vm0, %v1153_v0 }
 0x21b   : > { %1106 = vmatmul.mubr.msk.f32.vlgmr.msra.gmra.mxu1 %vm245_vm1, %v757_v23 }
 0x2cf   : > { %v1253_v24 = vpop.f32.mrf.mxu1 }
 0x2d1   : > { %v1082_v25 = vpop.f32.mrf.mxu1 }
 0x2d3   : > { %v494_v26 = vpop.f32.mrf.mxu1 }
 0x2d4   : > { %v498_v27 = vmul.f32 0.35355338, %v494_v26 }
 0x2d5   : > { %v1087_v28 = vpop.f32.mrf.mxu1 }
 0x2d6   : > { %v499_v29 = vadd.f32 %v1218_v4, %v498_v27 }
 0x2d7   : > { %v662_v30 = vpop.f32.mrf.mxu1 }
 0x2d8   : > { %v666_v31 = vmul.f32 0.35355338, %v662_v30  ;;  %v500_v32 = vsel %vm330_vm2, %v499_v29, -inf }
 0x2d9   : > { %501 = vmax.xlane.f32.xlu1 %v500_v32  ;;  %v1097_v33 = vpop.f32.mrf.mxu1 }
 0x2da   : > { %v667_v34 = vadd.f32 %v1218_v4, %v666_v31 }
 0x2db   : > { %v830_v35 = vpop.f32.mrf.mxu1 }
 0x2dc   : > { %v834_v36 = vmul.f32 0.35355338, %v830_v35  ;;  %v668_v37 = vsel %vm330_vm2, %v667_v34, -inf }
 0x2dd   : > { %669 = vmax.xlane.f32.xlu0 %v668_v37  ;;  %v1107_v38 = vpop.f32.mrf.mxu1 }
 0x2de   : > { %v835_v39 = vadd.f32 %v1218_v4, %v834_v36 }
 0x2e0   : > { %v836_v40 = vsel %vm330_vm2, %v835_v39, -inf }
 0x2e1   : > { %837 = vmax.xlane.f32.xlu1 %v836_v40 }
 0x362   : > { %v502_v41 = vpop.xlane.xlu1 %501 }
 0x363   : > { %v503_v42 = vsub.f32 %v499_v29, %v502_v41 }
 0x365   : > { %v504_v43 = vmul.f32 1.442695, %v503_v42 }
 0x366   : > { %v670_v44 = vpop.xlane.xlu0 %669 }
 0x367   : > { %1133 = vpow2.f32 %v504_v43  ;;  %v671_v45 = vsub.f32 %v667_v34, %v670_v44 }
 0x369   : > { %v672_v46 = vmul.f32 1.442695, %v671_v45 }
 0x36a   : > { %v838_v51 = vpop.xlane.xlu1 %837 }
 0x36b   : > { %1135 = vpow2.f32 %v672_v46  ;;  %v839_v52 = vsub.f32 %v835_v39, %v838_v51 }
 0x36d   : > { %v840_v53 = vmul.f32 1.442695, %v839_v52 }
 0x36f   : > { %1137 = vpow2.f32 %v840_v53 }
 0x374   : > { %v1134_v47 = vpop.eup %1133 }
 0x375   : > { %v506_v48 = vsel %vm330_vm2, %v1134_v47, 0.0 }
 0x376   : > { %507 = vadd.xlane.f32.xlu1 %v506_v48 }
 0x378   : > { %v1136_v49 = vpop.eup %1135 }
 0x379   : > { %v674_v50 = vsel %vm330_vm2, %v1136_v49, 0.0 }
 0x37a   : > { %675 = vadd.xlane.f32.xlu0 %v674_v50 }
 0x37c   : > { %v1138_v54 = vpop.eup %1137 }
 0x37d   : > { %v842_v55 = vsel %vm330_vm2, %v1138_v54, 0.0 }
 0x387   : > { %679 = vrot.lane.b32.xlu1 %v1232_v14, %s1156_s28 }
 0x390   : > { %511 = vrot.lane.b32.xlu0 %v1232_v14, %s1155_s27 }
 0x3ab   : > { %843 = vadd.xlane.f32.xlu1 %v842_v55 }
 0x3bc   : > { %847 = vrot.lane.b32.xlu1 %v1232_v14, %s1157_s29 }
 0x3ff   : > { %v508_v56 = vpop.xlane.xlu1 %507 }
 0x400   : > { %1139 = vrcp.f32 %v508_v56 }
 0x403   : > { %v676_v57 = vpop.xlane.xlu0 %675  ;;  %v680_v61 = vpop.permute.xlu1 %679 }
 0x404   : > { %1141 = vrcp.f32 %v676_v57 }
 0x407   : > { %v512_v58 = vpop.permute.xlu0 %511 }
 0x408   : > { %1089 = vmatpush3.msk.msra.mxu0 %vm346_vm3, %v512_v58 }
 0x409   : > { %1098 = vmatprep.subr.mxu0 %v1153_v0 }
 0x40d   : > { %v1140_v59 = vpop.eup %1139 }
 0x40e   : > { %v510_v60 = vmul.f32 %v1140_v59, %v1134_v47 }
 0x410   : > { %1091 = vmatmul.mubr.msk.f32.vlgmr.msra.gmra.mxu0 %vm342_vm4, %v510_v60 }
 0x411   : > { %v1142_v62 = vpop.eup %1141  ;;  %1099 = vmatpush3.msk.msra.mxu0 %vm346_vm3, %v680_v61  ;;  %1100 = vmatprep.mubr.msk.f32.mxu0 %vm1154_vm0, %v1153_v0 }
 0x412   : > { %v678_v63 = vmul.f32 %v1142_v62, %v1136_v49  ;;  %1108 = vmatprep.subr.mxu0 %v1153_v0 }
 0x414   : > { %1101 = vmatmul.mubr.msk.f32.vlgmr.msra.gmra.mxu0 %vm342_vm4, %v678_v63 }
 0x415   : > { %1110 = vmatprep.mubr.msk.f32.mxu0 %vm1154_vm0, %v1153_v0 }
 0x434   : > { %v844_v1 = vpop.xlane.xlu1 %843 }
 0x435   : > { %1143 = vrcp.f32 %v844_v1 }
 0x438   : > { %v848_v2 = vpop.permute.xlu1 %847 }
 0x439   : > { %1109 = vmatpush3.msk.msra.mxu0 %vm346_vm3, %v848_v2 }
 0x442   : > { %v1144_v3 = vpop.eup %1143 }
 0x443   : > { %v846_v4 = vmul.f32 %v1144_v3, %v1138_v54 }
 0x445   : > { %1111 = vmatmul.mubr.msk.f32.vlgmr.msra.gmra.mxu0 %vm342_vm4, %v846_v4 }
 0x4d0   : > { %v584_v5 = vpop.f32.mrf.mxu0 }
 0x4d1   : > { %925 = vrot.lane.b32.xlu0 %v584_v5, %s1158_s7 }
 0x4d2   : > { %v1092_v6 = vpop.f32.mrf.mxu0 }
 0x4d4   : > { %v752_v7 = vpop.f32.mrf.mxu0 }
 0x4d5   : > { %929 = vrot.lane.b32.xlu1 %v752_v7, %s1159_s8 }
 0x4d6   : > { %v1102_v8 = vpop.f32.mrf.mxu0 }
 0x505   : > { %v920_v9 = vpop.f32.mrf.mxu0 }
 0x506   : > { %933 = vrot.lane.b32.xlu0 %v920_v9, %s1160_s9 }
 0x507   : > { %v1112_v0 = vpop.f32.mrf.mxu0 }
 0x543   : > { %v926_v10 = vpop.permute.xlu0 %925 }
 0x544   : > { %v936_v12 = vsel %vm245_vm1, %v1253_v24, %v926_v10 }
 0x547   : > { %v930_v11 = vpop.permute.xlu1 %929 }
 0x548   : > { %v938_v13 = vsel %vm937_vm5, %v936_v12, %v930_v11 }
 0x578   : > { %v934_v14 = vpop.permute.xlu0 %933 }
 0x579   : > { %v940_v15 = vsel %vm939_vm6, %v938_v13, %v934_v14 }
 0x57a   : > { %942 = vst.msk [vmem:[%s240_s12] sm:$0x7f] %vm941_vm7, %v940_v15 }
 0x57b PF: > { %s14_s15 = sadd.s32 1, %s1151_s15  }
 0x57c   : > { %p11_p4 = scmp.ge.s32.totalorder %s14_s15, 5  }
 0x57e   :  { %13 = sbr.rel (!%p11_p4) target bundleno = 1 (0x1), region = 75 }

// kernel: _device_forward.33
= control target key start
LH: loop header
LB: loop body
LE: loop exit
PB: predicated region body
PF: predicated region fallthrough
CT: control target
= control target key end

     0   :  { %v436_v0 = vmov 0.0   ;;  %vm437_vm0 = vmmov 0   ;;  %vm40_vm1 = vcmask 261120   ;;  %vm269_vm2 = vcmask 258048   ;;  %s624_s1 = inlined_call_operand.vmem [shape: f32[32,128], index: 1, kind: input, shape index: {}]   ;;  %s625_s0 = inlined_call_operand.vmem [shape: f32[21,32], index: 0, kind: input, shape index: {}]   ;;  %s626_s3 = inlined_call_operand.vmem [shape: f32[128,32], index: 3, kind: input, shape index: {}]   ;;  %s627_s2 = inlined_call_operand.vmem [shape: f32[1,128], index: 2, kind: input, shape index: {}]   ;;  %s628_s4 = inlined_call_operand.vmem [shape: f32[1,32], index: 4, kind: input, shape index: {}]   ;;  %s629_s5 = inlined_call_operand.vmem [shape: f32[1,32], index: 5, kind: input, shape index: {}]   ;;  %s630_s6 = inlined_call_operand.vmem [shape: f32[1,32], index: 6, kind: input, shape index: {}]   ;;  %s631_s7 = inlined_call_operand.vmem [shape: f32[21,32], index: 7, kind: output, shape index: {}]  }
   0x1   :  { %364 = vmatprep.subr.mxu0 %v436_v0  ;;  %v32_v1 = vld [vmem:[%s624_s1 + $0x18] sm:$0xff]  ;;  %v31_v2 = vld [vmem:[%s624_s1 + $0x10] sm:$0xff]  ;;  %372 = vmatprep.mubr.msk.f32.mxu0 %vm437_vm0, %v436_v0  ;;  %v30_v3 = vld [vmem:[%s624_s1 + $0x8] sm:$0xff] }
   0x2   :  { %365 = vmatpush3.msra.mxu0 %v32_v1  ;;  %381 = vmatprep.subr.mxu1 %v436_v0  ;;  %v29_v4 = vld [vmem:[%s624_s1] sm:$0xff]  ;;  %v511_v6 = vld [vmem:[%s625_s0 + $0x8] sm:$0xff]  ;;  %v520_v7 = vld [vmem:[%s625_s0 + $0x10] sm:$0x1f] }
   0x3   :  { %366 = vmatprep.subr.mxu0 %v436_v0  ;;  %413 = vmatprep.mubr.msk.f32.mxu1 %vm437_vm0, %v436_v0  ;;  %v501_v5 = vld [vmem:[%s625_s0] sm:$0xff]  ;;  %v172_v8 = vld [vmem:[%s626_s3 + $0x78] sm:$0xff]  ;;  %v171_v9 = vld [vmem:[%s626_s3 + $0x70] sm:$0xff] }
   0x4   :  { %367 = vmatpush3.msra.mxu0 %v31_v2  ;;  %382 = vmatpush3.msra.mxu1 %v172_v8  ;;  %v170_v10 = vld [vmem:[%s626_s3 + $0x68] sm:$0xff]  ;;  %v169_v11 = vld [vmem:[%s626_s3 + $0x60] sm:$0xff]  ;;  %v168_v12 = vld [vmem:[%s626_s3 + $0x58] sm:$0xff] }
   0x5   :  { %368 = vmatprep.subr.mxu0 %v436_v0  ;;  %383 = vmatprep.subr.mxu1 %v436_v0  ;;  %v167_v13 = vld [vmem:[%s626_s3 + $0x50] sm:$0xff]  ;;  %v166_v14 = vld [vmem:[%s626_s3 + $0x48] sm:$0xff]  ;;  %v165_v15 = vld [vmem:[%s626_s3 + $0x40] sm:$0xff] }
   0x6   :  { %369 = vmatpush3.msra.mxu0 %v30_v3  ;;  %384 = vmatpush3.msra.mxu1 %v171_v9  ;;  %v164_v16 = vld [vmem:[%s626_s3 + $0x38] sm:$0xff]  ;;  %v163_v17 = vld [vmem:[%s626_s3 + $0x30] sm:$0xff]  ;;  %v162_v18 = vld [vmem:[%s626_s3 + $0x28] sm:$0xff] }
   0x7   :  { %370 = vmatprep.subr.mxu0 %v436_v0  ;;  %385 = vmatprep.subr.mxu1 %v436_v0  ;;  %v161_v19 = vld [vmem:[%s626_s3 + $0x20] sm:$0xff]  ;;  %v160_v20 = vld [vmem:[%s626_s3 + $0x18] sm:$0xff]  ;;  %v159_v21 = vld [vmem:[%s626_s3 + $0x10] sm:$0xff] }
   0x8   :  { %371 = vmatpush3.msra.mxu0 %v29_v4  ;;  %386 = vmatpush3.msra.mxu1 %v170_v10  ;;  %v158_v22 = vld [vmem:[%s626_s3 + $0x8] sm:$0xff]  ;;  %v157_v23 = vld [vmem:[%s626_s3] sm:$0xff] }
   0x9   :  { %373 = vmatmul.mubr.msk.f32.vlgmr.msra.gmra.mxu0 %vm40_vm1, %v501_v5  ;;  %387 = vmatprep.subr.mxu1 %v436_v0  ;;  %v331_v24 = vld [vmem:[%s627_s2] ss:$0 sm:$0xff] }
   0xa   :  { %375 = vmatprep.mubr.msk.f32.mxu0 %vm437_vm0, %v436_v0  ;;  %388 = vmatpush3.msra.mxu1 %v169_v11  ;;  %v335_v61 = vld [vmem:[%s628_s4] ss:$0 sm:$0xff] }
   0xb   :  { %389 = vmatprep.subr.mxu1 %v436_v0 }
   0xc   :  { %390 = vmatpush3.msra.mxu1 %v168_v12 }
   0xd   :  { %376 = vmatmul.mubr.msk.f32.gmra.mxu0 %vm40_vm1, %v511_v6  ;;  %391 = vmatprep.subr.mxu1 %v436_v0 }
   0xe   :  { %378 = vmatprep.mubr.msk.f32.mxu0 %vm437_vm0, %v436_v0  ;;  %392 = vmatpush3.msra.mxu1 %v167_v13 }
   0xf   :  { %393 = vmatprep.subr.mxu1 %v436_v0 }
  0x10   :  { %394 = vmatpush3.msra.mxu1 %v166_v14 }
  0x11   :  { %379 = vmatmul.mubr.msk.f32.gmra.mxu0 %vm40_vm1, %v520_v7  ;;  %395 = vmatprep.subr.mxu1 %v436_v0 }
  0x12   :  { %396 = vmatpush3.msra.mxu1 %v165_v15 }
  0x13   :  { %397 = vmatprep.subr.mxu1 %v436_v0 }
  0x14   :  { %398 = vmatpush3.msra.mxu1 %v164_v16 }
  0x15   :  { %399 = vmatprep.subr.mxu1 %v436_v0 }
  0x16   :  { %400 = vmatpush3.msra.mxu1 %v163_v17 }
  0x17   :  { %401 = vmatprep.subr.mxu1 %v436_v0 }
  0x18   :  { %402 = vmatpush3.msra.mxu1 %v162_v18 }
  0x19   :  { %403 = vmatprep.subr.mxu1 %v436_v0 }
  0x1a   :  { %404 = vmatpush3.msra.mxu1 %v161_v19 }
  0x1b   :  { %405 = vmatprep.subr.mxu1 %v436_v0 }
  0x1c   :  { %406 = vmatpush3.msra.mxu1 %v160_v20 }
  0x1d   :  { %407 = vmatprep.subr.mxu1 %v436_v0 }
  0x1e   :  { %408 = vmatpush3.msra.mxu1 %v159_v21 }
  0x1f   :  { %409 = vmatprep.subr.mxu1 %v436_v0 }
  0x20   :  { %410 = vmatpush3.msra.mxu1 %v158_v22 }
  0x21   :  { %411 = vmatprep.subr.mxu1 %v436_v0 }
  0x22   :  { %412 = vmatpush3.msra.mxu1 %v157_v23 }
  0xc9   :  { %v116_v25 = vpop.f32.mrf.mxu0 }
  0xca   :  { %v117_v26 = vadd.f32 %v331_v24, %v116_v25 }
  0xcb   :  { %v374_v27 = vpop.f32.mrf.mxu0 }
  0xcc   :  { %v130_v28 = vmul.f32 %v117_v26, %v117_v26 }
  0xcd   :  { %v121_v29 = vpop.f32.mrf.mxu0 }
  0xce   :  { %v133_v30 = vmul.f32 %v130_v28, %v117_v26  ;;  %v122_v31 = vadd.f32 %v331_v24, %v121_v29 }
  0xcf   :  { %v377_v32 = vpop.f32.mrf.mxu0 }
  0xd0   :  { %v136_v33 = vmul.f32 0.044715, %v133_v30  ;;  %v131_v34 = vmul.f32 %v122_v31, %v122_v31 }
  0xd1   :  { %v126_v35 = vpop.f32.mrf.mxu0 }
  0xd2   :  { %v139_v36 = vadd.f32 %v136_v33, %v117_v26  ;;  %v134_v37 = vmul.f32 %v131_v34, %v122_v31  ;;  %v127_v38 = vadd.f32 %v331_v24, %v126_v35 }
  0xd3   :  { %v380_v39 = vpop.f32.mrf.mxu0 }
  0xd4   :  { %v142_v40 = vmul.f32 0.7978846, %v139_v36  ;;  %v137_v41 = vmul.f32 0.044715, %v134_v37  ;;  %v132_v42 = vmul.f32 %v127_v38, %v127_v38 }
  0xd6   :  { %424 = vtanh.f32 %v142_v40  ;;  %v140_v43 = vadd.f32 %v137_v41, %v122_v31  ;;  %v135_v44 = vmul.f32 %v132_v42, %v127_v38  ;;  %v337_v40 = vld [vmem:[%s630_s6] ss:$0 sm:$0xff] }
  0xd8   :  { %v143_v45 = vmul.f32 0.7978846, %v140_v43  ;;  %v138_v46 = vmul.f32 0.044715, %v135_v44 }
  0xda   :  { %426 = vtanh.f32 %v143_v45  ;;  %v141_v47 = vadd.f32 %v138_v46, %v127_v38 }
  0xdc   :  { %v144_v48 = vmul.f32 0.7978846, %v141_v47 }
  0xde   :  { %428 = vtanh.f32 %v144_v48 }
  0xe3   :  { %v425_v49 = vpop.eup %424 }
  0xe4   :  { %v148_v50 = vadd.f32 1.0, %v425_v49 }
  0xe6   :  { %v151_v51 = vmul.f32 0.5, %v148_v50 }
  0xe7   :  { %v427_v52 = vpop.eup %426 }
  0xe8   :  { %v154_v53 = vmul.f32 %v151_v51, %v117_v26  ;;  %v149_v54 = vadd.f32 1.0, %v427_v52 }
  0xea   :  { %414 = vmatmul.mubr.f32.vlgmr.msra.gmra.mxu1 %v154_v53  ;;  %v152_v55 = vmul.f32 0.5, %v149_v54 }
  0xeb   :  { %v429_v56 = vpop.eup %428  ;;  %416 = vmatprep.mubr.msk.f32.mxu1 %vm437_vm0, %v436_v0 }
  0xec   :  { %v155_v57 = vmul.f32 %v152_v55, %v122_v31  ;;  %v150_v58 = vadd.f32 1.0, %v429_v56 }
  0xee   :  { %417 = vmatmul.mubr.f32.gmra.mxu1 %v155_v57  ;;  %v153_v59 = vmul.f32 0.5, %v150_v58 }
  0xef   :  { %419 = vmatprep.mubr.msk.f32.mxu1 %vm437_vm0, %v436_v0 }
  0xf0   :  { %v156_v60 = vmul.f32 %v153_v59, %v127_v38  ;;  %v336_v38 = vld [vmem:[%s629_s5] ss:$0 sm:$0xff] }
  0xf2   :  { %420 = vmatmul.mubr.f32.gmra.mxu1 %v156_v60 }
 0x1aa   :  { %v246_v62 = vpop.f32.mrf.mxu1 }
 0x1ab   :  { %v247_v63 = vadd.f32 %v335_v61, %v246_v62 }
 0x1ac   :  { %v415_v1 = vpop.f32.mrf.mxu1 }
 0x1ad   :  { %v260_v2 = vadd.f32 %v247_v63, %v501_v5 }
 0x1ae   :  { %v251_v3 = vpop.f32.mrf.mxu1 }
 0x1af   :  { %v252_v4 = vadd.f32 %v335_v61, %v251_v3  ;;  %v263_v8 = vsel %vm40_vm1, %v260_v2, 0.0 }
 0x1b0   :  { %264 = vadd.xlane.f32.xlu0 %v263_v8  ;;  %v418_v9 = vpop.f32.mrf.mxu1 }
 0x1b1   :  { %v261_v10 = vadd.f32 %v252_v4, %v511_v6 }
 0x1b2   :  { %v256_v0 = vpop.f32.mrf.mxu1 }
 0x1b3   :  { %v257_v11 = vadd.f32 %v335_v61, %v256_v0  ;;  %v266_v12 = vsel %vm40_vm1, %v261_v10, 0.0 }
 0x1b4   :  { %267 = vadd.xlane.f32.xlu0 %v266_v12  ;;  %v421_v13 = vpop.f32.mrf.mxu1 }
 0x1b5   :  { %v262_v14 = vadd.f32 %v257_v11, %v520_v7 }
 0x1b7   :  { %v270_v15 = vsel %vm269_vm2, %v262_v14, 0.0 }
 0x1b8   :  { %271 = vadd.xlane.f32.xlu1 %v270_v15 }
 0x239   :  { %v265_v5 = vpop.xlane.xlu0 %264 }
 0x23a   :  { %v274_v16 = vmul.f32 0.03125, %v265_v5 }
 0x23c   :  { %v277_v17 = vsub.f32 %v260_v2, %v274_v16 }
 0x23d   :  { %v268_v18 = vpop.xlane.xlu0 %267 }
 0x23e   :  { %v275_v19 = vmul.f32 0.03125, %v268_v18  ;;  %v280_v20 = vmul.f32 %v277_v17, %v277_v17 }
 0x240   :  { %v278_v21 = vsub.f32 %v261_v10, %v275_v19  ;;  %v283_v6 = vsel %vm40_vm1, %v280_v20, 0.0 }
 0x241   :  { %284 = vadd.xlane.f32.xlu1 %v283_v6  ;;  %v272_v22 = vpop.xlane.xlu1 %271 }
 0x242   :  { %v276_v23 = vmul.f32 0.03125, %v272_v22  ;;  %v281_v24 = vmul.f32 %v278_v21, %v278_v21 }
 0x244   :  { %v279_v25 = vsub.f32 %v262_v14, %v276_v23  ;;  %v286_v26 = vsel %vm40_vm1, %v281_v24, 0.0 }
 0x245   :  { %287 = vadd.xlane.f32.xlu0 %v286_v26 }
 0x246   :  { %v282_v7 = vmul.f32 %v279_v25, %v279_v25 }
 0x248   :  { %v289_v27 = vsel %vm269_vm2, %v282_v7, 0.0 }
 0x249   :  { %290 = vadd.xlane.f32.xlu1 %v289_v27 }
 0x2ca   :  { %v285_v28 = vpop.xlane.xlu1 %284 }
 0x2cb   :  { %v292_v29 = vmul.f32 0.03125, %v285_v28 }
 0x2cd   :  { %v295_v30 = vadd.f32 1e-12, %v292_v29 }
 0x2ce   :  { %v288_v31 = vpop.xlane.xlu0 %287 }
 0x2cf   :  { %430 = vrsqrt.f32 %v295_v30  ;;  %v293_v32 = vmul.f32 0.03125, %v288_v31 }
 0x2d1   :  { %v296_v33 = vadd.f32 1e-12, %v293_v32 }
 0x2d2   :  { %v291_v34 = vpop.xlane.xlu1 %290 }
 0x2d3   :  { %432 = vrsqrt.f32 %v296_v33  ;;  %v294_v35 = vmul.f32 0.03125, %v291_v34 }
 0x2d5   :  { %v297_v36 = vadd.f32 1e-12, %v294_v35 }
 0x2d7   :  { %434 = vrsqrt.f32 %v297_v36 }
 0x2dc   :  { %v431_v37 = vpop.eup %430 }
 0x2dd   :  { %v301_v39 = vmul.f32 %v431_v37, %v277_v17 }
 0x2df   :  { %v311_v41 = vmul.f32 %v336_v38, %v301_v39 }
 0x2e0   :  { %v433_v42 = vpop.eup %432 }
 0x2e1   :  { %v321_v43 = vadd.f32 %v337_v40, %v311_v41  ;;  %v302_v44 = vmul.f32 %v433_v42, %v278_v21 }
 0x2e3   :  { %324 = vst.msk [vmem:[%s631_s7] sm:$0xff] %vm40_vm1, %v321_v43  ;;  %v312_v45 = vmul.f32 %v336_v38, %v302_v44 }
 0x2e4   :  { %v435_v46 = vpop.eup %434 }
 0x2e5   :  { %v322_v47 = vadd.f32 %v337_v40, %v312_v45  ;;  %v303_v48 = vmul.f32 %v435_v46, %v279_v25 }
 0x2e7   :  { %325 = vst.msk [vmem:[%s631_s7 + $0x8] sm:$0xff] %vm40_vm1, %v322_v47  ;;  %v313_v49 = vmul.f32 %v336_v38, %v303_v48 }
 0x2e9   :  { %v323_v50 = vadd.f32 %v337_v40, %v313_v49 }
 0x2eb   :  { %326 = vst.msk [vmem:[%s631_s7 + $0x10] sm:$0x1f] %vm269_vm2, %v323_v50 }

// kernel: _device_forward.34
= control target key start
LH: loop header
LB: loop body
LE: loop exit
PB: predicated region body
PF: predicated region fallthrough
CT: control target
= control target key end

     0   :  { %vm31_vm0 = vcmask 261120   ;;  %vm145_vm1 = vcmask 785408   ;;  %s281_s1 = inlined_call_operand.vmem [shape: f32[32,96], index: 1, kind: input, shape index: {}]   ;;  %s282_s0 = inlined_call_operand.vmem [shape: f32[48,32], index: 0, kind: input, shape index: {}]   ;;  %s283_s2 = inlined_call_operand.vmem [shape: f32[1,96], index: 2, kind: input, shape index: {}]   ;;  %s284_s3 = inlined_call_operand.vmem [shape: f32[48,96], index: 3, kind: output, shape index: {}]  }
   0x1   :  { %v23_v0 = vld [vmem:[%s281_s1 + $0x18] sm:$0xff]  ;;  %v22_v1 = vld [vmem:[%s281_s1 + $0x10] sm:$0xff]  ;;  %v21_v2 = vld [vmem:[%s281_s1 + $0x8] sm:$0xff] }
   0x2   :  { %190 = vmatprep.subr.mxu1 %v23_v0  ;;  %173 = vmatprep.subr.mxu0 %v23_v0  ;;  %v20_v3 = vld [vmem:[%s281_s1] sm:$0xff]  ;;  %v16_v4 = vld [vmem:[%s282_s0 + $0x10] sm:$0xff]  ;;  %v17_v5 = vld [vmem:[%s282_s0 + $0x18] sm:$0xff] }
   0x3   :  { %194 = vmatpush3.msra.mxu1 %v23_v0  ;;  %174 = vmatpush3.msra.mxu0 %v23_v0  ;;  %v14_v6 = vld [vmem:[%s282_s0] sm:$0xff]  ;;  %v15_v8 = vld [vmem:[%s282_s0 + $0x8] sm:$0xff] }
   0x4   :  { %191 = vmatprep.subr.mxu1 %v22_v1  ;;  %175 = vmatprep.subr.mxu0 %v22_v1  ;;  %v18_v7 = vld [vmem:[%s282_s0 + $0x20] sm:$0xff]  ;;  %v19_v9 = vld [vmem:[%s282_s0 + $0x28] sm:$0xff] }
   0x5   :  { %195 = vmatpush3.msra.mxu1 %v22_v1  ;;  %176 = vmatpush3.msra.mxu0 %v22_v1  ;;  %v156_v10 = vld [vmem:[%s283_s2] ss:$0 sm:$0xff] }
   0x6   :  { %192 = vmatprep.subr.mxu1 %v21_v2  ;;  %177 = vmatprep.subr.mxu0 %v21_v2 }
   0x7   :  { %196 = vmatpush3.msra.mxu1 %v21_v2  ;;  %178 = vmatpush3.msra.mxu0 %v21_v2 }
   0x8   :  { %193 = vmatprep.subr.mxu1 %v20_v3  ;;  %184 = vmatprep.mubr.msk.f32.mxu1 %vm31_vm0, %v16_v4 }
   0x9   :  { %197 = vmatpush3.msra.mxu1 %v20_v3  ;;  %179 = vmatprep.subr.mxu0 %v20_v3 }
   0xa   :  { %185 = vmatmul.mubr.msk.f32.vlgmr.msra.gmra.mxu1 %vm31_vm0, %v17_v5  ;;  %180 = vmatpush3.msra.mxu0 %v20_v3 }
   0xb   :  { %181 = vmatprep.mubr.msk.f32.mxu0 %vm31_vm0, %v14_v6  ;;  %187 = vmatprep.mubr.msk.f32.mxu1 %vm31_vm0, %v18_v7 }
   0xc   :  { %182 = vmatmul.mubr.msk.f32.vlgmr.msra.gmra.mxu0 %vm31_vm0, %v15_v8 }
   0xe   :  { %188 = vmatmul.mubr.msk.f32.gmra.mxu1 %vm31_vm0, %v19_v9 }
  0xca   :  { %v186_v11 = vpop.f32.mrf.mxu1 }
  0xcb   :  { %v132_v12 = vadd.f32 %v186_v11, %v156_v10 }
  0xcc   :  { %v183_v13 = vpop.f32.mrf.mxu0  ;;  %v126_v14 = vpop.f32.mrf.mxu1 }
  0xcd   :  { %149 = vst.msk [vmem:[%s284_s3 + $0x18] sm:$0xff] %vm145_vm1, %v132_v12  ;;  %v122_v15 = vadd.f32 %v183_v13, %v156_v10  ;;  %v127_v16 = vadd.f32 %v156_v10, %v126_v14 }
  0xce   :  { %v116_v17 = vpop.f32.mrf.mxu0  ;;  %v189_v18 = vpop.f32.mrf.mxu1 }
  0xcf   :  { %147 = vst.msk [vmem:[%s284_s3 + $0x8] sm:$0xff] %vm145_vm1, %v122_v15  ;;  %148 = vst.msk [vmem:[%s284_s3 + $0x10] sm:$0xff] %vm145_vm1, %v127_v16  ;;  %v117_v19 = vadd.f32 %v156_v10, %v116_v17  ;;  %v142_v20 = vadd.f32 %v189_v18, %v156_v10 }
  0xd0   :  { %v136_v21 = vpop.f32.mrf.mxu1 }
  0xd1   :  { %146 = vst.msk [vmem:[%s284_s3] sm:$0xff] %vm145_vm1, %v117_v19  ;;  %151 = vst.msk [vmem:[%s284_s3 + $0x28] sm:$0xff] %vm145_vm1, %v142_v20  ;;  %v137_v22 = vadd.f32 %v156_v10, %v136_v21 }
  0xd3   :  { %150 = vst.msk [vmem:[%s284_s3 + $0x20] sm:$0xff] %vm145_vm1, %v137_v22 }

// kernel: _device_forward.39
= control target key start
LH: loop header
LB: loop body
LE: loop exit
PB: predicated region body
PF: predicated region fallthrough
CT: control target
= control target key end

     0   :  { %v171_v0 = vmov 0.0   ;;  %vm172_vm0 = vmmov 0   ;;  %vm35_vm1 = vcmask 261120   ;;  %vm111_vm2 = vcmask 256000   ;;  %s241_s2 = inlined_call_operand.vmem [shape: f32[32,32], index: 2, kind: input, shape index: {}]   ;;  %s242_s0 = inlined_call_operand.vmem [shape: f32[3,32], index: 0, kind: input, shape index: {}]   ;;  %s243_s3 = inlined_call_operand.vmem [shape: f32[1,32], index: 3, kind: input, shape index: {}]   ;;  %s244_s1 = inlined_call_operand.vmem [shape: f32[3,32], index: 1, kind: input, shape index: {}]   ;;  %s245_s4 = inlined_call_operand.vmem [shape: f32[1,32], index: 4, kind: input, shape index: {}]   ;;  %s246_s5 = inlined_call_operand.vmem [shape: f32[1,32], index: 5, kind: input, shape index: {}]   ;;  %s247_s6 = inlined_call_operand.vmem [shape: f32[3,32], index: 6, kind: output, shape index: {}]  }
   0x1   :  { %156 = vmatprep.subr.mxu0 %v171_v0  ;;  %v27_v1 = vld [vmem:[%s241_s2 + $0x18] sm:$0xff]  ;;  %v26_v2 = vld [vmem:[%s241_s2 + $0x10] sm:$0xff]  ;;  %164 = vmatprep.mubr.msk.f32.mxu0 %vm172_vm0, %v171_v0  ;;  %v25_v3 = vld [vmem:[%s241_s2 + $0x8] sm:$0xff] }
   0x2   :  { %157 = vmatpush3.msra.mxu0 %v27_v1  ;;  %v24_v4 = vld [vmem:[%s241_s2] sm:$0xff] }
   0x3   :  { %158 = vmatprep.subr.mxu0 %v171_v0  ;;  %v23_v5 = vld [vmem:[%s242_s0] sm:$0x7] }
   0x4   :  { %159 = vmatpush3.msra.mxu0 %v26_v2  ;;  %v147_v6 = vld [vmem:[%s243_s3] ss:$0 sm:$0xff] }
   0x5   :  { %160 = vmatprep.subr.mxu0 %v171_v0  ;;  %v109_v8 = vld [vmem:[%s244_s1] sm:$0x7] }
   0x6   :  { %161 = vmatpush3.msra.mxu0 %v25_v3  ;;  %v149_v22 = vld [vmem:[%s245_s4] ss:$0 sm:$0xff] }
   0x7   :  { %162 = vmatprep.subr.mxu0 %v171_v0  ;;  %v150_v24 = vld [vmem:[%s246_s5] ss:$0 sm:$0xff] }
   0x8   :  { %163 = vmatpush3.msra.mxu0 %v24_v4 }
   0x9   :  { %165 = vmatmul.mubr.msk.f32.vlgmr.msra.gmra.mxu0 %vm35_vm1, %v23_v5 }
  0xc9   :  { %v105_v7 = vpop.f32.mrf.mxu0 }
  0xca   :  { %v106_v9 = vadd.f32 %v147_v6, %v105_v7 }
  0xcb   :  { %v166_v10 = vpop.f32.mrf.mxu0 }
  0xcc   :  { %v110_v11 = vadd.f32 %v109_v8, %v106_v9 }
  0xce   :  { %v112_v12 = vsel %vm111_vm2, %v110_v11, 0.0 }
  0xcf   :  { %113 = vadd.xlane.f32.xlu0 %v112_v12 }
 0x158   :  { %v114_v13 = vpop.xlane.xlu0 %113 }
 0x159   :  { %v116_v14 = vmul.f32 0.03125, %v114_v13 }
 0x15b   :  { %v117_v15 = vsub.f32 %v110_v11, %v116_v14 }
 0x15d   :  { %v118_v16 = vmul.f32 %v117_v15, %v117_v15 }
 0x15f   :  { %v119_v17 = vsel %vm111_vm2, %v118_v16, 0.0 }
 0x160   :  { %120 = vadd.xlane.f32.xlu0 %v119_v17 }
 0x1e9   :  { %v121_v18 = vpop.xlane.xlu0 %120 }
 0x1ea   :  { %v122_v19 = vmul.f32 0.03125, %v121_v18 }
 0x1ec   :  { %v123_v20 = vadd.f32 1e-12, %v122_v19 }
 0x1ee   :  { %169 = vrsqrt.f32 %v123_v20 }
 0x1fb   :  { %v170_v21 = vpop.eup %169 }
 0x1fc   :  { %v125_v23 = vmul.f32 %v170_v21, %v117_v15 }
 0x1fe   :  { %v133_v25 = vmul.f32 %v149_v22, %v125_v23 }
 0x200   :  { %v141_v26 = vadd.f32 %v150_v24, %v133_v25 }
 0x202   :  { %142 = vst.msk [vmem:[%s247_s6] sm:$0x7] %vm111_vm2, %v141_v26 }

// kernel: _device_forward.40
= control target key start
LH: loop header
LB: loop body
LE: loop exit
PB: predicated region body
PF: predicated region fallthrough
CT: control target
= control target key end

     0   :  { %v330_v0 = vmov 0.0   ;;  %vm331_vm0 = vmmov 0   ;;  %vm38_vm1 = vcmask 261120   ;;  %vm215_vm2 = vcmask 256000   ;;  %s479_s1 = inlined_call_operand.vmem [shape: f32[32,128], index: 1, kind: input, shape index: {}]   ;;  %s480_s0 = inlined_call_operand.vmem [shape: f32[3,32], index: 0, kind: input, shape index: {}]   ;;  %s481_s3 = inlined_call_operand.vmem [shape: f32[128,32], index: 3, kind: input, shape index: {}]   ;;  %s482_s2 = inlined_call_operand.vmem [shape: f32[1,128], index: 2, kind: input, shape index: {}]   ;;  %s483_s4 = inlined_call_operand.vmem [shape: f32[1,32], index: 4, kind: input, shape index: {}]   ;;  %s484_s5 = inlined_call_operand.vmem [shape: f32[1,32], index: 5, kind: input, shape index: {}]   ;;  %s485_s6 = inlined_call_operand.vmem [shape: f32[1,32], index: 6, kind: input, shape index: {}]   ;;  %s486_s7 = inlined_call_operand.vmem [shape: f32[3,32], index: 7, kind: output, shape index: {}]  }
   0x1   :  { %278 = vmatprep.subr.mxu0 %v330_v0  ;;  %v30_v1 = vld [vmem:[%s479_s1 + $0x18] sm:$0xff]  ;;  %v29_v2 = vld [vmem:[%s479_s1 + $0x10] sm:$0xff]  ;;  %286 = vmatprep.mubr.msk.f32.mxu0 %vm331_vm0, %v330_v0  ;;  %v28_v3 = vld [vmem:[%s479_s1 + $0x8] sm:$0xff] }
   0x2   :  { %279 = vmatpush3.msra.mxu0 %v30_v1  ;;  %289 = vmatprep.subr.mxu1 %v330_v0  ;;  %v27_v4 = vld [vmem:[%s479_s1] sm:$0xff]  ;;  %v136_v6 = vld [vmem:[%s481_s3 + $0x78] sm:$0xff]  ;;  %v135_v7 = vld [vmem:[%s481_s3 + $0x70] sm:$0xff] }
   0x3   :  { %280 = vmatprep.subr.mxu0 %v330_v0  ;;  %321 = vmatprep.mubr.msk.f32.mxu1 %vm331_vm0, %v330_v0  ;;  %v393_v5 = vld [vmem:[%s480_s0] sm:$0x7]  ;;  %v134_v8 = vld [vmem:[%s481_s3 + $0x68] sm:$0xff]  ;;  %v132_v10 = vld [vmem:[%s481_s3 + $0x58] sm:$0xff] }
   0x4   :  { %281 = vmatpush3.msra.mxu0 %v29_v2  ;;  %290 = vmatpush3.msra.mxu1 %v136_v6  ;;  %v133_v9 = vld [vmem:[%s481_s3 + $0x60] sm:$0xff]  ;;  %v131_v11 = vld [vmem:[%s481_s3 + $0x50] sm:$0xff]  ;;  %v130_v12 = vld [vmem:[%s481_s3 + $0x48] sm:$0xff] }
   0x5   :  { %282 = vmatprep.subr.mxu0 %v330_v0  ;;  %291 = vmatprep.subr.mxu1 %v330_v0  ;;  %v129_v13 = vld [vmem:[%s481_s3 + $0x40] sm:$0xff]  ;;  %v128_v14 = vld [vmem:[%s481_s3 + $0x38] sm:$0xff]  ;;  %v127_v15 = vld [vmem:[%s481_s3 + $0x30] sm:$0xff] }
   0x6   :  { %283 = vmatpush3.msra.mxu0 %v28_v3  ;;  %292 = vmatpush3.msra.mxu1 %v135_v7  ;;  %v126_v16 = vld [vmem:[%s481_s3 + $0x28] sm:$0xff]  ;;  %v125_v17 = vld [vmem:[%s481_s3 + $0x20] sm:$0xff]  ;;  %v124_v18 = vld [vmem:[%s481_s3 + $0x18] sm:$0xff] }
   0x7   :  { %284 = vmatprep.subr.mxu0 %v330_v0  ;;  %293 = vmatprep.subr.mxu1 %v330_v0  ;;  %v123_v19 = vld [vmem:[%s481_s3 + $0x10] sm:$0xff]  ;;  %v122_v20 = vld [vmem:[%s481_s3 + $0x8] sm:$0xff]  ;;  %v121_v21 = vld [vmem:[%s481_s3] sm:$0xff] }
   0x8   :  { %285 = vmatpush3.msra.mxu0 %v27_v4  ;;  %294 = vmatpush3.msra.mxu1 %v134_v8  ;;  %v251_v22 = vld [vmem:[%s482_s2] ss:$0 sm:$0xff] }
   0x9   :  { %287 = vmatmul.mubr.msk.f32.vlgmr.msra.gmra.mxu0 %vm38_vm1, %v393_v5  ;;  %295 = vmatprep.subr.mxu1 %v330_v0  ;;  %v253_v35 = vld [vmem:[%s483_s4] ss:$0 sm:$0xff] }
   0xa   :  { %296 = vmatpush3.msra.mxu1 %v133_v9  ;;  %v254_v50 = vld [vmem:[%s484_s5] ss:$0 sm:$0xff] }
   0xb   :  { %297 = vmatprep.subr.mxu1 %v330_v0  ;;  %v255_v52 = vld [vmem:[%s485_s6] ss:$0 sm:$0xff] }
   0xc   :  { %298 = vmatpush3.msra.mxu1 %v132_v10 }
   0xd   :  { %299 = vmatprep.subr.mxu1 %v330_v0 }
   0xe   :  { %300 = vmatpush3.msra.mxu1 %v131_v11 }
   0xf   :  { %301 = vmatprep.subr.mxu1 %v330_v0 }
  0x10   :  { %302 = vmatpush3.msra.mxu1 %v130_v12 }
  0x11   :  { %303 = vmatprep.subr.mxu1 %v330_v0 }
  0x12   :  { %304 = vmatpush3.msra.mxu1 %v129_v13 }
  0x13   :  { %305 = vmatprep.subr.mxu1 %v330_v0 }
  0x14   :  { %306 = vmatpush3.msra.mxu1 %v128_v14 }
  0x15   :  { %307 = vmatprep.subr.mxu1 %v330_v0 }
  0x16   :  { %308 = vmatpush3.msra.mxu1 %v127_v15 }
  0x17   :  { %309 = vmatprep.subr.mxu1 %v330_v0 }
  0x18   :  { %310 = vmatpush3.msra.mxu1 %v126_v16 }
  0x19   :  { %311 = vmatprep.subr.mxu1 %v330_v0 }
  0x1a   :  { %312 = vmatpush3.msra.mxu1 %v125_v17 }
  0x1b   :  { %313 = vmatprep.subr.mxu1 %v330_v0 }
  0x1c   :  { %314 = vmatpush3.msra.mxu1 %v124_v18 }
  0x1d   :  { %315 = vmatprep.subr.mxu1 %v330_v0 }
  0x1e   :  { %316 = vmatpush3.msra.mxu1 %v123_v19 }
  0x1f   :  { %317 = vmatprep.subr.mxu1 %v330_v0 }
  0x20   :  { %318 = vmatpush3.msra.mxu1 %v122_v20 }
  0x21   :  { %319 = vmatprep.subr.mxu1 %v330_v0 }
  0x22   :  { %320 = vmatpush3.msra.mxu1 %v121_v21 }
  0xc9   :  { %v108_v23 = vpop.f32.mrf.mxu0 }
  0xca   :  { %v109_v24 = vadd.f32 %v251_v22, %v108_v23 }
  0xcb   :  { %v288_v25 = vpop.f32.mrf.mxu0 }
  0xcc   :  { %v112_v26 = vmul.f32 %v109_v24, %v109_v24 }
  0xce   :  { %v113_v27 = vmul.f32 %v112_v26, %v109_v24 }
  0xd0   :  { %v114_v28 = vmul.f32 0.044715, %v113_v27 }
  0xd2   :  { %v115_v29 = vadd.f32 %v114_v28, %v109_v24 }
  0xd4   :  { %v116_v30 = vmul.f32 0.7978846, %v115_v29 }
  0xd6   :  { %326 = vtanh.f32 %v116_v30 }
  0xe3   :  { %v327_v31 = vpop.eup %326 }
  0xe4   :  { %v118_v32 = vadd.f32 1.0, %v327_v31 }
  0xe6   :  { %v119_v33 = vmul.f32 0.5, %v118_v32 }
  0xe8   :  { %v120_v34 = vmul.f32 %v119_v33, %v109_v24 }
  0xea   :  { %322 = vmatmul.mubr.f32.vlgmr.msra.gmra.mxu1 %v120_v34 }
 0x1aa   :  { %v210_v36 = vpop.f32.mrf.mxu1 }
 0x1ab   :  { %v211_v37 = vadd.f32 %v253_v35, %v210_v36 }
 0x1ac   :  { %v323_v38 = vpop.f32.mrf.mxu1 }
 0x1ad   :  { %v214_v39 = vadd.f32 %v211_v37, %v393_v5 }
 0x1af   :  { %v216_v40 = vsel %vm215_vm2, %v214_v39, 0.0 }
 0x1b0   :  { %217 = vadd.xlane.f32.xlu0 %v216_v40 }
 0x239   :  { %v218_v41 = vpop.xlane.xlu0 %217 }
 0x23a   :  { %v220_v42 = vmul.f32 0.03125, %v218_v41 }
 0x23c   :  { %v221_v43 = vsub.f32 %v214_v39, %v220_v42 }
 0x23e   :  { %v222_v44 = vmul.f32 %v221_v43, %v221_v43 }
 0x240   :  { %v223_v45 = vsel %vm215_vm2, %v222_v44, 0.0 }
 0x241   :  { %224 = vadd.xlane.f32.xlu0 %v223_v45 }
 0x2ca   :  { %v225_v46 = vpop.xlane.xlu0 %224 }
 0x2cb   :  { %v226_v47 = vmul.f32 0.03125, %v225_v46 }
 0x2cd   :  { %v227_v48 = vadd.f32 1e-12, %v226_v47 }
 0x2cf   :  { %328 = vrsqrt.f32 %v227_v48 }
 0x2dc   :  { %v329_v49 = vpop.eup %328 }
 0x2dd   :  { %v229_v51 = vmul.f32 %v329_v49, %v221_v43 }
 0x2df   :  { %v237_v53 = vmul.f32 %v254_v50, %v229_v51 }
 0x2e1   :  { %v245_v54 = vadd.f32 %v255_v52, %v237_v53 }
 0x2e3   :  { %246 = vst.msk [vmem:[%s486_s7] sm:$0x7] %vm215_vm2, %v245_v54 }

// kernel: _device_forward.38
= control target key start
LH: loop header
LB: loop body
LE: loop exit
PB: predicated region body
PF: predicated region fallthrough
CT: control target
= control target key end

     0   :  { %s1232_s15 = smov 0   ;;  %s1382_s0 = inlined_call_operand.vmem [shape: f32[3,1,32], index: 0, kind: input, shape index: {}]   ;;  %s1383_s1 = inlined_call_operand.vmem [shape: f32[3,15,32], index: 1, kind: input, shape index: {}]   ;;  %s1384_s2 = inlined_call_operand.vmem [shape: f32[3,15,32], index: 2, kind: input, shape index: {}]   ;;  %s1385_s3 = inlined_call_operand.vmem [shape: f32[3,1,15], index: 3, kind: input, shape index: {}]   ;;  %s1386_s4 = inlined_call_operand.vmem [shape: f32[3,1,32], index: 4, kind: output, shape index: {}]  }
   0x1 LB: > { %s1046_s16 = sadd.s32 4294967295, %s1197_s15   ;;  %p1050_p0 = scmp.ge.s32.totalorder %s1197_s15, 1  ;;  %s1197_s15 = sphi %s1232_s15, %s14_s15  }
   0x2   : > { %p188_p1 = scmp.lt.s32.totalorder %s1197_s15, 4 }
   0x4   : > { %p189_p2 = pnand %p1050_p0, %p188_p1 }
   0x5   : > { %p223_p3 = scmp.lt.s32.totalorder (!%p189_p2), %s1046_s16, 2  ;;  %s1201_s27 = smov (!%p189_p2), 120  }
   0x6   : > { %192 = sbr.rel (%p189_p2) target bundleno = 2392 (0x958), region = 36  ;;  %s1202_s5 = smov (!%p189_p2), 112  }
   0x7   : > { %s1203_s6 = smov (!%p189_p2), 104   ;;  %s1204_s7 = smov (!%p189_p2), 8  }
   0x8   : > { %s1205_s8 = smov (!%p189_p2), 16   ;;  %s1206_s9 = smov (!%p189_p2), 24  }
   0xb   : > { %v1199_v0 = vmov 0.0   ;;  %vm1200_vm0 = vmmov 0   ;;  %s1388_s16 = smov (!%p223_p3, %s1046_s16), 2  ;;  %vm248_vm1 = vcmask 64512   ;;  %vm330_vm2 = vcmask 114688  }
   0xc   : > { %1103 = vmatprep.subr.mxu0 %v1199_v0  ;;  %1107 = vmatprep.mubr.msk.f32.mxu0 %vm1200_vm0, %v1199_v0  ;;  %s1077_s17 = sshll.u32 %s1388_s16, 4  ;;  %s225_s23 = scalar_lea.vmem %s1382_s0, %s1388_s16  ;;  %v420_v15 = vlaneseq  ;;  %vm346_vm3 = vcmask 1046528   ;;  %vm342_vm4 = vcmask 121856   ;;  %vm963_vm5 = vcmask 130048  }
   0xd   : > { %1110 = vmatprep.subr.mxu1 %v1199_v0  ;;  %1114 = vmatprep.mubr.msk.f32.mxu1 %vm1200_vm0, %v1199_v0  ;;  %s230_s20 = scalar_lea.vmem %s1383_s1, %s1077_s17  ;;  %v242_v3 = vld [vmem:[%s225_s23] sm:$0x1]  ;;  %s238_s26 = scalar_lea.vmem %s1385_s3, %s1388_s16  ;;  %vm965_vm6 = vcmask 195584   ;;  %vm967_vm7 = vcmask 253952  }
   0xe   : > { %v1254_v1 = vld [vmem:[%s230_s20 + $0x8] sm:$0x7f]  ;;  %v1259_v2 = vld [vmem:[%s230_s20] sm:$0xff]  ;;  %v421_v16 = vshrl.u32 %v420_v15, 7  ;;  %s235_s30 = scalar_lea.vmem %s1384_s2, %s1077_s17  ;;  %s241_s12 = scalar_lea.vmem %s1386_s4, %s1388_s16 }
   0xf   : > { %1104 = vmatpush3.xpose.msk.msra.mxu0 %vm248_vm1, %v1254_v1  ;;  %v1275_v5 = vld [vmem:[%s238_s26] sm:$0x1]  ;;  %428 = vrot.lane.b32.xlu1 %v1254_v1, %s1201_s27  ;;  %v1289_v17 = vld [vmem:[%s235_s30 + $0x8] sm:$0x7f] }
  0x10   : > { %1105 = vmatprep.subr.mxu0 %v1199_v0  ;;  %v1291_v18 = vld [vmem:[%s235_s30] sm:$0xff]  ;;  %1111 = vmatpush3.msk.msra.mxu1 %vm346_vm3, %v1289_v17  ;;  %v422_v19 = vsub.s32 0, %v421_v16 }
  0x11   : > { %1112 = vmatprep.subr.mxu1 %v1199_v0 }
  0x12   : > { %1113 = vmatpush3.msra.mxu1 %v1291_v18  ;;  %v1298_v20 = vrot.slane %v242_v3, %v422_v19 }
  0x13   : > { %1106 = vmatpush3.xpose.msk.msra.mxu0 %vm248_vm1, %v1259_v2  ;;  %426 = vrot.lane.b32.xlu1 %v1259_v2, %s1201_s27 }
  0x14   : > { %1124 = vmatprep.subr.mxu0 %v1199_v0  ;;  %1117 = vmatprep.subr.mxu1 %v1199_v0 }
  0x16   : > { %1108 = vmatmul.mubr.msk.f32.vlgmr.msra.gmra.mxu0 %vm248_vm1, %v242_v3 }
  0x17   : > { %1128 = vmatprep.mubr.msk.f32.mxu0 %vm1200_vm0, %v1199_v0 }
  0x81   : > { %v429_v22 = vpop.permute.xlu1 %428 }
  0x85   : > { %v427_v25 = vpop.permute.xlu1 %426 }
  0xd6   : > { %v324_v4 = vpop.f32.mrf.mxu0 }
  0xd7   : > { %v328_v6 = vmul.f32 0.35355338, %v324_v4 }
  0xd8   : > { %v1109_v7 = vpop.f32.mrf.mxu0 }
  0xd9   : > { %v329_v8 = vadd.f32 %v328_v6, %v1275_v5 }
  0xdb   : > { %v331_v9 = vsel %vm330_vm2, %v329_v8, -inf }
  0xdc   : > { %332 = vmax.xlane.f32.xlu0 %v331_v9 }
 0x165   : > { %v333_v10 = vpop.xlane.xlu0 %332 }
 0x166   : > { %v334_v11 = vsub.f32 %v329_v8, %v333_v10 }
 0x168   : > { %v335_v12 = vmul.f32 1.442695, %v334_v11 }
 0x16a   : > { %1175 = vpow2.f32 %v335_v12 }
 0x177   : > { %v1176_v13 = vpop.eup %1175 }
 0x178   : > { %v337_v14 = vsel %vm330_vm2, %v1176_v13, 0.0 }
 0x179   : > { %338 = vadd.xlane.f32.xlu0 %v337_v14 }
 0x18f   : > { %424 = vrot.lane.b32.xlu0 %v1298_v20, %s1201_s27 }
 0x202   : > { %v339_v21 = vpop.xlane.xlu0 %338 }
 0x203   : > { %1177 = vrcp.f32 %v339_v21 }
 0x206   : > { %v425_v26 = vpop.permute.xlu0 %424 }
 0x210   : > { %v1178_v23 = vpop.eup %1177 }
 0x211   : > { %v341_v24 = vmul.f32 %v1178_v23, %v1176_v13 }
 0x213   : > { %1115 = vmatmul.mubr.msk.f32.vlgmr.msra.gmra.mxu1 %vm342_vm4, %v341_v24 }
 0x214   : > { %1118 = vmatpush3.xpose.msk.msra.mxu1 %vm248_vm1, %v429_v22  ;;  %1121 = vmatprep.mubr.msk.f32.mxu1 %vm1200_vm0, %v1199_v0 }
 0x215   : > { %1119 = vmatprep.subr.mxu1 %v1199_v0 }
 0x218   : > { %1120 = vmatpush3.xpose.msk.msra.mxu1 %vm248_vm1, %v427_v25 }
 0x219   : > { %1138 = vmatprep.subr.mxu1 %v1199_v0 }
 0x21b   : > { %1122 = vmatmul.mubr.msk.f32.vlgmr.msra.gmra.mxu1 %vm248_vm1, %v425_v26 }
 0x21c   : > { %1142 = vmatprep.mubr.msk.f32.mxu1 %vm1200_vm0, %v1199_v0 }
 0x2d3   : > { %v1312_v27 = vpop.f32.mrf.mxu1 }
 0x2d5   : > { %v1116_v28 = vpop.f32.mrf.mxu1 }
 0x2db   : > { %v502_v29 = vpop.f32.mrf.mxu1 }
 0x2dc   : > { %v506_v30 = vmul.f32 0.35355338, %v502_v29 }
 0x2dd   : > { %v1123_v31 = vpop.f32.mrf.mxu1 }
 0x2de   : > { %v507_v32 = vadd.f32 %v506_v30, %v1275_v5 }
 0x2e0   : > { %v508_v33 = vsel %vm330_vm2, %v507_v32, -inf }
 0x2e1   : > { %509 = vmax.xlane.f32.xlu1 %v508_v33 }
 0x2f2   : > { %522 = vrot.lane.b32.xlu1 %v1289_v17, %s1201_s27 }
 0x2f6   : > { %604 = vrot.lane.b32.xlu1 %v1254_v1, %s1202_s5 }
 0x2fa   : > { %602 = vrot.lane.b32.xlu1 %v1259_v2, %s1202_s5 }
 0x2fe   : > { %600 = vrot.lane.b32.xlu1 %v1298_v20, %s1202_s5 }
 0x36a   : > { %v510_v34 = vpop.xlane.xlu1 %509 }
 0x36b   : > { %v511_v35 = vsub.f32 %v507_v32, %v510_v34 }
 0x36d   : > { %v512_v36 = vmul.f32 1.442695, %v511_v35 }
 0x36e   : > { %v523_v39 = vpop.permute.xlu1 %522 }
 0x36f   : > { %1179 = vpow2.f32 %v512_v36  ;;  %1125 = vmatpush3.msk.msra.mxu0 %vm346_vm3, %v523_v39 }
 0x370   : > { %1126 = vmatprep.subr.mxu0 %v1199_v0 }
 0x372   : > { %v605_v42 = vpop.permute.xlu1 %604 }
 0x376   : > { %v603_v45 = vpop.permute.xlu1 %602 }
 0x37a   : > { %v601_v46 = vpop.permute.xlu1 %600 }
 0x37c   : > { %v1180_v37 = vpop.eup %1179 }
 0x37d   : > { %v514_v38 = vsel %vm330_vm2, %v1180_v37, 0.0 }
 0x37e   : > { %515 = vadd.xlane.f32.xlu0 %v514_v38 }
 0x394   : > { %520 = vrot.lane.b32.xlu0 %v1291_v18, %s1201_s27 }
 0x407   : > { %v516_v40 = vpop.xlane.xlu0 %515 }
 0x408   : > { %1181 = vrcp.f32 %v516_v40 }
 0x40b   : > { %v521_v41 = vpop.permute.xlu0 %520 }
 0x40c   : > { %1127 = vmatpush3.msra.mxu0 %v521_v41 }
 0x40d   : > { %1131 = vmatprep.subr.mxu0 %v1199_v0 }
 0x415   : > { %v1182_v43 = vpop.eup %1181 }
 0x416   : > { %v518_v44 = vmul.f32 %v1182_v43, %v1180_v37 }
 0x418   : > { %1129 = vmatmul.mubr.msk.f32.vlgmr.msra.gmra.mxu0 %vm342_vm4, %v518_v44 }
 0x419   : > { %1132 = vmatpush3.xpose.msk.msra.mxu0 %vm248_vm1, %v605_v42  ;;  %1135 = vmatprep.mubr.msk.f32.mxu0 %vm1200_vm0, %v1199_v0 }
 0x41a   : > { %1133 = vmatprep.subr.mxu0 %v1199_v0 }
 0x41d   : > { %1134 = vmatpush3.xpose.msk.msra.mxu0 %vm248_vm1, %v603_v45 }
 0x41e   : > { %1152 = vmatprep.subr.mxu0 %v1199_v0 }
 0x420   : > { %1136 = vmatmul.mubr.msk.f32.vlgmr.msra.gmra.mxu0 %vm248_vm1, %v601_v46 }
 0x421   : > { %1156 = vmatprep.mubr.msk.f32.mxu0 %vm1200_vm0, %v1199_v0 }
 0x4d8   : > { %v596_v47 = vpop.f32.mrf.mxu0 }
 0x4da   : > { %v1130_v48 = vpop.f32.mrf.mxu0 }
 0x4e0   : > { %v678_v49 = vpop.f32.mrf.mxu0 }
 0x4e1   : > { %v682_v50 = vmul.f32 0.35355338, %v678_v49 }
 0x4e2   : > { %v1137_v51 = vpop.f32.mrf.mxu0 }
 0x4e3   : > { %v683_v52 = vadd.f32 %v682_v50, %v1275_v5 }
 0x4e5   : > { %v684_v53 = vsel %vm330_vm2, %v683_v52, -inf }
 0x4e6   : > { %685 = vmax.xlane.f32.xlu1 %v684_v53 }
 0x4f7   : > { %697 = vrot.lane.b32.xlu1 %v1289_v17, %s1202_s5 }
 0x4fb   : > { %779 = vrot.lane.b32.xlu1 %v1254_v1, %s1203_s6 }
 0x4ff   : > { %777 = vrot.lane.b32.xlu1 %v1259_v2, %s1203_s6 }
 0x503   : > { %775 = vrot.lane.b32.xlu1 %v1298_v20, %s1203_s6 }
 0x56f   : > { %v686_v54 = vpop.xlane.xlu1 %685 }
 0x570   : > { %v687_v55 = vsub.f32 %v683_v52, %v686_v54 }
 0x572   : > { %v688_v56 = vmul.f32 1.442695, %v687_v55 }
 0x573   : > { %v698_v59 = vpop.permute.xlu1 %697 }
 0x574   : > { %1183 = vpow2.f32 %v688_v56  ;;  %1139 = vmatpush3.msk.msra.mxu1 %vm346_vm3, %v698_v59 }
 0x575   : > { %1140 = vmatprep.subr.mxu1 %v1199_v0 }
 0x577   : > { %v780_v62 = vpop.permute.xlu1 %779 }
 0x57b   : > { %v778_v2 = vpop.permute.xlu1 %777 }
 0x57f   : > { %v776_v3 = vpop.permute.xlu1 %775 }
 0x581   : > { %v1184_v57 = vpop.eup %1183 }
 0x582   : > { %v690_v58 = vsel %vm330_vm2, %v1184_v57, 0.0 }
 0x583   : > { %691 = vadd.xlane.f32.xlu0 %v690_v58 }
 0x599   : > { %695 = vrot.lane.b32.xlu0 %v1291_v18, %s1202_s5 }
 0x60c   : > { %v692_v60 = vpop.xlane.xlu0 %691 }
 0x60d   : > { %1185 = vrcp.f32 %v692_v60 }
 0x610   : > { %v696_v61 = vpop.permute.xlu0 %695 }
 0x611   : > { %1141 = vmatpush3.msra.mxu1 %v696_v61 }
 0x612   : > { %1145 = vmatprep.subr.mxu1 %v1199_v0 }
 0x61a   : > { %v1186_v63 = vpop.eup %1185 }
 0x61b   : > { %v694_v1 = vmul.f32 %v1186_v63, %v1184_v57 }
 0x61d   : > { %1143 = vmatmul.mubr.msk.f32.vlgmr.msra.gmra.mxu1 %vm342_vm4, %v694_v1 }
 0x61e   : > { %1146 = vmatpush3.xpose.msk.msra.mxu1 %vm248_vm1, %v780_v62  ;;  %1149 = vmatprep.mubr.msk.f32.mxu1 %vm1200_vm0, %v1199_v0 }
 0x61f   : > { %1147 = vmatprep.subr.mxu1 %v1199_v0 }
 0x622   : > { %1148 = vmatpush3.xpose.msk.msra.mxu1 %vm248_vm1, %v778_v2 }
 0x625   : > { %1150 = vmatmul.mubr.msk.f32.vlgmr.msra.gmra.mxu1 %vm248_vm1, %v776_v3 }
 0x6dd   : > { %v771_v4 = vpop.f32.mrf.mxu1 }
 0x6df   : > { %v1144_v6 = vpop.f32.mrf.mxu1 }
 0x6e5   : > { %v853_v7 = vpop.f32.mrf.mxu1 }
 0x6e6   : > { %v857_v8 = vmul.f32 0.35355338, %v853_v7 }
 0x6e7   : > { %v1151_v9 = vpop.f32.mrf.mxu1 }
 0x6e8   : > { %v858_v10 = vadd.f32 %v857_v8, %v1275_v5 }
 0x6ea   : > { %v859_v11 = vsel %vm330_vm2, %v858_v10, -inf }
 0x6eb   : > { %860 = vmax.xlane.f32.xlu0 %v859_v11 }
 0x701   : > { %872 = vrot.lane.b32.xlu0 %v1289_v17, %s1203_s6 }
 0x705   : > { %951 = vrot.lane.b32.xlu0 %v596_v47, %s1204_s7 }
 0x774   : > { %v861_v12 = vpop.xlane.xlu0 %860 }
 0x775   : > { %v862_v13 = vsub.f32 %v858_v10, %v861_v12 }
 0x777   : > { %v863_v14 = vmul.f32 1.442695, %v862_v13 }
 0x778   : > { %v873_v15 = vpop.permute.xlu0 %872 }
 0x779   : > { %1187 = vpow2.f32 %v863_v14  ;;  %1153 = vmatpush3.msk.msra.mxu0 %vm346_vm3, %v873_v15 }
 0x77a   : > { %1154 = vmatprep.subr.mxu0 %v1199_v0 }
 0x77c   : > { %v952_v23 = vpop.permute.xlu0 %951 }
 0x786   : > { %v1188_v16 = vpop.eup %1187 }
 0x787   : > { %v865_v5 = vsel %vm330_vm2, %v1188_v16, 0.0 }
 0x788   : > { %866 = vadd.xlane.f32.xlu1 %v865_v5 }
 0x799   : > { %870 = vrot.lane.b32.xlu1 %v1291_v18, %s1203_s6  ;;  %v962_v18 = vsel %vm248_vm1, %v1312_v27, %v952_v23 }
 0x79d   : > { %955 = vrot.lane.b32.xlu1 %v771_v4, %s1205_s8 }
 0x811   : > { %v867_v17 = vpop.xlane.xlu1 %866 }
 0x812   : > { %1189 = vrcp.f32 %v867_v17 }
 0x815   : > { %v871_v19 = vpop.permute.xlu1 %870 }
 0x816   : > { %1155 = vmatpush3.msra.mxu0 %v871_v19 }
 0x819   : > { %v956_v24 = vpop.permute.xlu1 %955 }
 0x81a   : > { %v964_v25 = vsel %vm963_vm5, %v962_v18, %v956_v24 }
 0x81f   : > { %v1190_v20 = vpop.eup %1189 }
 0x820   : > { %v869_v21 = vmul.f32 %v1190_v20, %v1188_v16 }
 0x822   : > { %1157 = vmatmul.mubr.msk.f32.vlgmr.msra.gmra.mxu0 %vm342_vm4, %v869_v21 }
 0x8e2   : > { %v946_v22 = vpop.f32.mrf.mxu0 }
 0x8e3   : > { %959 = vrot.lane.b32.xlu0 %v946_v22, %s1206_s9 }
 0x8e4   : > { %v1158_v0 = vpop.f32.mrf.mxu0 }
 0x955   : > { %v960_v26 = vpop.permute.xlu0 %959 }
 0x956   : > { %v966_v28 = vsel %vm965_vm6, %v964_v25, %v960_v26 }
 0x957   : > { %968 = vst.msk [vmem:[%s241_s12] sm:$0x1] %vm967_vm7, %v966_v28 }
 0x958 PF: > { %s14_s15 = sadd.s32 1, %s1197_s15  }
 0x959   : > { %p11_p4 = scmp.ge.s32.totalorder %s14_s15, 5  }
 0x95b   :  { %13 = sbr.rel (!%p11_p4) target bundleno = 1 (0x1), region = 75 }

// kernel: _device_forward.41
= control target key start
LH: loop header
LB: loop body
LE: loop exit
PB: predicated region body
PF: predicated region fallthrough
CT: control target
= control target key end

     0   :  { %v126_v0 = vmov 0.0   ;;  %vm127_vm0 = vmmov 0   ;;  %vm26_vm1 = vcmask 261120   ;;  %vm100_vm2 = vcmask 780288   ;;  %s169_s1 = inlined_call_operand.vmem [shape: f32[32,96], index: 1, kind: input, shape index: {}]   ;;  %s170_s0 = inlined_call_operand.vmem [shape: f32[3,32], index: 0, kind: input, shape index: {}]   ;;  %s171_s2 = inlined_call_operand.vmem [shape: f32[1,96], index: 2, kind: input, shape index: {}]   ;;  %s172_s3 = inlined_call_operand.vmem [shape: f32[3,96], index: 3, kind: output, shape index: {}]  }
   0x1   :  { %113 = vmatprep.subr.mxu0 %v126_v0  ;;  %v18_v1 = vld [vmem:[%s169_s1 + $0x18] sm:$0xff]  ;;  %v17_v2 = vld [vmem:[%s169_s1 + $0x10] sm:$0xff]  ;;  %121 = vmatprep.mubr.msk.f32.mxu0 %vm127_vm0, %v126_v0  ;;  %v16_v3 = vld [vmem:[%s169_s1 + $0x8] sm:$0xff] }
   0x2   :  { %114 = vmatpush3.msra.mxu0 %v18_v1  ;;  %v15_v4 = vld [vmem:[%s169_s1] sm:$0xff] }
   0x3   :  { %115 = vmatprep.subr.mxu0 %v126_v0  ;;  %v14_v5 = vld [vmem:[%s170_s0] sm:$0x7] }
   0x4   :  { %116 = vmatpush3.msra.mxu0 %v17_v2  ;;  %v106_v6 = vld [vmem:[%s171_s2] ss:$0 sm:$0xff] }
   0x5   :  { %117 = vmatprep.subr.mxu0 %v126_v0 }
   0x6   :  { %118 = vmatpush3.msra.mxu0 %v16_v3 }
   0x7   :  { %119 = vmatprep.subr.mxu0 %v126_v0 }
   0x8   :  { %120 = vmatpush3.msra.mxu0 %v15_v4 }
   0x9   :  { %122 = vmatmul.mubr.msk.f32.vlgmr.msra.gmra.mxu0 %vm26_vm1, %v14_v5 }
  0xc9   :  { %v96_v7 = vpop.f32.mrf.mxu0 }
  0xca   :  { %v97_v8 = vadd.f32 %v106_v6, %v96_v7 }
  0xcb   :  { %v123_v9 = vpop.f32.mrf.mxu0 }
  0xcc   :  { %101 = vst.msk [vmem:[%s172_s3] sm:$0x7] %vm100_vm2, %v97_v8 }

// kernel: _device_forward.43
= control target key start
LH: loop header
LB: loop body
LE: loop exit
PB: predicated region body
PF: predicated region fallthrough
CT: control target
= control target key end

     0   :  { %v171_v0 = vmov 0.0   ;;  %vm172_vm0 = vmmov 0   ;;  %vm35_vm1 = vcmask 261120   ;;  %vm111_vm2 = vcmask 256000   ;;  %s241_s2 = inlined_call_operand.vmem [shape: f32[32,32], index: 2, kind: input, shape index: {}]   ;;  %s242_s0 = inlined_call_operand.vmem [shape: f32[3,32], index: 0, kind: input, shape index: {}]   ;;  %s243_s3 = inlined_call_operand.vmem [shape: f32[1,32], index: 3, kind: input, shape index: {}]   ;;  %s244_s1 = inlined_call_operand.vmem [shape: f32[3,32], index: 1, kind: input, shape index: {}]   ;;  %s245_s4 = inlined_call_operand.vmem [shape: f32[1,32], index: 4, kind: input, shape index: {}]   ;;  %s246_s5 = inlined_call_operand.vmem [shape: f32[1,32], index: 5, kind: input, shape index: {}]   ;;  %s247_s6 = inlined_call_operand.vmem [shape: f32[3,32], index: 6, kind: output, shape index: {}]  }
   0x1   :  { %156 = vmatprep.subr.mxu0 %v171_v0  ;;  %v27_v1 = vld [vmem:[%s241_s2 + $0x18] sm:$0xff]  ;;  %v26_v2 = vld [vmem:[%s241_s2 + $0x10] sm:$0xff]  ;;  %164 = vmatprep.mubr.msk.f32.mxu0 %vm172_vm0, %v171_v0  ;;  %v25_v3 = vld [vmem:[%s241_s2 + $0x8] sm:$0xff] }
   0x2   :  { %157 = vmatpush3.msra.mxu0 %v27_v1  ;;  %v24_v4 = vld [vmem:[%s241_s2] sm:$0xff] }
   0x3   :  { %158 = vmatprep.subr.mxu0 %v171_v0  ;;  %v23_v5 = vld [vmem:[%s242_s0] sm:$0x7] }
   0x4   :  { %159 = vmatpush3.msra.mxu0 %v26_v2  ;;  %v147_v6 = vld [vmem:[%s243_s3] ss:$0 sm:$0xff] }
   0x5   :  { %160 = vmatprep.subr.mxu0 %v171_v0  ;;  %v109_v8 = vld [vmem:[%s244_s1] sm:$0x7] }
   0x6   :  { %161 = vmatpush3.msra.mxu0 %v25_v3  ;;  %v149_v22 = vld [vmem:[%s245_s4] ss:$0 sm:$0xff] }
   0x7   :  { %162 = vmatprep.subr.mxu0 %v171_v0  ;;  %v150_v24 = vld [vmem:[%s246_s5] ss:$0 sm:$0xff] }
   0x8   :  { %163 = vmatpush3.msra.mxu0 %v24_v4 }
   0x9   :  { %165 = vmatmul.mubr.msk.f32.vlgmr.msra.gmra.mxu0 %vm35_vm1, %v23_v5 }
  0xc9   :  { %v105_v7 = vpop.f32.mrf.mxu0 }
  0xca   :  { %v106_v9 = vadd.f32 %v147_v6, %v105_v7 }
  0xcb   :  { %v166_v10 = vpop.f32.mrf.mxu0 }
  0xcc   :  { %v110_v11 = vadd.f32 %v109_v8, %v106_v9 }
  0xce   :  { %v112_v12 = vsel %vm111_vm2, %v110_v11, 0.0 }
  0xcf   :  { %113 = vadd.xlane.f32.xlu0 %v112_v12 }
 0x158   :  { %v114_v13 = vpop.xlane.xlu0 %113 }
 0x159   :  { %v116_v14 = vmul.f32 0.03125, %v114_v13 }
 0x15b   :  { %v117_v15 = vsub.f32 %v110_v11, %v116_v14 }
 0x15d   :  { %v118_v16 = vmul.f32 %v117_v15, %v117_v15 }
 0x15f   :  { %v119_v17 = vsel %vm111_vm2, %v118_v16, 0.0 }
 0x160   :  { %120 = vadd.xlane.f32.xlu0 %v119_v17 }
 0x1e9   :  { %v121_v18 = vpop.xlane.xlu0 %120 }
 0x1ea   :  { %v122_v19 = vmul.f32 0.03125, %v121_v18 }
 0x1ec   :  { %v123_v20 = vadd.f32 1e-05, %v122_v19 }
 0x1ee   :  { %169 = vrsqrt.f32 %v123_v20 }
 0x1fb   :  { %v170_v21 = vpop.eup %169 }
 0x1fc   :  { %v125_v23 = vmul.f32 %v170_v21, %v117_v15 }
 0x1fe   :  { %v133_v25 = vmul.f32 %v149_v22, %v125_v23 }
 0x200   :  { %v141_v26 = vadd.f32 %v150_v24, %v133_v25 }
 0x202   :  { %142 = vst.msk [vmem:[%s247_s6] sm:$0x7] %vm111_vm2, %v141_v26 }

// kernel: _device_forward.44
= control target key start
LH: loop header
LB: loop body
LE: loop exit
PB: predicated region body
PF: predicated region fallthrough
CT: control target
= control target key end

     0   :  { %v320_v0 = vmov 0.0   ;;  %vm321_vm0 = vmmov 0   ;;  %vm38_vm1 = vcmask 261120   ;;  %vm207_vm2 = vcmask 256000   ;;  %s467_s1 = inlined_call_operand.vmem [shape: f32[32,128], index: 1, kind: input, shape index: {}]   ;;  %s468_s3 = inlined_call_operand.vmem [shape: f32[128,32], index: 3, kind: input, shape index: {}]   ;;  %s469_s0 = inlined_call_operand.vmem [shape: f32[3,32], index: 0, kind: input, shape index: {}]   ;;  %s470_s2 = inlined_call_operand.vmem [shape: f32[1,128], index: 2, kind: input, shape index: {}]   ;;  %s471_s4 = inlined_call_operand.vmem [shape: f32[1,32], index: 4, kind: input, shape index: {}]   ;;  %s472_s5 = inlined_call_operand.vmem [shape: f32[1,32], index: 5, kind: input, shape index: {}]   ;;  %s473_s6 = inlined_call_operand.vmem [shape: f32[1,32], index: 6, kind: input, shape index: {}]   ;;  %s474_s7 = inlined_call_operand.vmem [shape: f32[3,32], index: 7, kind: output, shape index: {}]  }
   0x1   :  { %270 = vmatprep.subr.mxu0 %v320_v0  ;;  %v30_v1 = vld [vmem:[%s467_s1 + $0x18] sm:$0xff]  ;;  %v29_v2 = vld [vmem:[%s467_s1 + $0x10] sm:$0xff]  ;;  %278 = vmatprep.mubr.msk.f32.mxu0 %vm321_vm0, %v320_v0  ;;  %v28_v4 = vld [vmem:[%s467_s1 + $0x8] sm:$0xff] }
   0x2   :  { %271 = vmatpush3.msra.mxu0 %v30_v1  ;;  %281 = vmatprep.subr.mxu1 %v320_v0  ;;  %v128_v3 = vld [vmem:[%s468_s3 + $0x78] sm:$0xff]  ;;  %v127_v5 = vld [vmem:[%s468_s3 + $0x70] sm:$0xff]  ;;  %v126_v6 = vld [vmem:[%s468_s3 + $0x68] sm:$0xff] }
   0x3   :  { %272 = vmatprep.subr.mxu0 %v320_v0  ;;  %282 = vmatpush3.msra.mxu1 %v128_v3  ;;  %v27_v7 = vld [vmem:[%s467_s1] sm:$0xff]  ;;  %v124_v10 = vld [vmem:[%s468_s3 + $0x58] sm:$0xff]  ;;  %v123_v11 = vld [vmem:[%s468_s3 + $0x50] sm:$0xff] }
   0x4   :  { %273 = vmatpush3.msra.mxu0 %v29_v2  ;;  %283 = vmatprep.subr.mxu1 %v320_v0  ;;  %v26_v8 = vld [vmem:[%s469_s0] sm:$0x7]  ;;  %v122_v12 = vld [vmem:[%s468_s3 + $0x48] sm:$0xff]  ;;  %v120_v14 = vld [vmem:[%s468_s3 + $0x38] sm:$0xff] }
   0x5   :  { %274 = vmatprep.subr.mxu0 %v320_v0  ;;  %284 = vmatpush3.msra.mxu1 %v127_v5  ;;  %v125_v9 = vld [vmem:[%s468_s3 + $0x60] sm:$0xff]  ;;  %v119_v15 = vld [vmem:[%s468_s3 + $0x30] sm:$0xff]  ;;  %v118_v16 = vld [vmem:[%s468_s3 + $0x28] sm:$0xff] }
   0x6   :  { %275 = vmatpush3.msra.mxu0 %v28_v4  ;;  %285 = vmatprep.subr.mxu1 %v320_v0  ;;  %v121_v13 = vld [vmem:[%s468_s3 + $0x40] sm:$0xff]  ;;  %v116_v18 = vld [vmem:[%s468_s3 + $0x18] sm:$0xff]  ;;  %v115_v19 = vld [vmem:[%s468_s3 + $0x10] sm:$0xff] }
   0x7   :  { %276 = vmatprep.subr.mxu0 %v320_v0  ;;  %286 = vmatpush3.msra.mxu1 %v126_v6  ;;  %v117_v17 = vld [vmem:[%s468_s3 + $0x20] sm:$0xff]  ;;  %v114_v20 = vld [vmem:[%s468_s3 + $0x8] sm:$0xff] }
   0x8   :  { %277 = vmatpush3.msra.mxu0 %v27_v7  ;;  %287 = vmatprep.subr.mxu1 %v320_v0  ;;  %v113_v21 = vld [vmem:[%s468_s3] sm:$0xff] }
   0x9   :  { %279 = vmatmul.mubr.msk.f32.vlgmr.msra.gmra.mxu0 %vm38_vm1, %v26_v8  ;;  %288 = vmatpush3.msra.mxu1 %v125_v9  ;;  %v243_v22 = vld [vmem:[%s470_s2] ss:$0 sm:$0xff] }
   0xa   :  { %289 = vmatprep.subr.mxu1 %v320_v0  ;;  %313 = vmatprep.mubr.msk.f32.mxu1 %vm321_vm0, %v320_v0  ;;  %v245_v27 = vld [vmem:[%s471_s4] ss:$0 sm:$0xff] }
   0xb   :  { %290 = vmatpush3.msra.mxu1 %v124_v10  ;;  %v246_v42 = vld [vmem:[%s472_s5] ss:$0 sm:$0xff] }
   0xc   :  { %291 = vmatprep.subr.mxu1 %v320_v0  ;;  %v247_v44 = vld [vmem:[%s473_s6] ss:$0 sm:$0xff] }
   0xd   :  { %292 = vmatpush3.msra.mxu1 %v123_v11 }
   0xe   :  { %293 = vmatprep.subr.mxu1 %v320_v0 }
   0xf   :  { %294 = vmatpush3.msra.mxu1 %v122_v12 }
  0x10   :  { %295 = vmatprep.subr.mxu1 %v320_v0 }
  0x11   :  { %296 = vmatpush3.msra.mxu1 %v121_v13 }
  0x12   :  { %297 = vmatprep.subr.mxu1 %v320_v0 }
  0x13   :  { %298 = vmatpush3.msra.mxu1 %v120_v14 }
  0x14   :  { %299 = vmatprep.subr.mxu1 %v320_v0 }
  0x15   :  { %300 = vmatpush3.msra.mxu1 %v119_v15 }
  0x16   :  { %301 = vmatprep.subr.mxu1 %v320_v0 }
  0x17   :  { %302 = vmatpush3.msra.mxu1 %v118_v16 }
  0x18   :  { %303 = vmatprep.subr.mxu1 %v320_v0 }
  0x19   :  { %304 = vmatpush3.msra.mxu1 %v117_v17 }
  0x1a   :  { %305 = vmatprep.subr.mxu1 %v320_v0 }
  0x1b   :  { %306 = vmatpush3.msra.mxu1 %v116_v18 }
  0x1c   :  { %307 = vmatprep.subr.mxu1 %v320_v0 }
  0x1d   :  { %308 = vmatpush3.msra.mxu1 %v115_v19 }
  0x1e   :  { %309 = vmatprep.subr.mxu1 %v320_v0 }
  0x1f   :  { %310 = vmatpush3.msra.mxu1 %v114_v20 }
  0x20   :  { %311 = vmatprep.subr.mxu1 %v320_v0 }
  0x21   :  { %312 = vmatpush3.msra.mxu1 %v113_v21 }
  0xc9   :  { %v108_v23 = vpop.f32.mrf.mxu0 }
  0xca   :  { %v109_v24 = vadd.f32 %v243_v22, %v108_v23 }
  0xcb   :  { %v280_v25 = vpop.f32.mrf.mxu0 }
  0xcc   :  { %v112_v26 = vmax.f32 %v109_v24, 0.0 }
  0xce   :  { %314 = vmatmul.mubr.f32.vlgmr.msra.gmra.mxu1 %v112_v26 }
 0x18e   :  { %v202_v28 = vpop.f32.mrf.mxu1 }
 0x18f   :  { %v203_v29 = vadd.f32 %v245_v27, %v202_v28 }
 0x190   :  { %v315_v30 = vpop.f32.mrf.mxu1 }
 0x191   :  { %v206_v31 = vadd.f32 %v203_v29, %v26_v8 }
 0x193   :  { %v208_v32 = vsel %vm207_vm2, %v206_v31, 0.0 }
 0x194   :  { %209 = vadd.xlane.f32.xlu0 %v208_v32 }
 0x21d   :  { %v210_v33 = vpop.xlane.xlu0 %209 }
 0x21e   :  { %v212_v34 = vmul.f32 0.03125, %v210_v33 }
 0x220   :  { %v213_v35 = vsub.f32 %v206_v31, %v212_v34 }
 0x222   :  { %v214_v36 = vmul.f32 %v213_v35, %v213_v35 }
 0x224   :  { %v215_v37 = vsel %vm207_vm2, %v214_v36, 0.0 }
 0x225   :  { %216 = vadd.xlane.f32.xlu0 %v215_v37 }
 0x2ae   :  { %v217_v38 = vpop.xlane.xlu0 %216 }
 0x2af   :  { %v218_v39 = vmul.f32 0.03125, %v217_v38 }
 0x2b1   :  { %v219_v40 = vadd.f32 1e-05, %v218_v39 }
 0x2b3   :  { %318 = vrsqrt.f32 %v219_v40 }
 0x2c0   :  { %v319_v41 = vpop.eup %318 }
 0x2c1   :  { %v221_v43 = vmul.f32 %v319_v41, %v213_v35 }
 0x2c3   :  { %v229_v45 = vmul.f32 %v246_v42, %v221_v43 }
 0x2c5   :  { %v237_v46 = vadd.f32 %v247_v44, %v229_v45 }
 0x2c7   :  { %238 = vst.msk [vmem:[%s474_s7] sm:$0x7] %vm207_vm2, %v237_v46 }

// kernel: _device_forward.42
= control target key start
LH: loop header
LB: loop body
LE: loop exit
PB: predicated region body
PF: predicated region fallthrough
CT: control target
= control target key end

     0   :  { %vm21_vm0 = vcmask 31744   ;;  %v1605_v0 = vmov 0.0   ;;  %vm1606_vm1 = vmmov 0   ;;  %vm100_vm2 = vcmask 18432   ;;  %s1608_s20 = smov 120   ;;  %s1609_s21 = smov 116   ;;  %s1810_s1 = inlined_call_operand.vmem [shape: f32[1,3,32], index: 1, kind: input, shape index: {}]   ;;  %s1811_s0 = inlined_call_operand.vmem [shape: f32[1,3,32], index: 0, kind: input, shape index: {}]   ;;  %s1812_s3 = inlined_call_operand.vmem [shape: f32[1,3,3], index: 3, kind: input, shape index: {}]   ;;  %s1813_s2 = inlined_call_operand.vmem [shape: f32[1,3,32], index: 2, kind: input, shape index: {}]   ;;  %s1814_s4 = inlined_call_operand.vmem [shape: f32[1,3,32], index: 4, kind: output, shape index: {}]  }
   0x1   :  { %1477 = vmatprep.subr.mxu0 %v1605_v0  ;;  %v18_v1 = vld [vmem:[%s1810_s1] sm:$0x7]  ;;  %1479 = vmatprep.mubr.msk.f32.mxu0 %vm1606_vm1, %v1605_v0  ;;  %s1611_s22 = smov 108   ;;  %s1612_s23 = smov 104   ;;  %vm116_vm3 = vcmask 1042432   ;;  %vm112_vm4 = vcmask 23552  }
   0x2   :  { %1478 = vmatpush3.xpose.msk.msra.mxu0 %vm21_vm0, %v18_v1  ;;  %v17_v2 = vld [vmem:[%s1811_s0] sm:$0x7]  ;;  %1482 = vmatprep.subr.mxu1 %v1605_v0  ;;  %s1607_s0 = smov 124   ;;  %s1613_s24 = smov 100   ;;  %vm1395_vm5 = vcmask 64512   ;;  %vm1397_vm6 = vcmask 97280  }
   0x3   :  { %1484 = vmatprep.mubr.msk.f32.mxu1 %vm1606_vm1, %v1605_v0  ;;  %1492 = vmatprep.subr.mxu0 %v1605_v0  ;;  %v1666_v4 = vld [vmem:[%s1812_s3] sm:$0x7]  ;;  %s1610_s3 = smov 112   ;;  %s1615_s27 = smov 8   ;;  %vm1399_vm7 = vcmask 130048   ;;  %vm1401_vm8 = vcmask 162816  }
   0x4   :  { %192 = vrot.lane.b32.xlu1 %v18_v1, %s1607_s0  ;;  %v1684_v14 = vld [vmem:[%s1813_s2] sm:$0x7]  ;;  %s1614_s2 = smov 4   ;;  %s1616_s28 = smov 12   ;;  %vm1403_vm9 = vcmask 195584   ;;  %vm1405_vm10 = vcmask 228352  }
   0x5   :  { %1480 = vmatmul.mubr.msk.f32.vlgmr.msra.gmra.mxu0 %vm21_vm0, %v17_v2  ;;  %1483 = vmatpush3.msk.msra.mxu1 %vm116_vm3, %v1684_v14  ;;  %s1617_s29 = smov 16   ;;  %s1618_s30 = smov 20   ;;  %vm1407_vm11 = vcmask 256000  }
   0x6   :  { %1494 = vmatprep.mubr.msk.f32.mxu0 %vm1606_vm1, %v1605_v0  ;;  %1487 = vmatprep.subr.mxu1 %v1605_v0  ;;  %s1619_s5 = smov 24   ;;  %s1620_s6 = smov 28  }
   0x8   :  { %190 = vrot.lane.b32.xlu1 %v17_v2, %s1607_s0 }
   0xc   :  { %358 = vrot.lane.b32.xlu1 %v17_v2, %s1608_s20 }
  0x10   :  { %528 = vrot.lane.b32.xlu1 %v18_v1, %s1609_s21 }
  0x14   :  { %526 = vrot.lane.b32.xlu1 %v17_v2, %s1609_s21 }
  0x18   :  { %696 = vrot.lane.b32.xlu1 %v18_v1, %s1610_s3 }
  0x1c   :  { %694 = vrot.lane.b32.xlu1 %v17_v2, %s1610_s3 }
  0x20   :  { %864 = vrot.lane.b32.xlu1 %v18_v1, %s1611_s22 }
  0x24   :  { %1032 = vrot.lane.b32.xlu1 %v18_v1, %s1612_s23 }
  0x28   :  { %1200 = vrot.lane.b32.xlu1 %v18_v1, %s1613_s24 }
  0x76   :  { %v193_v15 = vpop.permute.xlu1 %192 }
  0x7a   :  { %v191_v16 = vpop.permute.xlu1 %190 }
  0x7e   :  { %v359_v17 = vpop.permute.xlu1 %358 }
  0x82   :  { %v529_v19 = vpop.permute.xlu1 %528 }
  0x86   :  { %v527_v20 = vpop.permute.xlu1 %526 }
  0x8a   :  { %v697_v23 = vpop.permute.xlu1 %696 }
  0x8e   :  { %v695_v25 = vpop.permute.xlu1 %694 }
  0x92   :  { %v865_v26 = vpop.permute.xlu1 %864 }
  0x96   :  { %v1033_v28 = vpop.permute.xlu1 %1032 }
  0x9a   :  { %v1201_v30 = vpop.permute.xlu1 %1200 }
  0xc5   :  { %v94_v3 = vpop.f32.mrf.mxu0 }
  0xc6   :  { %v98_v5 = vmul.f32 0.5, %v94_v3 }
  0xc7   :  { %v1481_v6 = vpop.f32.mrf.mxu0 }
  0xc8   :  { %v99_v7 = vadd.f32 %v98_v5, %v1666_v4 }
  0xca   :  { %v101_v8 = vsel %vm100_vm2, %v99_v7, -inf }
  0xcb   :  { %102 = vmax.xlane.f32.xlu0 %v101_v8 }
 0x154   :  { %v103_v9 = vpop.xlane.xlu0 %102 }
 0x155   :  { %v104_v10 = vsub.f32 %v99_v7, %v103_v9 }
 0x157   :  { %v105_v11 = vmul.f32 1.442695, %v104_v10 }
 0x159   :  { %1573 = vpow2.f32 %v105_v11 }
 0x166   :  { %v1574_v12 = vpop.eup %1573 }
 0x167   :  { %v107_v13 = vsel %vm100_vm2, %v1574_v12, 0.0 }
 0x168   :  { %108 = vadd.xlane.f32.xlu0 %v107_v13 }
 0x17e   :  { %360 = vrot.lane.b32.xlu0 %v18_v1, %s1608_s20 }
 0x182   :  { %862 = vrot.lane.b32.xlu0 %v17_v2, %s1611_s22 }
 0x186   :  { %1030 = vrot.lane.b32.xlu0 %v17_v2, %s1612_s23 }
 0x18a   :  { %1198 = vrot.lane.b32.xlu0 %v17_v2, %s1613_s24 }
 0x1f1   :  { %v109_v18 = vpop.xlane.xlu0 %108 }
 0x1f2   :  { %1575 = vrcp.f32 %v109_v18 }
 0x1f5   :  { %v361_v24 = vpop.permute.xlu0 %360 }
 0x1f9   :  { %v863_v27 = vpop.permute.xlu0 %862 }
 0x1fd   :  { %v1031_v29 = vpop.permute.xlu0 %1030 }
 0x1ff   :  { %v1576_v21 = vpop.eup %1575 }
 0x200   :  { %v111_v22 = vmul.f32 %v1576_v21, %v1574_v12 }
 0x201   :  { %v1199_v31 = vpop.permute.xlu0 %1198 }
 0x202   :  { %1485 = vmatmul.mubr.msk.f32.vlgmr.msra.gmra.mxu1 %vm112_vm4, %v111_v22 }
 0x203   :  { %1488 = vmatpush3.xpose.msk.msra.mxu1 %vm21_vm0, %v193_v15  ;;  %1489 = vmatprep.mubr.msk.f32.mxu1 %vm1606_vm1, %v1605_v0 }
 0x204   :  { %1497 = vmatprep.subr.mxu1 %v1605_v0 }
 0x206   :  { %1490 = vmatmul.mubr.msk.f32.vlgmr.msra.gmra.mxu1 %vm21_vm0, %v191_v16 }
 0x207   :  { %1498 = vmatpush3.xpose.msk.msra.mxu1 %vm21_vm0, %v361_v24  ;;  %1499 = vmatprep.mubr.msk.f32.mxu1 %vm1606_vm1, %v1605_v0 }
 0x208   :  { %1507 = vmatprep.subr.mxu1 %v1605_v0 }
 0x20a   :  { %1500 = vmatmul.mubr.msk.f32.vlgmr.msra.gmra.mxu1 %vm21_vm0, %v359_v17 }
 0x20b   :  { %1508 = vmatpush3.xpose.msk.msra.mxu1 %vm21_vm0, %v529_v19  ;;  %1509 = vmatprep.mubr.msk.f32.mxu1 %vm1606_vm1, %v1605_v0 }
 0x20c   :  { %1517 = vmatprep.subr.mxu1 %v1605_v0 }
 0x20e   :  { %1510 = vmatmul.mubr.msk.f32.vlgmr.msra.gmra.mxu1 %vm21_vm0, %v527_v20 }
 0x20f   :  { %1518 = vmatpush3.xpose.msk.msra.mxu1 %vm21_vm0, %v697_v23  ;;  %1519 = vmatprep.mubr.msk.f32.mxu1 %vm1606_vm1, %v1605_v0 }
 0x210   :  { %1527 = vmatprep.subr.mxu1 %v1605_v0 }
 0x212   :  { %1520 = vmatmul.mubr.msk.f32.vlgmr.msra.gmra.mxu1 %vm21_vm0, %v695_v25 }
 0x213   :  { %1528 = vmatpush3.xpose.msk.msra.mxu1 %vm21_vm0, %v865_v26  ;;  %1529 = vmatprep.mubr.msk.f32.mxu1 %vm1606_vm1, %v1605_v0 }
 0x214   :  { %1537 = vmatprep.subr.mxu1 %v1605_v0 }
 0x216   :  { %1530 = vmatmul.mubr.msk.f32.vlgmr.msra.gmra.mxu1 %vm21_vm0, %v863_v27 }
 0x217   :  { %1538 = vmatpush3.xpose.msk.msra.mxu1 %vm21_vm0, %v1033_v28  ;;  %1539 = vmatprep.mubr.msk.f32.mxu1 %vm1606_vm1, %v1605_v0 }
 0x218   :  { %1547 = vmatprep.subr.mxu1 %v1605_v0 }
 0x21a   :  { %1540 = vmatmul.mubr.msk.f32.vlgmr.msra.gmra.mxu1 %vm21_vm0, %v1031_v29 }
 0x21b   :  { %1548 = vmatpush3.xpose.msk.msra.mxu1 %vm21_vm0, %v1201_v30  ;;  %1549 = vmatprep.mubr.msk.f32.mxu1 %vm1606_vm1, %v1605_v0 }
 0x21e   :  { %1550 = vmatmul.mubr.msk.f32.vlgmr.msra.gmra.mxu1 %vm21_vm0, %v1199_v31 }
 0x2c2   :  { %v1728_v32 = vpop.f32.mrf.mxu1 }
 0x2c4   :  { %v1486_v33 = vpop.f32.mrf.mxu1 }
 0x2c6   :  { %v264_v34 = vpop.f32.mrf.mxu1 }
 0x2c7   :  { %v268_v35 = vmul.f32 0.5, %v264_v34 }
 0x2c8   :  { %v1491_v36 = vpop.f32.mrf.mxu1 }
 0x2c9   :  { %v269_v37 = vadd.f32 %v268_v35, %v1666_v4 }
 0x2ca   :  { %v432_v38 = vpop.f32.mrf.mxu1 }
 0x2cb   :  { %v436_v39 = vmul.f32 0.5, %v432_v38  ;;  %v270_v40 = vsel %vm100_vm2, %v269_v37, -inf }
 0x2cc   :  { %271 = vmax.xlane.f32.xlu1 %v270_v40  ;;  %v1501_v41 = vpop.f32.mrf.mxu1 }
 0x2cd   :  { %v437_v42 = vadd.f32 %v436_v39, %v1666_v4 }
 0x2ce   :  { %v600_v43 = vpop.f32.mrf.mxu1 }
 0x2cf   :  { %v604_v44 = vmul.f32 0.5, %v600_v43  ;;  %v438_v45 = vsel %vm100_vm2, %v437_v42, -inf }
 0x2d0   :  { %439 = vmax.xlane.f32.xlu0 %v438_v45  ;;  %v1511_v46 = vpop.f32.mrf.mxu1 }
 0x2d1   :  { %v605_v47 = vadd.f32 %v604_v44, %v1666_v4 }
 0x2d2   :  { %v768_v48 = vpop.f32.mrf.mxu1 }
 0x2d3   :  { %v772_v49 = vmul.f32 0.5, %v768_v48  ;;  %v606_v50 = vsel %vm100_vm2, %v605_v47, -inf }
 0x2d4   :  { %607 = vmax.xlane.f32.xlu0 %v606_v50  ;;  %v1521_v51 = vpop.f32.mrf.mxu1 }
 0x2d5   :  { %v773_v52 = vadd.f32 %v772_v49, %v1666_v4 }
 0x2d6   :  { %v936_v53 = vpop.f32.mrf.mxu1 }
 0x2d7   :  { %v940_v54 = vmul.f32 0.5, %v936_v53  ;;  %v774_v55 = vsel %vm100_vm2, %v773_v52, -inf }
 0x2d8   :  { %775 = vmax.xlane.f32.xlu1 %v774_v55  ;;  %v1531_v56 = vpop.f32.mrf.mxu1 }
 0x2d9   :  { %v941_v57 = vadd.f32 %v940_v54, %v1666_v4 }
 0x2da   :  { %v1104_v58 = vpop.f32.mrf.mxu1 }
 0x2db   :  { %v1108_v59 = vmul.f32 0.5, %v1104_v58  ;;  %v942_v60 = vsel %vm100_vm2, %v941_v57, -inf }
 0x2dc   :  { %943 = vmax.xlane.f32.xlu0 %v942_v60  ;;  %v1541_v61 = vpop.f32.mrf.mxu1 }
 0x2dd   :  { %v1109_v62 = vadd.f32 %v1108_v59, %v1666_v4 }
 0x2de   :  { %v1272_v63 = vpop.f32.mrf.mxu1 }
 0x2df   :  { %v1276_v1 = vmul.f32 0.5, %v1272_v63  ;;  %v1110_v2 = vsel %vm100_vm2, %v1109_v62, -inf }
 0x2e0   :  { %1111 = vmax.xlane.f32.xlu1 %v1110_v2  ;;  %v1551_v3 = vpop.f32.mrf.mxu1 }
 0x2e1   :  { %v1277_v5 = vadd.f32 %v1276_v1, %v1666_v4 }
 0x2e3   :  { %v1278_v6 = vsel %vm100_vm2, %v1277_v5, -inf }
 0x2e4   :  { %1279 = vmax.xlane.f32.xlu0 %v1278_v6 }
 0x2f1   :  { %449 = vrot.lane.b32.xlu1 %v1684_v14, %s1608_s20 }
 0x2f5   :  { %617 = vrot.lane.b32.xlu1 %v1684_v14, %s1609_s21 }
 0x2fa   :  { %281 = vrot.lane.b32.xlu0 %v1684_v14, %s1607_s0 }
 0x355   :  { %v272_v7 = vpop.xlane.xlu1 %271 }
 0x356   :  { %v273_v8 = vsub.f32 %v269_v37, %v272_v7 }
 0x358   :  { %v274_v9 = vmul.f32 1.442695, %v273_v8 }
 0x359   :  { %v440_v10 = vpop.xlane.xlu0 %439 }
 0x35a   :  { %1577 = vpow2.f32 %v274_v9  ;;  %v441_v11 = vsub.f32 %v437_v42, %v440_v10 }
 0x35c   :  { %v442_v12 = vmul.f32 1.442695, %v441_v11 }
 0x35d   :  { %v608_v4 = vpop.xlane.xlu0 %607 }
 0x35e   :  { %1579 = vpow2.f32 %v442_v12  ;;  %v609_v21 = vsub.f32 %v605_v47, %v608_v4 }
 0x360   :  { %v610_v24 = vmul.f32 1.442695, %v609_v21 }
 0x361   :  { %v776_v22 = vpop.xlane.xlu1 %775 }
 0x362   :  { %v777_v23 = vsub.f32 %v773_v52, %v776_v22  ;;  %1581 = vpow2.f32 %v610_v24 }
 0x364   :  { %v778_v27 = vmul.f32 1.442695, %v777_v23 }
 0x365   :  { %v944_v16 = vpop.xlane.xlu0 %943 }
 0x366   :  { %v945_v25 = vsub.f32 %v941_v57, %v944_v16  ;;  %1583 = vpow2.f32 %v778_v27 }
 0x367   :  { %v1578_v13 = vpop.eup %1577 }
 0x368   :  { %v276_v15 = vsel %vm100_vm2, %v1578_v13, 0.0  ;;  %v946_v29 = vmul.f32 1.442695, %v945_v25 }
 0x369   :  { %277 = vadd.xlane.f32.xlu1 %v276_v15  ;;  %v1112_v26 = vpop.xlane.xlu1 %1111 }
 0x36a   :  { %v1113_v28 = vsub.f32 %v1109_v62, %v1112_v26  ;;  %1585 = vpow2.f32 %v946_v29 }
 0x36b   :  { %v1580_v17 = vpop.eup %1579 }
 0x36c   :  { %v444_v18 = vsel %vm100_vm2, %v1580_v17, 0.0  ;;  %v1114_v31 = vmul.f32 1.442695, %v1113_v28 }
 0x36d   :  { %445 = vadd.xlane.f32.xlu0 %v444_v18  ;;  %v1280_v19 = vpop.xlane.xlu0 %1279  ;;  %v450_v44 = vpop.permute.xlu1 %449 }
 0x36e   :  { %v1281_v30 = vsub.f32 %v1277_v5, %v1280_v19  ;;  %1587 = vpow2.f32 %v1114_v31 }
 0x36f   :  { %v1582_v34 = vpop.eup %1581 }
 0x370   :  { %v1282_v33 = vmul.f32 1.442695, %v1281_v30  ;;  %v612_v36 = vsel %vm100_vm2, %v1582_v34, 0.0 }
 0x371   :  { %v282_v20 = vpop.permute.xlu0 %281  ;;  %v618_v45 = vpop.permute.xlu1 %617 }
 0x372   :  { %1493 = vmatpush3.msk.msra.mxu0 %vm116_vm3, %v282_v20  ;;  %1589 = vpow2.f32 %v1282_v33 }
 0x373   :  { %1502 = vmatprep.subr.mxu0 %v1605_v0  ;;  %v1584_v35 = vpop.eup %1583 }
 0x374   :  { %v780_v39 = vsel %vm100_vm2, %v1584_v35, 0.0 }
 0x377   :  { %v1586_v37 = vpop.eup %1585 }
 0x378   :  { %v948_v40 = vsel %vm100_vm2, %v1586_v37, 0.0 }
 0x37a   :  { %953 = vrot.lane.b32.xlu1 %v1684_v14, %s1611_s22 }
 0x37b   :  { %v1759_v38 = vpop.eup %1587 }
 0x37c   :  { %v1116_v42 = vsel %vm100_vm2, %v1759_v38, 0.0 }
 0x37f   :  { %v1763_v41 = vpop.eup %1589 }
 0x380   :  { %v1284_v43 = vsel %vm100_vm2, %v1763_v41, 0.0 }
 0x383   :  { %785 = vrot.lane.b32.xlu0 %v1684_v14, %s1610_s3 }
 0x39e   :  { %613 = vadd.xlane.f32.xlu1 %v612_v36 }
 0x3a2   :  { %781 = vadd.xlane.f32.xlu0 %v780_v39  ;;  %949 = vadd.xlane.f32.xlu1 %v948_v40 }
 0x3a6   :  { %1117 = vadd.xlane.f32.xlu0 %v1116_v42  ;;  %1285 = vadd.xlane.f32.xlu1 %v1284_v43 }
 0x3b7   :  { %1289 = vrot.lane.b32.xlu1 %v1684_v14, %s1613_s24 }
 0x3bc   :  { %1121 = vrot.lane.b32.xlu0 %v1684_v14, %s1612_s23 }
 0x3f2   :  { %v278_v46 = vpop.xlane.xlu1 %277 }
 0x3f3   :  { %1591 = vrcp.f32 %v278_v46 }
 0x3f6   :  { %v446_v47 = vpop.xlane.xlu0 %445  ;;  %v954_v14 = vpop.permute.xlu1 %953 }
 0x3f7   :  { %1593 = vrcp.f32 %v446_v47 }
 0x3fa   :  { %v786_v52 = vpop.permute.xlu0 %785 }
 0x400   :  { %v1592_v48 = vpop.eup %1591 }
 0x401   :  { %v280_v49 = vmul.f32 %v1592_v48, %v1578_v13 }
 0x403   :  { %1495 = vmatmul.mubr.msk.f32.vlgmr.msra.gmra.mxu0 %vm112_vm4, %v280_v49 }
 0x404   :  { %v1594_v50 = vpop.eup %1593  ;;  %1503 = vmatpush3.msk.msra.mxu0 %vm116_vm3, %v450_v44  ;;  %1504 = vmatprep.mubr.msk.f32.mxu0 %vm1606_vm1, %v1605_v0 }
 0x405   :  { %1512 = vmatprep.subr.mxu0 %v1605_v0  ;;  %v448_v51 = vmul.f32 %v1594_v50, %v1580_v17 }
 0x407   :  { %1505 = vmatmul.mubr.msk.f32.vlgmr.msra.gmra.mxu0 %vm112_vm4, %v448_v51 }
 0x408   :  { %1513 = vmatpush3.msk.msra.mxu0 %vm116_vm3, %v618_v45  ;;  %1514 = vmatprep.mubr.msk.f32.mxu0 %vm1606_vm1, %v1605_v0 }
 0x409   :  { %1522 = vmatprep.subr.mxu0 %v1605_v0 }
 0x427   :  { %v614_v53 = vpop.xlane.xlu1 %613 }
 0x428   :  { %1595 = vrcp.f32 %v614_v53 }
 0x42b   :  { %v782_v54 = vpop.xlane.xlu0 %781  ;;  %v950_v55 = vpop.xlane.xlu1 %949 }
 0x42c   :  { %1597 = vrcp.f32 %v782_v54 }
 0x42d   :  { %1599 = vrcp.f32 %v950_v55 }
 0x42f   :  { %v1118_v56 = vpop.xlane.xlu0 %1117  ;;  %v1286_v57 = vpop.xlane.xlu1 %1285 }
 0x430   :  { %1601 = vrcp.f32 %v1118_v56 }
 0x431   :  { %1603 = vrcp.f32 %v1286_v57 }
 0x433   :  { %v1122_v63 = vpop.permute.xlu0 %1121  ;;  %v1290_v3 = vpop.permute.xlu1 %1289 }
 0x435   :  { %v1596_v58 = vpop.eup %1595 }
 0x436   :  { %v616_v59 = vmul.f32 %v1596_v58, %v1582_v34 }
 0x438   :  { %1515 = vmatmul.mubr.msk.f32.vlgmr.msra.gmra.mxu0 %vm112_vm4, %v616_v59 }
 0x439   :  { %1523 = vmatpush3.msk.msra.mxu0 %vm116_vm3, %v786_v52  ;;  %1524 = vmatprep.mubr.msk.f32.mxu0 %vm1606_vm1, %v1605_v0  ;;  %v1598_v60 = vpop.eup %1597 }
 0x43a   :  { %1532 = vmatprep.subr.mxu0 %v1605_v0  ;;  %v784_v61 = vmul.f32 %v1598_v60, %v1584_v35  ;;  %v1600_v62 = vpop.eup %1599 }
 0x43b   :  { %v952_v1 = vmul.f32 %v1600_v62, %v1586_v37 }
 0x43c   :  { %1525 = vmatmul.mubr.msk.f32.vlgmr.msra.gmra.mxu0 %vm112_vm4, %v784_v61 }
 0x43d   :  { %1533 = vmatpush3.msk.msra.mxu0 %vm116_vm3, %v954_v14  ;;  %1534 = vmatprep.mubr.msk.f32.mxu0 %vm1606_vm1, %v1605_v0  ;;  %v1602_v2 = vpop.eup %1601 }
 0x43e   :  { %1542 = vmatprep.subr.mxu0 %v1605_v0  ;;  %v1120_v5 = vmul.f32 %v1602_v2, %v1759_v38  ;;  %v1604_v6 = vpop.eup %1603 }
 0x43f   :  { %v1288_v7 = vmul.f32 %v1604_v6, %v1763_v41 }
 0x440   :  { %1535 = vmatmul.mubr.msk.f32.vlgmr.msra.gmra.mxu0 %vm112_vm4, %v952_v1 }
 0x441   :  { %1543 = vmatpush3.msk.msra.mxu0 %vm116_vm3, %v1122_v63  ;;  %1544 = vmatprep.mubr.msk.f32.mxu0 %vm1606_vm1, %v1605_v0 }
 0x442   :  { %1552 = vmatprep.subr.mxu0 %v1605_v0 }
 0x444   :  { %1545 = vmatmul.mubr.msk.f32.vlgmr.msra.gmra.mxu0 %vm112_vm4, %v1120_v5 }
 0x445   :  { %1553 = vmatpush3.msk.msra.mxu0 %vm116_vm3, %v1290_v3  ;;  %1554 = vmatprep.mubr.msk.f32.mxu0 %vm1606_vm1, %v1605_v0 }
 0x448   :  { %1555 = vmatmul.mubr.msk.f32.vlgmr.msra.gmra.mxu0 %vm112_vm4, %v1288_v7 }
 0x4c3   :  { %v354_v8 = vpop.f32.mrf.mxu0 }
 0x4c4   :  { %1367 = vrot.lane.b32.xlu0 %v354_v8, %s1614_s2 }
 0x4c5   :  { %v1496_v9 = vpop.f32.mrf.mxu0 }
 0x4c7   :  { %v522_v10 = vpop.f32.mrf.mxu0 }
 0x4c8   :  { %1371 = vrot.lane.b32.xlu1 %v522_v10, %s1615_s27 }
 0x4c9   :  { %v1506_v11 = vpop.f32.mrf.mxu0 }
 0x4f8   :  { %v690_v12 = vpop.f32.mrf.mxu0 }
 0x4f9   :  { %1375 = vrot.lane.b32.xlu0 %v690_v12, %s1616_s28 }
 0x4fa   :  { %v1516_v4 = vpop.f32.mrf.mxu0 }
 0x4fc   :  { %v858_v13 = vpop.f32.mrf.mxu0 }
 0x4fd   :  { %1379 = vrot.lane.b32.xlu1 %v858_v13, %s1617_s29 }
 0x4fe   :  { %v1526_v0 = vpop.f32.mrf.mxu0 }
 0x500   :  { %v1026_v15 = vpop.f32.mrf.mxu0 }
 0x501   :  { %1383 = vrot.lane.b32.xlu0 %v1026_v15, %s1618_s30 }
 0x502   :  { %v1536_v16 = vpop.f32.mrf.mxu0 }
 0x504   :  { %v1194_v17 = vpop.f32.mrf.mxu0 }
 0x505   :  { %1387 = vrot.lane.b32.xlu1 %v1194_v17, %s1619_s5 }
 0x506   :  { %v1546_v18 = vpop.f32.mrf.mxu0 }
 0x508   :  { %v1362_v19 = vpop.f32.mrf.mxu0 }
 0x509   :  { %1391 = vrot.lane.b32.xlu0 %v1362_v19, %s1620_s6 }
 0x50a   :  { %v1556_v20 = vpop.f32.mrf.mxu0 }
 0x536   :  { %v1368_v21 = vpop.permute.xlu0 %1367 }
 0x537   :  { %v1394_v25 = vsel %vm21_vm0, %v1728_v32, %v1368_v21 }
 0x53a   :  { %v1372_v22 = vpop.permute.xlu1 %1371 }
 0x53b   :  { %v1396_v26 = vsel %vm1395_vm5, %v1394_v25, %v1372_v22 }
 0x56b   :  { %v1376_v23 = vpop.permute.xlu0 %1375 }
 0x56c   :  { %v1398_v28 = vsel %vm1397_vm6, %v1396_v26, %v1376_v23 }
 0x56f   :  { %v1380_v24 = vpop.permute.xlu1 %1379 }
 0x570   :  { %v1400_v30 = vsel %vm1399_vm7, %v1398_v28, %v1380_v24 }
 0x573   :  { %v1384_v27 = vpop.permute.xlu0 %1383 }
 0x574   :  { %v1402_v31 = vsel %vm1401_vm8, %v1400_v30, %v1384_v27 }
 0x577   :  { %v1388_v29 = vpop.permute.xlu1 %1387 }
 0x578   :  { %v1404_v33 = vsel %vm1403_vm9, %v1402_v31, %v1388_v29 }
 0x57b   :  { %v1392_v34 = vpop.permute.xlu0 %1391 }
 0x57c   :  { %v1406_v35 = vsel %vm1405_vm10, %v1404_v33, %v1392_v34 }
 0x57d   :  { %1408 = vst.msk [vmem:[%s1814_s4] sm:$0x7] %vm1407_vm11, %v1406_v35 }

// kernel: _device_forward.35
= control target key start
LH: loop header
LB: loop body
LE: loop exit
PB: predicated region body
PF: predicated region fallthrough
CT: control target
= control target key end

     0   :  { %s976_s15 = smov 0   ;;  %s1047_s0 = inlined_call_operand.vmem [shape: f32[3,15,32], index: 0, kind: input, shape index: {}]   ;;  %s1048_s1 = inlined_call_operand.vmem [shape: f32[3,1,32], index: 1, kind: input, shape index: {}]   ;;  %s1049_s2 = inlined_call_operand.vmem [shape: f32[3,1,32], index: 2, kind: input, shape index: {}]   ;;  %s1050_s3 = inlined_call_operand.vmem [shape: f32[3,1,1], index: 3, kind: input, shape index: {}]   ;;  %s1051_s4 = inlined_call_operand.vmem [shape: f32[3,15,32], index: 4, kind: output, shape index: {}]  }
   0x1 LB: > { %s832_s16 = sadd.s32 4294967295, %s943_s15   ;;  %p836_p0 = scmp.ge.s32.totalorder %s943_s15, 1  ;;  %s943_s15 = sphi %s976_s15, %s14_s15  }
   0x2   : > { %p186_p1 = scmp.lt.s32.totalorder %s943_s15, 4 }
   0x4   : > { %p187_p2 = pnand %p836_p0, %p186_p1 }
   0x5   : > { %p221_p3 = scmp.lt.s32.totalorder (!%p187_p2), %s832_s16, 2  ;;  %s945_s24 = smov (!%p187_p2), 112  }
   0x6   : > { %190 = sbr.rel (%p187_p2) target bundleno = 634 (0x27a), region = 36  ;;  %s946_s25 = smov (!%p187_p2), 120  }
   0x7   : > { %s947_s26 = smov (!%p187_p2), 104   ;;  %s948_s7 = smov (!%p187_p2), 8  }
   0x8   : > { %s949_s8 = smov (!%p187_p2), 16   ;;  %s950_s9 = smov (!%p187_p2), 24  }
   0xb   : > { %s1053_s16 = smov (!%p221_p3, %s832_s16), 2  ;;  %vm253_vm0 = vcmask 64512   ;;  %vm257_vm1 = vcmask 63488   ;;  %v399_v19 = vlaneseq  ;;  %vm290_vm2 = vcmask 1040384  }
   0xc   : > { %s857_s17 = sshll.u32 %s1053_s16, 4  ;;  %s228_s20 = scalar_lea.vmem %s1048_s1, %s1053_s16  ;;  %vm283_vm3 = vcmask 7168   ;;  %vm740_vm4 = vcmask 130048   ;;  %vm743_vm5 = vcmask 195584   ;;  %vm748_vm6 = vcmask 260096  }
   0xd   : > { %s225_s23 = scalar_lea.vmem %s1047_s0, %s857_s17  ;;  %v841_v0 = vld [vmem:[%s228_s20] ss:$0 sm:$0xff]  ;;  %v400_v20 = vshrl.u32 %v399_v19, 7  ;;  %s231_s29 = scalar_lea.vmem %s1049_s2, %s1053_s16  ;;  %vm746_vm7 = vcmask 261120  }
   0xe   : > { %v240_v1 = vld [vmem:[%s225_s23] sm:$0xff]  ;;  %v241_v2 = vld [vmem:[%s225_s23 + $0x8] sm:$0x7f]  ;;  %s234_s6 = scalar_lea.vmem %s1050_s3, %s1053_s16  ;;  %s239_s12 = scalar_lea.vmem %s1051_s4, %s857_s17 }
   0xf   : > { %v251_v3 = vmul.f32 %v841_v0, %v240_v1  ;;  %v252_v4 = vmul.f32 %v841_v0, %v241_v2  ;;  %v401_v21 = vsub.s32 0, %v400_v20  ;;  %v243_v22 = vld [vmem:[%s231_s29] sm:$0x1] }
  0x10   : > { %871 = vmatprep.subr.msk.mxu0 %vm290_vm2, %v243_v22  ;;  %v842_v24 = vld [vmem:[%s234_s6] ss:$0 sm:$0xff] }
  0x11   : > { %488 = vrot.lane.b32.xlu1 %v251_v3, %s945_s24  ;;  %371 = vrot.lane.b32.xlu0 %v251_v3, %s946_s25  ;;  %v254_v5 = vsel %vm253_vm0, %v251_v3, 0.0  ;;  %v258_v6 = vsel %vm257_vm1, %v252_v4, 0.0  ;;  %v402_v23 = vrot.slane %v243_v22, %v401_v21 }
  0x12   : > { %872 = vmatpush3.msk.msra.mxu0 %vm290_vm2, %v243_v22 }
  0x15   : > { %373 = vrot.lane.b32.xlu0 %v252_v4, %s946_s25  ;;  %490 = vrot.lane.b32.xlu1 %v252_v4, %s945_s24 }
  0x19   : > { %601 = vrot.lane.b32.xlu0 %v251_v3, %s947_s26  ;;  %603 = vrot.lane.b32.xlu1 %v252_v4, %s947_s26 }
  0x38   : > { %255 = vadd.xlane.f32.xlu0 %v254_v5 }
  0x3d   : > { %259 = vadd.xlane.f32.xlu1 %v258_v6 }
  0x83   : > { %v489_v7 = vpop.permute.xlu1 %488  ;;  %v372_v8 = vpop.permute.xlu0 %371 }
  0x84   : > { %v494_v9 = vsel %vm253_vm0, %v489_v7, 0.0  ;;  %v377_v10 = vsel %vm253_vm0, %v372_v8, 0.0 }
  0x85   : > { %495 = vadd.xlane.f32.xlu1 %v494_v9  ;;  %378 = vadd.xlane.f32.xlu0 %v377_v10 }
  0x87   : > { %v374_v11 = vpop.permute.xlu0 %373  ;;  %v491_v12 = vpop.permute.xlu1 %490 }
  0x88   : > { %v380_v13 = vsel %vm257_vm1, %v374_v11, 0.0  ;;  %v497_v14 = vsel %vm257_vm1, %v491_v12, 0.0 }
  0x89   : > { %381 = vadd.xlane.f32.xlu0 %v380_v13 }
  0x8b   : > { %v602_v15 = vpop.permute.xlu0 %601  ;;  %v604_v16 = vpop.permute.xlu1 %603 }
  0x8c   : > { %v607_v17 = vsel %vm253_vm0, %v602_v15, 0.0  ;;  %v610_v18 = vsel %vm257_vm1, %v604_v16, 0.0 }
  0x8d   : > { %608 = vadd.xlane.f32.xlu1 %v607_v17  ;;  %498 = vadd.xlane.f32.xlu0 %v497_v14 }
  0x91   : > { %611 = vadd.xlane.f32.xlu0 %v610_v18 }
  0x9e   : > { %403 = vrot.lane.b32.xlu1 %v402_v23, %s946_s25 }
  0xa2   : > { %629 = vrot.lane.b32.xlu1 %v402_v23, %s947_s26 }
  0xa7   : > { %516 = vrot.lane.b32.xlu0 %v402_v23, %s945_s24 }
  0xc1   : > { %v256_v25 = vpop.xlane.xlu0 %255 }
  0xc2   : > { %v261_v26 = vmul.f32 0.35355338, %v256_v25 }
  0xc4   : > { %v269_v27 = vadd.f32 %v842_v24, %v261_v26 }
  0xc6   : > { %v271_v28 = vsub.f32 %v269_v27, %v269_v27  ;;  %v260_v29 = vpop.xlane.xlu1 %259 }
  0xc7   : > { %v262_v30 = vmul.f32 0.35355338, %v260_v29 }
  0xc8   : > { %v273_v31 = vmul.f32 1.442695, %v271_v28 }
  0xc9   : > { %v270_v32 = vadd.f32 %v842_v24, %v262_v30 }
  0xca   : > { %905 = vpow2.f32 %v273_v31 }
  0xcb   : > { %v272_v33 = vsub.f32 %v270_v32, %v270_v32 }
  0xcd   : > { %v275_v34 = vmul.f32 1.442695, %v272_v33 }
  0xcf   : > { %907 = vpow2.f32 %v275_v34 }
  0xd7   : > { %v906_v35 = vpop.eup %905 }
  0xd8   : > { %909 = vrcp.f32 %v906_v35 }
  0xdc   : > { %v908_v36 = vpop.eup %907 }
  0xdd   : > { %911 = vrcp.f32 %v908_v36 }
  0xe5   : > { %v910_v37 = vpop.eup %909 }
  0xe6   : > { %v281_v38 = vmul.f32 %v910_v37, %v906_v35 }
  0xe8   : > { %873 = vmatprep.mubr.msk.f32.mxu0 %vm283_vm3, %v281_v38 }
  0xea   : > { %v912_v39 = vpop.eup %911 }
  0xeb   : > { %v282_v40 = vmul.f32 %v912_v39, %v908_v36 }
  0xed   : > { %874 = vmatmul.mubr.msk.f32.vlgmr.msra.gmra.mxu0 %vm283_vm3, %v282_v40 }
 0x10e   : > { %v496_v41 = vpop.xlane.xlu1 %495  ;;  %v379_v42 = vpop.xlane.xlu0 %378 }
 0x10f   : > { %v500_v43 = vmul.f32 0.35355338, %v496_v41  ;;  %v383_v44 = vmul.f32 0.35355338, %v379_v42 }
 0x111   : > { %v502_v45 = vadd.f32 %v842_v24, %v500_v43  ;;  %v385_v46 = vadd.f32 %v842_v24, %v383_v44 }
 0x112   : > { %v382_v47 = vpop.xlane.xlu0 %381 }
 0x113   : > { %v504_v48 = vsub.f32 %v502_v45, %v502_v45  ;;  %v387_v49 = vsub.f32 %v385_v46, %v385_v46  ;;  %v384_v50 = vmul.f32 0.35355338, %v382_v47 }
 0x115   : > { %v506_v51 = vmul.f32 1.442695, %v504_v48  ;;  %v389_v52 = vmul.f32 1.442695, %v387_v49  ;;  %v386_v53 = vadd.f32 %v842_v24, %v384_v50 }
 0x116   : > { %v609_v54 = vpop.xlane.xlu1 %608  ;;  %v499_v55 = vpop.xlane.xlu0 %498 }
 0x117   : > { %913 = vpow2.f32 %v506_v51  ;;  %v388_v56 = vsub.f32 %v386_v53, %v386_v53  ;;  %v613_v57 = vmul.f32 0.35355338, %v609_v54  ;;  %v501_v58 = vmul.f32 0.35355338, %v499_v55 }
 0x118   : > { %915 = vpow2.f32 %v389_v52 }
 0x119   : > { %v391_v59 = vmul.f32 1.442695, %v388_v56  ;;  %v615_v60 = vadd.f32 %v842_v24, %v613_v57  ;;  %v503_v61 = vadd.f32 %v842_v24, %v501_v58 }
 0x11a   : > { %v612_v62 = vpop.xlane.xlu0 %611  ;;  %v404_v63 = vpop.permute.xlu1 %403 }
 0x11b   : > { %917 = vpow2.f32 %v391_v59  ;;  %v617_v0 = vsub.f32 %v615_v60, %v615_v60  ;;  %v505_v1 = vsub.f32 %v503_v61, %v503_v61  ;;  %v614_v2 = vmul.f32 0.35355338, %v612_v62  ;;  %876 = vmatprep.subr.msk.mxu1 %vm290_vm2, %v404_v63 }
 0x11c   : > { %877 = vmatpush3.msk.msra.mxu1 %vm290_vm2, %v404_v63 }
 0x11d   : > { %v619_v3 = vmul.f32 1.442695, %v617_v0  ;;  %v508_v4 = vmul.f32 1.442695, %v505_v1  ;;  %v616_v5 = vadd.f32 %v842_v24, %v614_v2 }
 0x11e   : > { %v517_v6 = vpop.permute.xlu0 %516  ;;  %v630_v7 = vpop.permute.xlu1 %629 }
 0x11f   : > { %919 = vpow2.f32 %v619_v3  ;;  %v618_v8 = vsub.f32 %v616_v5, %v616_v5  ;;  %881 = vmatprep.subr.msk.mxu0 %vm290_vm2, %v517_v6  ;;  %886 = vmatprep.subr.msk.mxu1 %vm290_vm2, %v630_v7 }
 0x120   : > { %921 = vpow2.f32 %v508_v4  ;;  %882 = vmatpush3.msk.msra.mxu0 %vm290_vm2, %v517_v6 }
 0x121   : > { %v621_v9 = vmul.f32 1.442695, %v618_v8 }
 0x123   : > { %923 = vpow2.f32 %v621_v9 }
 0x124   : > { %v914_v10 = vpop.eup %913 }
 0x125   : > { %v916_v11 = vpop.eup %915  ;;  %925 = vrcp.f32 %v914_v10 }
 0x126   : > { %927 = vrcp.f32 %v916_v11 }
 0x128   : > { %v918_v12 = vpop.eup %917 }
 0x129   : > { %929 = vrcp.f32 %v918_v12 }
 0x12c   : > { %v920_v13 = vpop.eup %919 }
 0x12d   : > { %v922_v14 = vpop.eup %921  ;;  %931 = vrcp.f32 %v920_v13 }
 0x12e   : > { %933 = vrcp.f32 %v922_v14 }
 0x130   : > { %v924_v15 = vpop.eup %923 }
 0x131   : > { %935 = vrcp.f32 %v924_v15 }
 0x132   : > { %v926_v16 = vpop.eup %925 }
 0x133   : > { %v928_v17 = vpop.eup %927  ;;  %v514_v18 = vmul.f32 %v926_v16, %v914_v10 }
 0x134   : > { %v397_v19 = vmul.f32 %v928_v17, %v916_v11 }
 0x135   : > { %883 = vmatprep.mubr.msk.f32.mxu0 %vm283_vm3, %v514_v18 }
 0x136   : > { %v930_v20 = vpop.eup %929  ;;  %878 = vmatprep.mubr.msk.f32.mxu1 %vm283_vm3, %v397_v19 }
 0x137   : > { %v398_v21 = vmul.f32 %v930_v20, %v918_v12 }
 0x139   : > { %879 = vmatmul.mubr.msk.f32.vlgmr.msra.gmra.mxu1 %vm283_vm3, %v398_v21 }
 0x13a   : > { %v932_v22 = vpop.eup %931  ;;  %887 = vmatpush3.msk.msra.mxu1 %vm290_vm2, %v630_v7 }
 0x13b   : > { %v934_v23 = vpop.eup %933  ;;  %v627_v24 = vmul.f32 %v932_v22, %v920_v13 }
 0x13c   : > { %v515_v25 = vmul.f32 %v934_v23, %v922_v14 }
 0x13d   : > { %888 = vmatprep.mubr.msk.f32.mxu1 %vm283_vm3, %v627_v24 }
 0x13e   : > { %v936_v26 = vpop.eup %935  ;;  %884 = vmatmul.mubr.msk.f32.vlgmr.msra.gmra.mxu0 %vm283_vm3, %v515_v25 }
 0x13f   : > { %v628_v27 = vmul.f32 %v936_v26, %v924_v15 }
 0x141   : > { %889 = vmatmul.mubr.msk.f32.vlgmr.msra.gmra.mxu1 %vm283_vm3, %v628_v27 }
 0x1ad   : > { %v875_v28 = vpop.f32.mrf.mxu0 }
 0x1af   : > { %v360_v31 = vpop.f32.mrf.mxu0 }
 0x1f9   : > { %v880_v29 = vpop.f32.mrf.mxu1 }
 0x1fa   : > { %718 = vrot.lane.b32.xlu0 %v880_v29, %s948_s7 }
 0x1fb   : > { %v479_v30 = vpop.f32.mrf.mxu1 }
 0x1fc   : > { %716 = vrot.lane.b32.xlu1 %v479_v30, %s948_s7 }
 0x1fe   : > { %v885_v32 = vpop.f32.mrf.mxu0 }
 0x1ff   : > { %726 = vrot.lane.b32.xlu0 %v885_v32, %s949_s8 }
 0x200   : > { %v592_v33 = vpop.f32.mrf.mxu0 }
 0x201   : > { %724 = vrot.lane.b32.xlu1 %v592_v33, %s949_s8  ;;  %v890_v34 = vpop.f32.mrf.mxu1 }
 0x203   : > { %734 = vrot.lane.b32.xlu0 %v890_v34, %s950_s9  ;;  %v705_v35 = vpop.f32.mrf.mxu1 }
 0x205   : > { %732 = vrot.lane.b32.xlu1 %v705_v35, %s950_s9 }
 0x26c   : > { %v719_v36 = vpop.permute.xlu0 %718 }
 0x26d   : > { %v739_v40 = vsel %vm253_vm0, %v875_v28, %v719_v36 }
 0x26e   : > { %v717_v37 = vpop.permute.xlu1 %716 }
 0x26f   : > { %v738_v43 = vsel %vm253_vm0, %v360_v31, %v717_v37 }
 0x271   : > { %v727_v38 = vpop.permute.xlu0 %726 }
 0x272   : > { %v742_v41 = vsel %vm740_vm4, %v739_v40, %v727_v38 }
 0x273   : > { %v725_v39 = vpop.permute.xlu1 %724 }
 0x274   : > { %v741_v45 = vsel %vm740_vm4, %v738_v43, %v725_v39 }
 0x275   : > { %v735_v42 = vpop.permute.xlu0 %734 }
 0x276   : > { %v745_v44 = vsel %vm743_vm5, %v742_v41, %v735_v42 }
 0x277   : > { %749 = vst.msk [vmem:[%s239_s12 + $0x8] sm:$0x7f] %vm748_vm6, %v745_v44  ;;  %v733_v46 = vpop.permute.xlu1 %732 }
 0x278   : > { %v744_v47 = vsel %vm743_vm5, %v741_v45, %v733_v46 }
 0x279   : > { %747 = vst.msk [vmem:[%s239_s12] sm:$0xff] %vm746_vm7, %v744_v47 }
 0x27a PF: > { %s14_s15 = sadd.s32 1, %s943_s15  }
 0x27b   : > { %p11_p4 = scmp.ge.s32.totalorder %s14_s15, 5  }
 0x27d   :  { %13 = sbr.rel (!%p11_p4) target bundleno = 1 (0x1), region = 75 }

// kernel: _device_forward.36
= control target key start
LH: loop header
LB: loop body
LE: loop exit
PB: predicated region body
PF: predicated region fallthrough
CT: control target
= control target key end

     0   :  { %vm40_vm0 = vcmask 261120   ;;  %vm181_vm1 = vcmask 258048   ;;  %s487_s2 = inlined_call_operand.vmem [shape: f32[32,32], index: 2, kind: input, shape index: {}]   ;;  %s488_s0 = inlined_call_operand.vmem [shape: f32[45,32], index: 0, kind: input, shape index: {}]   ;;  %s489_s3 = inlined_call_operand.vmem [shape: f32[1,32], index: 3, kind: input, shape index: {}]   ;;  %s490_s1 = inlined_call_operand.vmem [shape: f32[45,32], index: 1, kind: input, shape index: {}]   ;;  %s491_s4 = inlined_call_operand.vmem [shape: f32[1,32], index: 4, kind: input, shape index: {}]   ;;  %s492_s5 = inlined_call_operand.vmem [shape: f32[1,32], index: 5, kind: input, shape index: {}]   ;;  %s493_s6 = inlined_call_operand.vmem [shape: f32[45,32], index: 6, kind: output, shape index: {}]  }
   0x1   :  { %v32_v0 = vld [vmem:[%s487_s2 + $0x18] sm:$0xff]  ;;  %v31_v1 = vld [vmem:[%s487_s2 + $0x10] sm:$0xff]  ;;  %v30_v2 = vld [vmem:[%s487_s2 + $0x8] sm:$0xff] }
   0x2   :  { %301 = vmatprep.subr.mxu0 %v32_v0  ;;  %318 = vmatprep.subr.mxu1 %v32_v0  ;;  %v29_v3 = vld [vmem:[%s487_s2] sm:$0xff]  ;;  %v25_v5 = vld [vmem:[%s488_s0 + $0x10] sm:$0xff]  ;;  %v24_v6 = vld [vmem:[%s488_s0 + $0x8] sm:$0xff] }
   0x3   :  { %302 = vmatpush3.msra.mxu0 %v32_v0  ;;  %322 = vmatpush3.msra.mxu1 %v32_v0  ;;  %v23_v4 = vld [vmem:[%s488_s0] sm:$0xff]  ;;  %v26_v7 = vld [vmem:[%s488_s0 + $0x18] sm:$0xff]  ;;  %v28_v9 = vld [vmem:[%s488_s0 + $0x28] sm:$0x1f] }
   0x4   :  { %303 = vmatprep.subr.mxu0 %v31_v1  ;;  %319 = vmatprep.subr.mxu1 %v31_v1  ;;  %v27_v8 = vld [vmem:[%s488_s0 + $0x20] sm:$0xff]  ;;  %v157_v13 = vld [vmem:[%s490_s1 + $0x18] sm:$0xff]  ;;  %v155_v14 = vld [vmem:[%s490_s1 + $0x8] sm:$0xff] }
   0x5   :  { %304 = vmatpush3.msra.mxu0 %v31_v1  ;;  %323 = vmatpush3.msra.mxu1 %v31_v1  ;;  %v282_v10 = vld [vmem:[%s489_s3] ss:$0 sm:$0xff]  ;;  %v156_v19 = vld [vmem:[%s490_s1 + $0x10] sm:$0xff]  ;;  %v159_v26 = vld [vmem:[%s490_s1 + $0x28] sm:$0x1f] }
   0x6   :  { %305 = vmatprep.subr.mxu0 %v30_v2  ;;  %320 = vmatprep.subr.mxu1 %v30_v2  ;;  %v154_v24 = vld [vmem:[%s490_s1] sm:$0xff] }
   0x7   :  { %306 = vmatpush3.msra.mxu0 %v30_v2  ;;  %324 = vmatpush3.msra.mxu1 %v30_v2  ;;  %v158_v33 = vld [vmem:[%s490_s1 + $0x20] sm:$0xff] }
   0x8   :  { %307 = vmatprep.subr.mxu0 %v29_v3  ;;  %321 = vmatprep.subr.mxu1 %v29_v3 }
   0x9   :  { %308 = vmatpush3.msra.mxu0 %v29_v3  ;;  %325 = vmatpush3.msra.mxu1 %v29_v3 }
   0xa   :  { %309 = vmatprep.mubr.msk.f32.mxu0 %vm40_vm0, %v23_v4  ;;  %312 = vmatprep.mubr.msk.f32.mxu1 %vm40_vm0, %v25_v5 }
   0xb   :  { %310 = vmatmul.mubr.msk.f32.vlgmr.msra.gmra.mxu0 %vm40_vm0, %v24_v6  ;;  %313 = vmatmul.mubr.msk.f32.vlgmr.msra.gmra.mxu1 %vm40_vm0, %v26_v7 }
   0xc   :  { %315 = vmatprep.mubr.msk.f32.mxu1 %vm40_vm0, %v27_v8 }
   0xf   :  { %316 = vmatmul.mubr.msk.f32.gmra.mxu1 %vm40_vm0, %v28_v9 }
  0xcb   :  { %v311_v11 = vpop.f32.mrf.mxu0  ;;  %v314_v12 = vpop.f32.mrf.mxu1 }
  0xcc   :  { %v131_v15 = vadd.f32 %v311_v11, %v282_v10  ;;  %v141_v16 = vadd.f32 %v314_v12, %v282_v10 }
  0xcd   :  { %v125_v17 = vpop.f32.mrf.mxu0  ;;  %v135_v18 = vpop.f32.mrf.mxu1 }
  0xce   :  { %v126_v20 = vadd.f32 %v282_v10, %v125_v17  ;;  %v136_v21 = vadd.f32 %v282_v10, %v135_v18  ;;  %v163_v22 = vadd.f32 %v157_v13, %v141_v16  ;;  %v161_v23 = vadd.f32 %v155_v14, %v131_v15 }
  0xcf   :  { %v317_v25 = vpop.f32.mrf.mxu1 }
  0xd0   :  { %v175_v27 = vsel %vm40_vm0, %v163_v22, 0.0  ;;  %v151_v28 = vadd.f32 %v317_v25, %v282_v10  ;;  %v169_v29 = vsel %vm40_vm0, %v161_v23, 0.0  ;;  %v162_v30 = vadd.f32 %v156_v19, %v136_v21 }
  0xd1   :  { %176 = vadd.xlane.f32.xlu1 %v175_v27  ;;  %170 = vadd.xlane.f32.xlu0 %v169_v29  ;;  %v145_v31 = vpop.f32.mrf.mxu1  ;;  %v160_v32 = vadd.f32 %v154_v24, %v126_v20 }
  0xd2   :  { %v146_v34 = vadd.f32 %v282_v10, %v145_v31  ;;  %v172_v35 = vsel %vm40_vm0, %v162_v30, 0.0  ;;  %v165_v36 = vadd.f32 %v159_v26, %v151_v28  ;;  %v289_v26 = vld [vmem:[%s491_s4] ss:$0 sm:$0xff] }
  0xd3   :  { %v166_v37 = vsel %vm40_vm0, %v160_v32, 0.0  ;;  %v290_v28 = vld [vmem:[%s492_s5] ss:$0 sm:$0xff] }
  0xd4   :  { %v164_v38 = vadd.f32 %v158_v33, %v146_v34  ;;  %v182_v39 = vsel %vm181_vm1, %v165_v36, 0.0 }
  0xd5   :  { %173 = vadd.xlane.f32.xlu1 %v172_v35  ;;  %167 = vadd.xlane.f32.xlu0 %v166_v37 }
  0xd6   :  { %v178_v40 = vsel %vm40_vm0, %v164_v38, 0.0 }
  0xd9   :  { %183 = vadd.xlane.f32.xlu1 %v182_v39  ;;  %179 = vadd.xlane.f32.xlu0 %v178_v40 }
 0x15a   :  { %v177_v41 = vpop.xlane.xlu1 %176  ;;  %v171_v42 = vpop.xlane.xlu0 %170 }
 0x15b   :  { %v189_v43 = vmul.f32 0.03125, %v177_v41  ;;  %v187_v44 = vmul.f32 0.03125, %v171_v42 }
 0x15d   :  { %v436_v45 = vsub.f32 %v163_v22, %v189_v43  ;;  %v193_v46 = vsub.f32 %v161_v23, %v187_v44 }
 0x15e   :  { %v174_v47 = vpop.xlane.xlu1 %173  ;;  %v168_v48 = vpop.xlane.xlu0 %167 }
 0x15f   :  { %v188_v49 = vmul.f32 0.03125, %v174_v47  ;;  %v186_v50 = vmul.f32 0.03125, %v168_v48  ;;  %v199_v51 = vmul.f32 %v193_v46, %v193_v46  ;;  %v201_v52 = vmul.f32 %v436_v45, %v436_v45 }
 0x161   :  { %v440_v53 = vsub.f32 %v162_v30, %v188_v49  ;;  %v192_v54 = vsub.f32 %v160_v32, %v186_v50  ;;  %v207_v55 = vsel %vm40_vm0, %v199_v51, 0.0  ;;  %v213_v61 = vsel %vm40_vm0, %v201_v52, 0.0 }
 0x162   :  { %v184_v56 = vpop.xlane.xlu1 %183  ;;  %208 = vadd.xlane.f32.xlu1 %v207_v55  ;;  %v180_v57 = vpop.xlane.xlu0 %179 }
 0x163   :  { %v191_v58 = vmul.f32 0.03125, %v184_v56  ;;  %v190_v59 = vmul.f32 0.03125, %v180_v57  ;;  %v198_v60 = vmul.f32 %v192_v54, %v192_v54  ;;  %v200_v1 = vmul.f32 %v440_v53, %v440_v53 }
 0x165   :  { %v197_v62 = vsub.f32 %v165_v36, %v191_v58  ;;  %v444_v63 = vsub.f32 %v164_v38, %v190_v59  ;;  %v204_v0 = vsel %vm40_vm0, %v198_v60, 0.0  ;;  %v210_v4 = vsel %vm40_vm0, %v200_v1, 0.0 }
 0x166   :  { %214 = vadd.xlane.f32.xlu1 %v213_v61  ;;  %205 = vadd.xlane.f32.xlu0 %v204_v0 }
 0x167   :  { %v203_v2 = vmul.f32 %v197_v62, %v197_v62  ;;  %v202_v5 = vmul.f32 %v444_v63, %v444_v63 }
 0x169   :  { %v219_v3 = vsel %vm181_vm1, %v203_v2, 0.0  ;;  %v216_v6 = vsel %vm40_vm0, %v202_v5, 0.0 }
 0x16a   :  { %220 = vadd.xlane.f32.xlu1 %v219_v3  ;;  %211 = vadd.xlane.f32.xlu0 %v210_v4 }
 0x16e   :  { %217 = vadd.xlane.f32.xlu0 %v216_v6 }
 0x1eb   :  { %v209_v7 = vpop.xlane.xlu1 %208 }
 0x1ec   :  { %v223_v8 = vmul.f32 0.03125, %v209_v7 }
 0x1ee   :  { %v229_v9 = vadd.f32 1e-12, %v223_v8 }
 0x1ef   :  { %v215_v10 = vpop.xlane.xlu1 %214  ;;  %v206_v11 = vpop.xlane.xlu0 %205 }
 0x1f0   :  { %326 = vrsqrt.f32 %v229_v9  ;;  %v225_v12 = vmul.f32 0.03125, %v215_v10  ;;  %v222_v13 = vmul.f32 0.03125, %v206_v11 }
 0x1f2   :  { %v231_v14 = vadd.f32 1e-12, %v225_v12  ;;  %v228_v15 = vadd.f32 1e-12, %v222_v13 }
 0x1f3   :  { %v221_v16 = vpop.xlane.xlu1 %220  ;;  %v212_v17 = vpop.xlane.xlu0 %211 }
 0x1f4   :  { %328 = vrsqrt.f32 %v231_v14  ;;  %v227_v18 = vmul.f32 0.03125, %v221_v16  ;;  %v224_v19 = vmul.f32 0.03125, %v212_v17 }
 0x1f5   :  { %330 = vrsqrt.f32 %v228_v15 }
 0x1f6   :  { %v233_v20 = vadd.f32 1e-12, %v227_v18  ;;  %v230_v21 = vadd.f32 1e-12, %v224_v19 }
 0x1f7   :  { %v218_v22 = vpop.xlane.xlu0 %217 }
 0x1f8   :  { %332 = vrsqrt.f32 %v233_v20  ;;  %v226_v23 = vmul.f32 0.03125, %v218_v22 }
 0x1f9   :  { %334 = vrsqrt.f32 %v230_v21 }
 0x1fa   :  { %v232_v24 = vadd.f32 1e-12, %v226_v23 }
 0x1fc   :  { %336 = vrsqrt.f32 %v232_v24 }
 0x1fd   :  { %v327_v25 = vpop.eup %326 }
 0x1fe   :  { %v241_v27 = vmul.f32 %v327_v25, %v193_v46 }
 0x200   :  { %v254_v29 = vmul.f32 %v289_v26, %v241_v27 }
 0x201   :  { %v329_v30 = vpop.eup %328 }
 0x202   :  { %v331_v31 = vpop.eup %330  ;;  %v267_v32 = vadd.f32 %v290_v28, %v254_v29  ;;  %v243_v33 = vmul.f32 %v329_v30, %v436_v45 }
 0x203   :  { %v240_v34 = vmul.f32 %v331_v31, %v192_v54 }
 0x204   :  { %273 = vst.msk [vmem:[%s493_s6 + $0x8] sm:$0xff] %vm40_vm0, %v267_v32  ;;  %v256_v35 = vmul.f32 %v289_v26, %v243_v33 }
 0x205   :  { %v333_v36 = vpop.eup %332  ;;  %v253_v37 = vmul.f32 %v289_v26, %v240_v34 }
 0x206   :  { %v335_v38 = vpop.eup %334  ;;  %v269_v39 = vadd.f32 %v290_v28, %v256_v35  ;;  %v245_v40 = vmul.f32 %v333_v36, %v197_v62 }
 0x207   :  { %v266_v41 = vadd.f32 %v290_v28, %v253_v37  ;;  %v242_v42 = vmul.f32 %v335_v38, %v440_v53 }
 0x208   :  { %275 = vst.msk [vmem:[%s493_s6 + $0x18] sm:$0xff] %vm40_vm0, %v269_v39  ;;  %v258_v43 = vmul.f32 %v289_v26, %v245_v40 }
 0x209   :  { %v337_v44 = vpop.eup %336  ;;  %272 = vst.msk [vmem:[%s493_s6] sm:$0xff] %vm40_vm0, %v266_v41  ;;  %v255_v45 = vmul.f32 %v289_v26, %v242_v42 }
 0x20a   :  { %v271_v46 = vadd.f32 %v290_v28, %v258_v43  ;;  %v244_v47 = vmul.f32 %v337_v44, %v444_v63 }
 0x20b   :  { %v268_v48 = vadd.f32 %v290_v28, %v255_v45 }
 0x20c   :  { %277 = vst.msk [vmem:[%s493_s6 + $0x28] sm:$0x1f] %vm181_vm1, %v271_v46  ;;  %v257_v49 = vmul.f32 %v289_v26, %v244_v47 }
 0x20d   :  { %274 = vst.msk [vmem:[%s493_s6 + $0x10] sm:$0xff] %vm40_vm0, %v268_v48 }
 0x20e   :  { %v270_v50 = vadd.f32 %v290_v28, %v257_v49 }
 0x210   :  { %276 = vst.msk [vmem:[%s493_s6 + $0x20] sm:$0xff] %vm40_vm0, %v270_v50 }

// kernel: _device_forward.37
= control target key start
LH: loop header
LB: loop body
LE: loop exit
PB: predicated region body
PF: predicated region fallthrough
CT: control target
= control target key end

     0   :  { %vm43_vm0 = vcmask 261120   ;;  %vm350_vm1 = vcmask 258048   ;;  %s786_s1 = inlined_call_operand.vmem [shape: f32[32,128], index: 1, kind: input, shape index: {}]   ;;  %s787_s0 = inlined_call_operand.vmem [shape: f32[45,32], index: 0, kind: input, shape index: {}]   ;;  %s788_s3 = inlined_call_operand.vmem [shape: f32[128,32], index: 3, kind: input, shape index: {}]   ;;  %s789_s2 = inlined_call_operand.vmem [shape: f32[1,128], index: 2, kind: input, shape index: {}]   ;;  %s790_s4 = inlined_call_operand.vmem [shape: f32[1,32], index: 4, kind: input, shape index: {}]   ;;  %s791_s5 = inlined_call_operand.vmem [shape: f32[1,32], index: 5, kind: input, shape index: {}]   ;;  %s792_s6 = inlined_call_operand.vmem [shape: f32[1,32], index: 6, kind: input, shape index: {}]   ;;  %s793_s7 = inlined_call_operand.vmem [shape: f32[45,32], index: 7, kind: output, shape index: {}]  }
   0x1   :  { %v35_v0 = vld [vmem:[%s786_s1 + $0x18] sm:$0xff]  ;;  %v34_v1 = vld [vmem:[%s786_s1 + $0x10] sm:$0xff]  ;;  %v624_v2 = vld [vmem:[%s787_s0] sm:$0xff] }
   0x2   :  { %493 = vmatprep.subr.mxu0 %v35_v0  ;;  %v33_v3 = vld [vmem:[%s786_s1 + $0x8] sm:$0xff]  ;;  %501 = vmatprep.mubr.msk.f32.mxu0 %vm43_vm0, %v624_v2  ;;  %v32_v4 = vld [vmem:[%s786_s1] sm:$0xff]  ;;  %v642_v6 = vld [vmem:[%s787_s0 + $0x10] sm:$0xff] }
   0x3   :  { %494 = vmatpush3.msra.mxu0 %v35_v0  ;;  %v637_v5 = vld [vmem:[%s787_s0 + $0x8] sm:$0xff]  ;;  %v651_v7 = vld [vmem:[%s787_s0 + $0x18] sm:$0xff]  ;;  %v656_v8 = vld [vmem:[%s787_s0 + $0x20] sm:$0xff] }
   0x4   :  { %495 = vmatprep.subr.mxu0 %v34_v1  ;;  %v665_v9 = vld [vmem:[%s787_s0 + $0x28] sm:$0x1f]  ;;  %v226_v10 = vld [vmem:[%s788_s3 + $0x78] sm:$0xff]  ;;  %v225_v11 = vld [vmem:[%s788_s3 + $0x70] sm:$0xff] }
   0x5   :  { %496 = vmatpush3.msra.mxu0 %v34_v1  ;;  %510 = vmatprep.subr.mxu1 %v226_v10  ;;  %v224_v12 = vld [vmem:[%s788_s3 + $0x68] sm:$0xff]  ;;  %v223_v13 = vld [vmem:[%s788_s3 + $0x60] sm:$0xff]  ;;  %v222_v14 = vld [vmem:[%s788_s3 + $0x58] sm:$0xff] }
   0x6   :  { %497 = vmatprep.subr.mxu0 %v33_v3  ;;  %511 = vmatpush3.msra.mxu1 %v226_v10  ;;  %v221_v15 = vld [vmem:[%s788_s3 + $0x50] sm:$0xff]  ;;  %v220_v16 = vld [vmem:[%s788_s3 + $0x48] sm:$0xff]  ;;  %v219_v17 = vld [vmem:[%s788_s3 + $0x40] sm:$0xff] }
   0x7   :  { %498 = vmatpush3.msra.mxu0 %v33_v3  ;;  %512 = vmatprep.subr.mxu1 %v225_v11  ;;  %v218_v18 = vld [vmem:[%s788_s3 + $0x38] sm:$0xff]  ;;  %v217_v19 = vld [vmem:[%s788_s3 + $0x30] sm:$0xff]  ;;  %v216_v20 = vld [vmem:[%s788_s3 + $0x28] sm:$0xff] }
   0x8   :  { %499 = vmatprep.subr.mxu0 %v32_v4  ;;  %513 = vmatpush3.msra.mxu1 %v225_v11  ;;  %v215_v21 = vld [vmem:[%s788_s3 + $0x20] sm:$0xff]  ;;  %v214_v22 = vld [vmem:[%s788_s3 + $0x18] sm:$0xff]  ;;  %v213_v23 = vld [vmem:[%s788_s3 + $0x10] sm:$0xff] }
   0x9   :  { %500 = vmatpush3.msra.mxu0 %v32_v4  ;;  %514 = vmatprep.subr.mxu1 %v224_v12  ;;  %v212_v24 = vld [vmem:[%s788_s3 + $0x8] sm:$0xff]  ;;  %v211_v25 = vld [vmem:[%s788_s3] sm:$0xff] }
   0xa   :  { %502 = vmatmul.mubr.msk.f32.vlgmr.msra.gmra.mxu0 %vm43_vm0, %v637_v5  ;;  %515 = vmatpush3.msra.mxu1 %v224_v12  ;;  %v451_v26 = vld [vmem:[%s789_s2] ss:$0 sm:$0xff] }
   0xb   :  { %504 = vmatprep.mubr.msk.f32.mxu0 %vm43_vm0, %v642_v6  ;;  %516 = vmatprep.subr.mxu1 %v223_v13 }
   0xc   :  { %517 = vmatpush3.msra.mxu1 %v223_v13 }
   0xd   :  { %518 = vmatprep.subr.mxu1 %v222_v14 }
   0xe   :  { %505 = vmatmul.mubr.msk.f32.gmra.mxu0 %vm43_vm0, %v651_v7  ;;  %519 = vmatpush3.msra.mxu1 %v222_v14 }
   0xf   :  { %507 = vmatprep.mubr.msk.f32.mxu0 %vm43_vm0, %v656_v8  ;;  %520 = vmatprep.subr.mxu1 %v221_v15 }
  0x10   :  { %521 = vmatpush3.msra.mxu1 %v221_v15 }
  0x11   :  { %522 = vmatprep.subr.mxu1 %v220_v16 }
  0x12   :  { %508 = vmatmul.mubr.msk.f32.gmra.mxu0 %vm43_vm0, %v665_v9  ;;  %523 = vmatpush3.msra.mxu1 %v220_v16 }
  0x13   :  { %524 = vmatprep.subr.mxu1 %v219_v17 }
  0x14   :  { %525 = vmatpush3.msra.mxu1 %v219_v17 }
  0x15   :  { %526 = vmatprep.subr.mxu1 %v218_v18 }
  0x16   :  { %527 = vmatpush3.msra.mxu1 %v218_v18 }
  0x17   :  { %528 = vmatprep.subr.mxu1 %v217_v19 }
  0x18   :  { %529 = vmatpush3.msra.mxu1 %v217_v19 }
  0x19   :  { %530 = vmatprep.subr.mxu1 %v216_v20 }
  0x1a   :  { %531 = vmatpush3.msra.mxu1 %v216_v20 }
  0x1b   :  { %532 = vmatprep.subr.mxu1 %v215_v21 }
  0x1c   :  { %533 = vmatpush3.msra.mxu1 %v215_v21 }
  0x1d   :  { %534 = vmatprep.subr.mxu1 %v214_v22 }
  0x1e   :  { %535 = vmatpush3.msra.mxu1 %v214_v22 }
  0x1f   :  { %536 = vmatprep.subr.mxu1 %v213_v23 }
  0x20   :  { %537 = vmatpush3.msra.mxu1 %v213_v23 }
  0x21   :  { %538 = vmatprep.subr.mxu1 %v212_v24 }
  0x22   :  { %539 = vmatpush3.msra.mxu1 %v212_v24 }
  0x23   :  { %540 = vmatprep.subr.mxu1 %v211_v25 }
  0x24   :  { %541 = vmatpush3.msra.mxu1 %v211_v25 }
  0xca   :  { %v503_v27 = vpop.f32.mrf.mxu0 }
  0xcb   :  { %v134_v28 = vadd.f32 %v503_v27, %v451_v26 }
  0xcc   :  { %v128_v29 = vpop.f32.mrf.mxu0 }
  0xcd   :  { %v158_v30 = vmul.f32 %v134_v28, %v134_v28  ;;  %v129_v31 = vadd.f32 %v451_v26, %v128_v29 }
  0xce   :  { %v506_v32 = vpop.f32.mrf.mxu0 }
  0xcf   :  { %v164_v33 = vmul.f32 %v158_v30, %v134_v28  ;;  %v157_v34 = vmul.f32 %v129_v31, %v129_v31  ;;  %v144_v35 = vadd.f32 %v506_v32, %v451_v26 }
  0xd0   :  { %v138_v36 = vpop.f32.mrf.mxu0 }
  0xd1   :  { %v170_v37 = vmul.f32 0.044715, %v164_v33  ;;  %v163_v38 = vmul.f32 %v157_v34, %v129_v31  ;;  %v160_v39 = vmul.f32 %v144_v35, %v144_v35  ;;  %v139_v40 = vadd.f32 %v451_v26, %v138_v36 }
  0xd2   :  { %v509_v41 = vpop.f32.mrf.mxu0 }
  0xd3   :  { %v176_v42 = vadd.f32 %v170_v37, %v134_v28  ;;  %v166_v43 = vmul.f32 %v160_v39, %v144_v35  ;;  %v159_v44 = vmul.f32 %v139_v40, %v139_v40  ;;  %v154_v45 = vadd.f32 %v509_v41, %v451_v26 }
  0xd4   :  { %v148_v46 = vpop.f32.mrf.mxu0  ;;  %v169_v47 = vmul.f32 0.044715, %v163_v38 }
  0xd5   :  { %v182_v48 = vmul.f32 0.7978846, %v176_v42  ;;  %v172_v49 = vmul.f32 0.044715, %v166_v43  ;;  %v165_v50 = vmul.f32 %v159_v44, %v139_v40  ;;  %v162_v51 = vmul.f32 %v154_v45, %v154_v45 }
  0xd6   :  { %v149_v52 = vadd.f32 %v451_v26, %v148_v46  ;;  %v175_v53 = vadd.f32 %v169_v47, %v129_v31 }
  0xd7   :  { %551 = vtanh.f32 %v182_v48  ;;  %v178_v54 = vadd.f32 %v172_v49, %v144_v35  ;;  %v171_v55 = vmul.f32 0.044715, %v165_v50  ;;  %v168_v56 = vmul.f32 %v162_v51, %v154_v45 }
  0xd8   :  { %v161_v57 = vmul.f32 %v149_v52, %v149_v52  ;;  %v181_v58 = vmul.f32 0.7978846, %v175_v53 }
  0xd9   :  { %v184_v59 = vmul.f32 0.7978846, %v178_v54  ;;  %v177_v60 = vadd.f32 %v171_v55, %v139_v40  ;;  %v174_v61 = vmul.f32 0.044715, %v168_v56 }
  0xda   :  { %v167_v62 = vmul.f32 %v161_v57, %v149_v52  ;;  %553 = vtanh.f32 %v181_v58 }
  0xdb   :  { %555 = vtanh.f32 %v184_v59  ;;  %v183_v63 = vmul.f32 0.7978846, %v177_v60  ;;  %v180_v0 = vadd.f32 %v174_v61, %v154_v45 }
  0xdc   :  { %v173_v1 = vmul.f32 0.044715, %v167_v62 }
  0xdd   :  { %557 = vtanh.f32 %v183_v63  ;;  %v186_v3 = vmul.f32 0.7978846, %v180_v0 }
  0xde   :  { %v179_v4 = vadd.f32 %v173_v1, %v149_v52 }
  0xdf   :  { %559 = vtanh.f32 %v186_v3 }
  0xe0   :  { %v185_v10 = vmul.f32 0.7978846, %v179_v4 }
  0xe2   :  { %561 = vtanh.f32 %v185_v10 }
  0xe4   :  { %v552_v11 = vpop.eup %551 }
  0xe5   :  { %v194_v12 = vadd.f32 1.0, %v552_v11 }
  0xe7   :  { %v554_v13 = vpop.eup %553  ;;  %v200_v16 = vmul.f32 0.5, %v194_v12 }
  0xe8   :  { %v556_v14 = vpop.eup %555  ;;  %v193_v15 = vadd.f32 1.0, %v554_v13 }
  0xe9   :  { %v196_v17 = vadd.f32 1.0, %v556_v14  ;;  %v206_v23 = vmul.f32 %v200_v16, %v134_v28  ;;  %v458_v28 = vld [vmem:[%s790_s4] ss:$0 sm:$0xff] }
  0xea   :  { %v558_v18 = vpop.eup %557  ;;  %v199_v19 = vmul.f32 0.5, %v193_v15 }
  0xeb   :  { %v195_v20 = vadd.f32 1.0, %v558_v18  ;;  %v202_v25 = vmul.f32 0.5, %v196_v17 }
  0xec   :  { %v560_v21 = vpop.eup %559  ;;  %v205_v22 = vmul.f32 %v199_v19, %v129_v31 }
  0xed   :  { %v201_v24 = vmul.f32 0.5, %v195_v20  ;;  %v198_v26 = vadd.f32 1.0, %v560_v21  ;;  %v208_v32 = vmul.f32 %v202_v25, %v144_v35 }
  0xee   :  { %542 = vmatprep.mubr.f32.mxu1 %v205_v22 }
  0xef   :  { %v562_v27 = vpop.eup %561  ;;  %543 = vmatmul.mubr.f32.vlgmr.msra.gmra.mxu1 %v206_v23  ;;  %v207_v29 = vmul.f32 %v201_v24, %v139_v40  ;;  %v204_v33 = vmul.f32 0.5, %v198_v26 }
  0xf0   :  { %v197_v30 = vadd.f32 1.0, %v562_v27 }
  0xf1   :  { %545 = vmatprep.mubr.f32.mxu1 %v207_v29  ;;  %v210_v37 = vmul.f32 %v204_v33, %v154_v45 }
  0xf2   :  { %v203_v34 = vmul.f32 0.5, %v197_v30 }
  0xf3   :  { %546 = vmatmul.mubr.f32.gmra.mxu1 %v208_v32 }
  0xf4   :  { %v209_v36 = vmul.f32 %v203_v34, %v149_v52 }
  0xf6   :  { %548 = vmatprep.mubr.f32.mxu1 %v209_v36 }
  0xf7   :  { %549 = vmatmul.mubr.f32.gmra.mxu1 %v210_v37 }
 0x1af   :  { %v544_v31 = vpop.f32.mrf.mxu1 }
 0x1b0   :  { %v306_v38 = vadd.f32 %v544_v31, %v458_v28 }
 0x1b1   :  { %v300_v39 = vpop.f32.mrf.mxu1 }
 0x1b2   :  { %v301_v41 = vadd.f32 %v458_v28, %v300_v39  ;;  %v330_v40 = vadd.f32 %v306_v38, %v637_v5 }
 0x1b3   :  { %v547_v42 = vpop.f32.mrf.mxu1 }
 0x1b4   :  { %v316_v43 = vadd.f32 %v547_v42, %v458_v28  ;;  %v338_v35 = vsel %vm43_vm0, %v330_v40, 0.0  ;;  %v329_v44 = vadd.f32 %v301_v41, %v624_v2 }
 0x1b5   :  { %339 = vadd.xlane.f32.xlu0 %v338_v35  ;;  %v310_v45 = vpop.f32.mrf.mxu1 }
 0x1b6   :  { %v311_v46 = vadd.f32 %v458_v28, %v310_v45  ;;  %v332_v47 = vadd.f32 %v316_v43, %v651_v7  ;;  %v335_v51 = vsel %vm43_vm0, %v329_v44, 0.0  ;;  %v459_v45 = vld [vmem:[%s791_s5] ss:$0 sm:$0xff] }
 0x1b7   :  { %v550_v48 = vpop.f32.mrf.mxu1 }
 0x1b8   :  { %v326_v49 = vadd.f32 %v550_v48, %v458_v28  ;;  %v344_v50 = vsel %vm43_vm0, %v332_v47, 0.0  ;;  %v331_v52 = vadd.f32 %v311_v46, %v642_v6 }
 0x1b9   :  { %345 = vadd.xlane.f32.xlu1 %v344_v50  ;;  %v320_v5 = vpop.f32.mrf.mxu1  ;;  %336 = vadd.xlane.f32.xlu0 %v335_v51 }
 0x1ba   :  { %v321_v53 = vadd.f32 %v458_v28, %v320_v5  ;;  %v341_v54 = vsel %vm43_vm0, %v331_v52, 0.0  ;;  %v334_v55 = vadd.f32 %v326_v49, %v665_v9 }
 0x1bc   :  { %v333_v2 = vadd.f32 %v321_v53, %v656_v8  ;;  %v351_v56 = vsel %vm350_vm1, %v334_v55, 0.0 }
 0x1bd   :  { %342 = vadd.xlane.f32.xlu1 %v341_v54 }
 0x1be   :  { %v347_v7 = vsel %vm43_vm0, %v333_v2, 0.0 }
 0x1bf   :  { %348 = vadd.xlane.f32.xlu0 %v347_v7 }
 0x1c1   :  { %352 = vadd.xlane.f32.xlu1 %v351_v56 }
 0x23e   :  { %v340_v57 = vpop.xlane.xlu0 %339 }
 0x23f   :  { %v356_v6 = vmul.f32 0.03125, %v340_v57 }
 0x241   :  { %v362_v58 = vsub.f32 %v330_v40, %v356_v6 }
 0x242   :  { %v346_v59 = vpop.xlane.xlu1 %345  ;;  %v337_v60 = vpop.xlane.xlu0 %336 }
 0x243   :  { %v358_v61 = vmul.f32 0.03125, %v346_v59  ;;  %v355_v62 = vmul.f32 0.03125, %v337_v60  ;;  %v368_v63 = vmul.f32 %v362_v58, %v362_v58 }
 0x245   :  { %v735_v0 = vsub.f32 %v332_v47, %v358_v61  ;;  %v737_v8 = vsub.f32 %v329_v44, %v355_v62  ;;  %v376_v9 = vsel %vm43_vm0, %v368_v63, 0.0  ;;  %v460_v47 = vld [vmem:[%s792_s6] ss:$0 sm:$0xff] }
 0x246   :  { %377 = vadd.xlane.f32.xlu1 %v376_v9  ;;  %v343_v1 = vpop.xlane.xlu1 %342 }
 0x247   :  { %v357_v3 = vmul.f32 0.03125, %v343_v1  ;;  %v370_v4 = vmul.f32 %v735_v0, %v735_v0  ;;  %v367_v10 = vmul.f32 %v737_v8, %v737_v8 }
 0x248   :  { %v349_v11 = vpop.xlane.xlu0 %348 }
 0x249   :  { %v363_v12 = vsub.f32 %v331_v52, %v357_v3  ;;  %v359_v13 = vmul.f32 0.03125, %v349_v11  ;;  %v382_v14 = vsel %vm43_vm0, %v370_v4, 0.0  ;;  %v373_v15 = vsel %vm43_vm0, %v367_v10, 0.0 }
 0x24a   :  { %383 = vadd.xlane.f32.xlu1 %v382_v14  ;;  %v353_v16 = vpop.xlane.xlu1 %352  ;;  %374 = vadd.xlane.f32.xlu0 %v373_v15 }
 0x24b   :  { %v746_v17 = vsub.f32 %v333_v2, %v359_v13  ;;  %v360_v18 = vmul.f32 0.03125, %v353_v16  ;;  %v369_v19 = vmul.f32 %v363_v12, %v363_v12 }
 0x24d   :  { %v366_v20 = vsub.f32 %v334_v55, %v360_v18  ;;  %v379_v21 = vsel %vm43_vm0, %v369_v19, 0.0  ;;  %v371_v22 = vmul.f32 %v746_v17, %v746_v17 }
 0x24e   :  { %380 = vadd.xlane.f32.xlu0 %v379_v21 }
 0x24f   :  { %v372_v23 = vmul.f32 %v366_v20, %v366_v20  ;;  %v385_v25 = vsel %vm43_vm0, %v371_v22, 0.0 }
 0x251   :  { %v388_v24 = vsel %vm350_vm1, %v372_v23, 0.0 }
 0x252   :  { %389 = vadd.xlane.f32.xlu1 %v388_v24  ;;  %386 = vadd.xlane.f32.xlu0 %v385_v25 }
 0x2cf   :  { %v378_v26 = vpop.xlane.xlu1 %377 }
 0x2d0   :  { %v392_v27 = vmul.f32 0.03125, %v378_v26 }
 0x2d2   :  { %v398_v29 = vadd.f32 1e-12, %v392_v27 }
 0x2d3   :  { %v384_v30 = vpop.xlane.xlu1 %383  ;;  %v375_v32 = vpop.xlane.xlu0 %374 }
 0x2d4   :  { %563 = vrsqrt.f32 %v398_v29  ;;  %v394_v33 = vmul.f32 0.03125, %v384_v30  ;;  %v391_v34 = vmul.f32 0.03125, %v375_v32 }
 0x2d6   :  { %v400_v36 = vadd.f32 1e-12, %v394_v33  ;;  %v397_v37 = vadd.f32 1e-12, %v391_v34 }
 0x2d7   :  { %v381_v28 = vpop.xlane.xlu0 %380 }
 0x2d8   :  { %565 = vrsqrt.f32 %v400_v36  ;;  %v393_v31 = vmul.f32 0.03125, %v381_v28 }
 0x2d9   :  { %567 = vrsqrt.f32 %v397_v37 }
 0x2da   :  { %v399_v38 = vadd.f32 1e-12, %v393_v31 }
 0x2db   :  { %v390_v39 = vpop.xlane.xlu1 %389  ;;  %v387_v41 = vpop.xlane.xlu0 %386 }
 0x2dc   :  { %569 = vrsqrt.f32 %v399_v38  ;;  %v396_v40 = vmul.f32 0.03125, %v390_v39  ;;  %v395_v42 = vmul.f32 0.03125, %v387_v41 }
 0x2de   :  { %v402_v43 = vadd.f32 1e-12, %v396_v40  ;;  %v401_v35 = vadd.f32 1e-12, %v395_v42 }
 0x2e0   :  { %571 = vrsqrt.f32 %v402_v43 }
 0x2e1   :  { %v564_v44 = vpop.eup %563  ;;  %573 = vrsqrt.f32 %v401_v35 }
 0x2e2   :  { %v410_v46 = vmul.f32 %v564_v44, %v362_v58 }
 0x2e4   :  { %v423_v48 = vmul.f32 %v459_v45, %v410_v46 }
 0x2e5   :  { %v566_v49 = vpop.eup %565 }
 0x2e6   :  { %v568_v50 = vpop.eup %567  ;;  %v436_v51 = vadd.f32 %v460_v47, %v423_v48  ;;  %v412_v52 = vmul.f32 %v566_v49, %v735_v0 }
 0x2e7   :  { %v409_v5 = vmul.f32 %v568_v50, %v737_v8 }
 0x2e8   :  { %442 = vst.msk [vmem:[%s793_s7 + $0x8] sm:$0xff] %vm43_vm0, %v436_v51  ;;  %v425_v53 = vmul.f32 %v459_v45, %v412_v52 }
 0x2e9   :  { %v570_v54 = vpop.eup %569  ;;  %v422_v2 = vmul.f32 %v459_v45, %v409_v5 }
 0x2ea   :  { %v438_v55 = vadd.f32 %v460_v47, %v425_v53  ;;  %v411_v7 = vmul.f32 %v570_v54, %v363_v12 }
 0x2eb   :  { %v435_v56 = vadd.f32 %v460_v47, %v422_v2 }
 0x2ec   :  { %444 = vst.msk [vmem:[%s793_s7 + $0x18] sm:$0xff] %vm43_vm0, %v438_v55  ;;  %v424_v57 = vmul.f32 %v459_v45, %v411_v7 }
 0x2ed   :  { %v572_v6 = vpop.eup %571  ;;  %441 = vst.msk [vmem:[%s793_s7] sm:$0xff] %vm43_vm0, %v435_v56 }
 0x2ee   :  { %v574_v58 = vpop.eup %573  ;;  %v437_v59 = vadd.f32 %v460_v47, %v424_v57  ;;  %v414_v60 = vmul.f32 %v572_v6, %v366_v20 }
 0x2ef   :  { %v413_v61 = vmul.f32 %v574_v58, %v746_v17 }
 0x2f0   :  { %443 = vst.msk [vmem:[%s793_s7 + $0x10] sm:$0xff] %vm43_vm0, %v437_v59  ;;  %v427_v62 = vmul.f32 %v459_v45, %v414_v60 }
 0x2f1   :  { %v426_v63 = vmul.f32 %v459_v45, %v413_v61 }
 0x2f2   :  { %v440_v0 = vadd.f32 %v460_v47, %v427_v62 }
 0x2f3   :  { %v439_v8 = vadd.f32 %v460_v47, %v426_v63 }
 0x2f4   :  { %446 = vst.msk [vmem:[%s793_s7 + $0x28] sm:$0x1f] %vm350_vm1, %v440_v0 }
 0x2f5   :  { %445 = vst.msk [vmem:[%s793_s7 + $0x20] sm:$0xff] %vm43_vm0, %v439_v8 }

// kernel: _device_forward.57
= control target key start
LH: loop header
LB: loop body
LE: loop exit
PB: predicated region body
PF: predicated region fallthrough
CT: control target
= control target key end

     0   :  { %v126_v0 = vmov 0.0   ;;  %vm127_vm0 = vmmov 0   ;;  %vm26_vm1 = vcmask 261120   ;;  %vm100_vm2 = vcmask 26624   ;;  %s169_s1 = inlined_call_operand.vmem [shape: f32[32,4], index: 1, kind: input, shape index: {}]   ;;  %s170_s0 = inlined_call_operand.vmem [shape: f32[3,32], index: 0, kind: input, shape index: {}]   ;;  %s171_s2 = inlined_call_operand.vmem [shape: f32[1,4], index: 2, kind: input, shape index: {}]   ;;  %s172_s3 = inlined_call_operand.vmem [shape: f32[3,4], index: 3, kind: output, shape index: {}]  }
   0x1   :  { %113 = vmatprep.subr.mxu0 %v126_v0  ;;  %v18_v1 = vld [vmem:[%s169_s1 + $0x18] sm:$0xff]  ;;  %v17_v2 = vld [vmem:[%s169_s1 + $0x10] sm:$0xff]  ;;  %121 = vmatprep.mubr.msk.f32.mxu0 %vm127_vm0, %v126_v0  ;;  %v16_v3 = vld [vmem:[%s169_s1 + $0x8] sm:$0xff] }
   0x2   :  { %114 = vmatpush3.msra.mxu0 %v18_v1  ;;  %v15_v4 = vld [vmem:[%s169_s1] sm:$0xff] }
   0x3   :  { %115 = vmatprep.subr.mxu0 %v126_v0  ;;  %v14_v5 = vld [vmem:[%s170_s0] sm:$0x7] }
   0x4   :  { %116 = vmatpush3.msra.mxu0 %v17_v2  ;;  %v106_v6 = vld [vmem:[%s171_s2] ss:$0 sm:$0xff] }
   0x5   :  { %117 = vmatprep.subr.mxu0 %v126_v0 }
   0x6   :  { %118 = vmatpush3.msra.mxu0 %v16_v3 }
   0x7   :  { %119 = vmatprep.subr.mxu0 %v126_v0 }
   0x8   :  { %120 = vmatpush3.msra.mxu0 %v15_v4 }
   0x9   :  { %122 = vmatmul.mubr.msk.f32.vlgmr.msra.gmra.mxu0 %vm26_vm1, %v14_v5 }
  0xc9   :  { %v96_v7 = vpop.f32.mrf.mxu0 }
  0xca   :  { %v97_v8 = vadd.f32 %v106_v6, %v96_v7 }
  0xcb   :  { %v123_v9 = vpop.f32.mrf.mxu0 }
  0xcc   :  { %101 = vst.msk [vmem:[%s172_s3] sm:$0x7] %vm100_vm2, %v97_v8 }

</bundles_post_ra>
